<compile_context>
chip_gen: v7x
topology: tpu7x:2x2x1
jax: 0.10.0
libtpu: 0.0.40
codegen_flags: <defaults>
</compile_context>

<pallas_src>
import functools
import math

import jax
import jax.numpy as jnp
import numpy as np
from jax.experimental import pallas as pl
from jax.experimental.pallas import tpu as pltpu

EPS = 1e-5          # nn.BatchNorm2d default eps
LANE = 128          # conv output channels are zero-padded to a multiple of this
ROW_TILE = 512      # preferred row (sublane) tile
COL_TILE = 512      # preferred channel (lane) tile
K_TILE_MAX = 1024   # max reduction tile of the conv matmul


# ------------------------------ small helpers ------------------------------ #

def _rup(x, m):
    return ((x + m - 1) // m) * m


def _row_tile(m, preferred=ROW_TILE):
    """(tile, padded_rows): tile is a multiple of 16 (bf16 sublane packing), <= preferred.
    Rows are zero-padded up to a tile multiple so a non-divisible M never degenerates
    into one huge block (bounded VMEM on v7x's 64 MiB part)."""
    tm = min(preferred, _rup(m, 16))
    return tm, _rup(m, tm)


def _col_tile(c, preferred=COL_TILE):
    if c <= preferred:
        return c
    for t in (512, 256, 128):
        if c % t == 0:
            return t
    return c


def _pad_rows(a, rows):
    return a if a.shape[0] == rows else jnp.pad(a, ((0, rows - a.shape[0]), (0, 0)))


def _pad_tail(v, n):
    return v if v.shape[0] == n else jnp.pad(v, (0, n - v.shape[0]))


# ----------------------------- Pallas kernels ------------------------------ #

def matmul_stats_kernel(a_ref, b_ref, o_ref, psum_ref, psq_ref, acc_ref):
    """(TM, TK)bf16 @ (TK, TN)bf16 with f32 accumulation; K is the innermost reduction
    axis.  The finalize also emits per-(row-tile, channel) partial sums and sums of
    squares of the f32 result so BatchNorm statistics need no extra pass over HBM."""
    @pl.when(pl.program_id(2) == 0)
    def _():
        acc_ref[...] = jnp.zeros_like(acc_ref)

    acc_ref[...] += jnp.dot(a_ref[...], b_ref[...],
                            preferred_element_type=jnp.float32)

    @pl.when(pl.program_id(2) == pl.num_programs(2) - 1)
    def _():
        acc = acc_ref[...]
        o_ref[...] = acc
        psum_ref[...] = jnp.sum(acc, axis=0, keepdims=True)
        psq_ref[...] = jnp.sum(acc * acc, axis=0, keepdims=True)


def bn_act_kernel(y_ref, scale_ref, shift_ref, o_ref):
    # bn1 path: relu(y * scale + shift)
    o_ref[...] = jnp.maximum(y_ref[...] * scale_ref[...] + shift_ref[...], 0.0)


def bn_res_act_kernel(y_ref, xs_ref, wd_ref, bd_ref, scale_ref, shift_ref, o_ref):
    # bn2 path: relu(bn2(conv2) + downsample(x)); the 1x1 stride-2 downsample conv is a
    # small per-tile matmul over the REAL input channels riding on spare MXU cycles.
    res = jnp.dot(xs_ref[...], wd_ref[...],
                  preferred_element_type=jnp.float32) + bd_ref[...]
    o_ref[...] = jnp.maximum(y_ref[...] * scale_ref[...] + shift_ref[...] + res, 0.0)


def avgpool_kernel(x_ref, o_ref, *, inv):
    @pl.when(pl.program_id(1) == 0)
    def _():
        o_ref[...] = jnp.zeros_like(o_ref)

    o_ref[...] += jnp.sum(x_ref[...], axis=1)

    @pl.when(pl.program_id(1) == pl.num_programs(1) - 1)
    def _():
        o_ref[...] *= inv


# --------------------------- Pallas-backed layers --------------------------- #

def matmul_stats_pallas(a, b):
    """a: (M, K) f32, b: (K, Np) f32 (Np a multiple of 128).
    Returns (y (Mpad, Np) f32, chan_sum (Np,), chan_sumsq (Np,)).
    Operands go to the MXU in bf16 with f32 accumulation; zero-padded rows contribute
    exactly zero to the channel statistics."""
    M, K = a.shape
    Np = b.shape[1]
    if K <= K_TILE_MAX:
        tk, kp = K, K
    else:
        kp = _rup(K, LANE)
        tk = 512 if kp % 512 == 0 else (256 if kp % 256 == 0 else 128)
        a = jnp.pad(a, ((0, 0), (0, kp - K)))
        b = jnp.pad(b, ((0, kp - K), (0, 0)))
    tm, mpad = _row_tile(M)
    tn = _col_tile(Np)
    a = _pad_rows(a, mpad).astype(jnp.bfloat16)
    b = b.astype(jnp.bfloat16)
    n_m = mpad // tm
    grid = (n_m, Np // tn, kp // tk)
    y, psum, psq = pl.pallas_call(
        matmul_stats_kernel,
        out_shape=(jax.ShapeDtypeStruct((mpad, Np), jnp.float32),
                   jax.ShapeDtypeStruct((n_m, Np), jnp.float32),
                   jax.ShapeDtypeStruct((n_m, Np), jnp.float32)),
        grid=grid,
        in_specs=[pl.BlockSpec((tm, tk), lambda i, j, k: (i, k)),
                  pl.BlockSpec((tk, tn), lambda i, j, k: (k, j))],
        out_specs=(pl.BlockSpec((tm, tn), lambda i, j, k: (i, j)),
                   pl.BlockSpec((1, tn), lambda i, j, k: (i, j)),
                   pl.BlockSpec((1, tn), lambda i, j, k: (i, j))),
        scratch_shapes=[pltpu.VMEM((tm, tn), jnp.float32)],
        compiler_params=pltpu.CompilerParams(
            dimension_semantics=("parallel", "parallel", "arbitrary")),
        cost_estimate=pl.CostEstimate(
            flops=2 * mpad * kp * Np, transcendentals=0,
            bytes_accessed=2 * (mpad * kp + kp * Np) + 4 * mpad * Np),
    )(a, b)
    return y, jnp.sum(psum, axis=0), jnp.sum(psq, axis=0)


def conv2d_stats_pallas(x, w, *, stride, padding, c_out_pad):
    """Conv2d (NHWC / HWIO, no bias: the following BN cancels it) via im2col + MXU
    matmul with fused BatchNorm statistics.
    Returns (y (Mpad, c_out_pad) f32 output rows, chan_sum, chan_sumsq, M, Ho, Wo)."""
    N, H, W, Cin = x.shape
    KH, KW, _, Cout = w.shape
    Ho = (H + 2 * padding - KH) // stride + 1
    Wo = (W + 2 * padding - KW) // stride + 1
    M = N * Ho * Wo
    xp = jnp.pad(x, ((0, 0), (padding, padding), (padding, padding), (0, 0)))
    # TODO(synk): im2col still materializes the (M, KH*KW*Cin) patch matrix in HBM
    # (bf16, i.e. half of the previous traffic); removing the KH*KW duplication needs
    # strided-window DMA from the raw input (memory_space=pl.ANY + manual copies).
    patches = [xp[:, kh:kh + stride * Ho:stride, kw:kw + stride * Wo:stride, :]
               for kh in range(KH) for kw in range(KW)]
    pat = jnp.stack(patches, axis=3).reshape(M, KH * KW * Cin)
    w2 = jnp.pad(w.reshape(KH * KW * Cin, Cout), ((0, 0), (0, c_out_pad - Cout)))
    y, csum, csq = matmul_stats_pallas(pat, w2)
    return y, csum, csq, M, Ho, Wo


def _bn_scale_shift(chan_sum, chan_sq, m, gamma_pad, beta_pad):
    """Fold training-mode batch statistics into per-channel (scale, shift) (tiny glue)."""
    mean = chan_sum / m
    # Biased variance via E[x^2] - E[x]^2; benign here because the convs feeding this
    # have no bias (near zero-mean outputs), so there is no large cancellation.
    var = chan_sq / m - mean * mean
    g_inv = gamma_pad * jax.lax.rsqrt(var + EPS)
    scale = g_inv.reshape(1, -1)
    shift = (beta_pad - mean * g_inv).reshape(1, -1)
    return scale, shift


def bn_relu_pallas(y2, scale, shift):
    Mp, C = y2.shape
    tm = min(ROW_TILE, Mp)
    tn = _col_tile(C)
    return pl.pallas_call(
        bn_act_kernel,
        out_shape=jax.ShapeDtypeStruct((Mp, C), jnp.float32),
        grid=(Mp // tm, C // tn),
        in_specs=[pl.BlockSpec((tm, tn), lambda i, j: (i, j)),
                  pl.BlockSpec((1, tn), lambda i, j: (0, j)),
                  pl.BlockSpec((1, tn), lambda i, j: (0, j))],
        out_specs=pl.BlockSpec((tm, tn), lambda i, j: (i, j)),
        compiler_params=pltpu.CompilerParams(
            dimension_semantics=("parallel", "parallel")),
        cost_estimate=pl.CostEstimate(
            flops=3 * Mp * C, transcendentals=0, bytes_accessed=8 * Mp * C),
    )(y2, scale, shift)


def bn_add_relu_pallas(y2, xs2, wd, bd, scale, shift):
    Mp, C = y2.shape
    cin = xs2.shape[1]
    tm = min(ROW_TILE, Mp)
    # tn = full padded C whenever it fits: wd/bd/scale/shift are then fetched once per
    # row tile instead of once per (i, j) step.
    tn = _col_tile(C)
    return pl.pallas_call(
        bn_res_act_kernel,
        out_shape=jax.ShapeDtypeStruct((Mp, C), jnp.float32),
        grid=(Mp // tm, C // tn),
        in_specs=[pl.BlockSpec((tm, tn), lambda i, j: (i, j)),    # conv2 output rows
                  pl.BlockSpec((tm, cin), lambda i, j: (i, 0)),   # stride-2 input rows (real channels)
                  pl.BlockSpec((cin, tn), lambda i, j: (0, j)),   # downsample weight
                  pl.BlockSpec((1, tn), lambda i, j: (0, j)),     # downsample bias
                  pl.BlockSpec((1, tn), lambda i, j: (0, j)),     # bn scale
                  pl.BlockSpec((1, tn), lambda i, j: (0, j))],    # bn shift
        out_specs=pl.BlockSpec((tm, tn), lambda i, j: (i, j)),
        compiler_params=pltpu.CompilerParams(
            dimension_semantics=("parallel", "parallel")),
        cost_estimate=pl.CostEstimate(
            flops=2 * Mp * cin * C + 4 * Mp * C, transcendentals=0,
            bytes_accessed=4 * (2 * Mp * C + Mp * cin + cin * C)),
    )(y2, xs2, wd, bd, scale, shift)


def avgpool_pallas(x_nhwc):
    """AdaptiveAvgPool2d((1,1)) + flatten.  Channel tiles on a leading 'parallel' grid
    axis (v7x's two TensorCores split them), spatial reduction on the inner axis."""
    N, H, W, C = x_nhwc.shape
    HW = H * W
    thw, hwpad = _row_tile(HW)
    x3 = x_nhwc.reshape(N, HW, C)
    if hwpad != HW:
        x3 = jnp.pad(x3, ((0, 0), (0, hwpad - HW), (0, 0)))
    tn = _col_tile(C)
    return pl.pallas_call(
        functools.partial(avgpool_kernel, inv=1.0 / HW),
        out_shape=jax.ShapeDtypeStruct((N, C), jnp.float32),
        grid=(C // tn, hwpad // thw),
        in_specs=[pl.BlockSpec((N, thw, tn), lambda c, t: (0, t, c))],
        out_specs=pl.BlockSpec((N, tn), lambda c, t: (0, c)),
        compiler_params=pltpu.CompilerParams(
            dimension_semantics=("parallel", "arbitrary")),
    )(x3)


# ------------------------------ Model assembly ------------------------------ #

def encoder_block_forward(x, p):
    """x: (N, H, W, c_in) f32 (real channels).  Returns (N, H/2, W/2, c_out) f32."""
    N, H, W, c_in = x.shape
    hid = p["w1"].shape[3]
    out_c = p["w2"].shape[3]
    hid_pad = _rup(hid, LANE)
    out_pad = _rup(out_c, LANE)

    # conv1 (4,2,1) with fused BN batch statistics, then bn1 + ReLU.
    y1, s1, q1, M1, Ho, Wo = conv2d_stats_pallas(
        x, p["w1"], stride=2, padding=1, c_out_pad=hid_pad)
    sc1, sh1 = _bn_scale_shift(s1, q1, M1, _pad_tail(p["g1"], hid_pad),
                               _pad_tail(p["be1"], hid_pad))
    h1 = bn_relu_pallas(y1, sc1, sh1)
    h1 = h1[:M1].reshape(N, Ho, Wo, hid_pad)[..., :hid]

    # conv2 (3,1,1) with fused BN batch statistics.
    y2, s2, q2, M2, Ho2, Wo2 = conv2d_stats_pallas(
        h1, p["w2"], stride=1, padding=1, c_out_pad=out_pad)
    sc2, sh2 = _bn_scale_shift(s2, q2, M2, _pad_tail(p["g2"], out_pad),
                               _pad_tail(p["be2"], out_pad))

    # Downsample (1x1, stride 2) fused into the bn2 + add + ReLU epilogue; only the
    # real input channels are streamed (padded to a sublane multiple of 8).
    cin_ds = max(8, _rup(c_in, 8))
    xs2 = x[:, ::2, ::2, :].reshape(M2, c_in)
    xs2 = jnp.pad(xs2, ((0, y2.shape[0] - M2), (0, cin_ds - c_in)))
    wd = jnp.pad(p["wd"].reshape(c_in, out_c),
                 ((0, cin_ds - c_in), (0, out_pad - out_c)))
    bd = _pad_tail(p["bd"], out_pad).reshape(1, out_pad)
    out = bn_add_relu_pallas(y2, xs2, wd, bd, sc2, sh2)
    return out[:M2].reshape(N, Ho2, Wo2, out_pad)[..., :out_c]


def encoder_forward(x_nchw, params):
    x = jnp.transpose(x_nchw, (0, 2, 3, 1))      # NCHW -> NHWC
    for p in params:
        x = encoder_block_forward(x, p)
    return avgpool_pallas(x)                     # (N, out_channels)


# ------------------------- Deterministic parameters ------------------------- #

def _conv_params(key, kh, kw, cin, cout):
    k1, k2 = jax.random.split(key)
    bound = 1.0 / math.sqrt(kh * kw * cin)
    w = jax.random.uniform(k1, (kh, kw, cin, cout), jnp.float32, -bound, bound)
    b = jax.random.uniform(k2, (cout,), jnp.float32, -bound, bound)
    return w, b


def _block_params(key, cin, hid, cout):
    ks = jax.random.split(key, 7)
    w1, b1 = _conv_params(ks[0], 4, 4, cin, hid)
    w2, b2 = _conv_params(ks[1], 3, 3, hid, cout)
    wd, bd = _conv_params(ks[2], 1, 1, cin, cout)
    g1 = jax.random.uniform(ks[3], (hid,), jnp.float32, 0.5, 1.5)
    be1 = jax.random.uniform(ks[4], (hid,), jnp.float32, -0.1, 0.1)
    g2 = jax.random.uniform(ks[5], (cout,), jnp.float32, 0.5, 1.5)
    be2 = jax.random.uniform(ks[6], (cout,), jnp.float32, -0.1, 0.1)
    return dict(w1=w1, b1=b1, w2=w2, b2=b2, wd=wd, bd=bd,
                g1=g1, be1=be1, g2=g2, be2=be2)


def make_encoder_params(key, in_channels, out_channels, hidden_channels, num_blocks):
    keys = jax.random.split(key, num_blocks)
    configs = [(in_channels, hidden_channels, 32)]
    in_ch = 32
    for _ in range(num_blocks - 2):
        out_ch = min(512, 2 * in_ch)
        configs.append((in_ch, hidden_channels, out_ch))
        in_ch = out_ch
    configs.append((in_ch, hidden_channels, out_channels))
    return [_block_params(k, *cfg) for k, cfg in zip(keys, configs)]


# --------------------------- Pure-JAX reference ----------------------------- #

def _conv_ref(x, w, b, s, p, bf16_ops=False):
    if bf16_ops:
        x = x.astype(jnp.bfloat16).astype(jnp.float32)
        w = w.astype(jnp.bfloat16).astype(jnp.float32)
    return jax.lax.conv_general_dilated(
        x, w, (s, s), [(p, p), (p, p)],
        dimension_numbers=("NHWC", "HWIO", "NHWC"),
        preferred_element_type=jnp.float32) + b


def _bn_ref(y, g, b):
    mean = y.mean(axis=(0, 1, 2), keepdims=True)
    var = jnp.square(y - mean).mean(axis=(0, 1, 2), keepdims=True)
    return (y - mean) * jax.lax.rsqrt(var + EPS) * g + b


def _encoder_ref(x_nchw, params, bf16_ops=False):
    x = jnp.transpose(x_nchw, (0, 2, 3, 1))
    for p in params:
        out = jax.nn.relu(_bn_ref(_conv_ref(x, p["w1"], p["b1"], 2, 1, bf16_ops),
                                  p["g1"], p["be1"]))
        out = _bn_ref(_conv_ref(out, p["w2"], p["b2"], 1, 1, bf16_ops),
                      p["g2"], p["be2"])
        res = _conv_ref(x, p["wd"], p["bd"], 2, 0)   # downsample stays f32 in the kernel too
        x = jax.nn.relu(out + res)
    return x.mean(axis=(1, 2))


# ---------------------------------- main ------------------------------------ #

if __name__ == "__main__":
    # Small configuration consistent with the module.  size=32 keeps the last
    # BatchNorm's batch statistics well conditioned (N * 4 * 4 = 32 samples).
    batch = 2
    in_channels = 3
    hidden_channels = 8
    out_channels = 64
    num_blocks = 3
    size = 32
    assert math.log2(size) >= num_blocks

    key = jax.random.PRNGKey(0)
    kx, kp = jax.random.split(key)
    x = jax.random.normal(kx, (batch, in_channels, size, size), jnp.float32)  # NCHW
    params = make_encoder_params(kp, in_channels, out_channels, hidden_channels, num_blocks)

    out = jax.jit(encoder_forward)(x, params)
    out = jax.block_until_ready(out)
    assert out.shape == (batch, out_channels), out.shape

    # The kernel uses bf16 MXU operands (f32 accumulation) for conv1/conv2, so the
    # tolerance against the pure-f32 module reference is set to the bf16 operand
    # precision accumulated over the three blocks.
    ref = _encoder_ref(x, params)
    np.testing.assert_allclose(np.asarray(out), np.asarray(ref), rtol=5e-2, atol=5e-2)

    print("KERNEL_OK")
</pallas_src>

<mosaic_0001>
module attributes {stable_mosaic.version = 11 : i64} {
  func.func @bn_act_kernel(%arg0: i32, %arg1: i32, %arg2: memref<512x128xf32, #tpu.memory_space<vmem>>, %arg3: memref<1x128xf32, #tpu.memory_space<vmem>>, %arg4: memref<1x128xf32, #tpu.memory_space<vmem>>, %arg5: memref<512x128xf32, #tpu.memory_space<vmem>>) attributes {dimension_semantics = [#tpu.dimension_semantics<parallel>, #tpu.dimension_semantics<parallel>], iteration_bounds = array<i64: 1, 1>, scalar_prefetch = 0 : i64, scratch_operands = 0 : i64, tpu.core_type = #tpu.core_type<tc>, window_params = [{transform_indices = @transform_0, window_bounds = array<i64: 512, 128>}, {transform_indices = @transform_1, window_bounds = array<i64: 1, 128>}, {transform_indices = @transform_2, window_bounds = array<i64: 1, 128>}, {transform_indices = @transform_3, window_bounds = array<i64: 512, 128>}]} {
    %c0 = arith.constant 0 : index
    %c0_0 = arith.constant 0 : index
    %0 = vector.load %arg2[%c0, %c0_0] : memref<512x128xf32, #tpu.memory_space<vmem>>, vector<512x128xf32>
    %c0_1 = arith.constant 0 : index
    %c0_2 = arith.constant 0 : index
    %1 = vector.load %arg3[%c0_1, %c0_2] : memref<1x128xf32, #tpu.memory_space<vmem>>, vector<1x128xf32>
    %2 = vector.broadcast %1 : vector<1x128xf32> to vector<512x128xf32>
    %3 = arith.mulf %0, %2 : vector<512x128xf32>
    %c0_3 = arith.constant 0 : index
    %c0_4 = arith.constant 0 : index
    %4 = vector.load %arg4[%c0_3, %c0_4] : memref<1x128xf32, #tpu.memory_space<vmem>>, vector<1x128xf32>
    %5 = vector.broadcast %4 : vector<1x128xf32> to vector<512x128xf32>
    %6 = arith.addf %3, %5 : vector<512x128xf32>
    %cst = arith.constant 0.000000e+00 : f32
    %7 = vector.broadcast %cst : f32 to vector<512x128xf32>
    %8 = arith.maximumf %6, %7 : vector<512x128xf32>
    %c0_5 = arith.constant 0 : index
    %c0_6 = arith.constant 0 : index
    %9 = vector.load %arg5[%c0_5, %c0_6] : memref<512x128xf32, #tpu.memory_space<vmem>>, vector<512x128xf32>
    tpu.vector_store %arg5[%c0_5, %c0_6], %8 {strides = array<i32>} : memref<512x128xf32, #tpu.memory_space<vmem>>, vector<512x128xf32>,
    return
  }
  func.func @transform_0(%arg0: i32, %arg1: i32) -> (i32, i32) {
    %c0_i32 = arith.constant 0 : i32
    return %arg0, %arg1 : i32, i32
  }
  func.func @transform_1(%arg0: i32, %arg1: i32) -> (i32, i32) {
    %c0_i32 = arith.constant 0 : i32
    %c0_i32_0 = arith.constant 0 : i32
    return %c0_i32, %arg1 : i32, i32
  }
  func.func @transform_2(%arg0: i32, %arg1: i32) -> (i32, i32) {
    %c0_i32 = arith.constant 0 : i32
    %c0_i32_0 = arith.constant 0 : i32
    return %c0_i32, %arg1 : i32, i32
  }
  func.func @transform_3(%arg0: i32, %arg1: i32) -> (i32, i32) {
    %c0_i32 = arith.constant 0 : i32
    return %arg0, %arg1 : i32, i32
  }
}

module attributes {stable_mosaic.version = 11 : i64} {
  func.func @matmul_stats_kernel(%arg0: i32, %arg1: i32, %arg2: i32, %arg3: memref<512x48xbf16, #tpu.memory_space<vmem>>, %arg4: memref<48x128xbf16, #tpu.memory_space<vmem>>, %arg5: memref<512x128xf32, #tpu.memory_space<vmem>>, %arg6: memref<1x128xf32, #tpu.memory_space<vmem>>, %arg7: memref<1x128xf32, #tpu.memory_space<vmem>>, %arg8: memref<512x128xf32, #tpu.memory_space<vmem>>) attributes {dimension_semantics = [#tpu.dimension_semantics<parallel>, #tpu.dimension_semantics<parallel>, #tpu.dimension_semantics<arbitrary>], iteration_bounds = array<i64: 1, 1, 1>, scalar_prefetch = 0 : i64, scratch_operands = 1 : i64, tpu.core_type = #tpu.core_type<tc>, window_params = [{transform_indices = @transform_0, window_bounds = array<i64: 512, 48>}, {transform_indices = @transform_1, window_bounds = array<i64: 48, 128>}, {transform_indices = @transform_2, window_bounds = array<i64: 512, 128>}, {transform_indices = @transform_3, window_bounds = array<i64: 1, 128>}, {transform_indices = @transform_4, window_bounds = array<i64: 1, 128>}]} {
    %c0_i32 = arith.constant 0 : i32
    %0 = arith.cmpi eq, %arg2, %c0_i32 : i32
    %1 = arith.extui %0 : i1 to i32
    %c0_i32_0 = arith.constant 0 : i32
    %2 = arith.cmpi ne, %1, %c0_i32_0 : i32
    scf.if %2 {
      %cst_10 = arith.constant 0.000000e+00 : f32
      %12 = vector.broadcast %cst_10 : f32 to vector<512x128xf32>
      %c0_11 = arith.constant 0 : index
      %c0_12 = arith.constant 0 : index
      %13 = vector.load %arg8[%c0_11, %c0_12] : memref<512x128xf32, #tpu.memory_space<vmem>>, vector<512x128xf32>
      tpu.vector_store %arg8[%c0_11, %c0_12], %12 {strides = array<i32>} : memref<512x128xf32, #tpu.memory_space<vmem>>, vector<512x128xf32>,
    } else {
    }
    %c0 = arith.constant 0 : index
    %c0_1 = arith.constant 0 : index
    %3 = vector.load %arg8[%c0, %c0_1] : memref<512x128xf32, #tpu.memory_space<vmem>>, vector<512x128xf32>
    %c0_2 = arith.constant 0 : index
    %c0_3 = arith.constant 0 : index
    %4 = vector.load %arg3[%c0_2, %c0_3] : memref<512x48xbf16, #tpu.memory_space<vmem>>, vector<512x48xbf16>
    %c0_4 = arith.constant 0 : index
    %c0_5 = arith.constant 0 : index
    %5 = vector.load %arg4[%c0_4, %c0_5] : memref<48x128xbf16, #tpu.memory_space<vmem>>, vector<48x128xbf16>
    %cst = arith.constant dense<0.000000e+00> : vector<512x128xf32>
    %6 = tpu.matmul %4, %5, %cst {dimension_numbers = #tpu.dot_dimension_numbers<[1], [0], [0], [1], [0, 0, 1, 1], [], []>} : vector<512x48xbf16>, vector<48x128xbf16>, vector<512x128xf32> -> vector<512x128xf32>
    %7 = arith.addf %3, %6 : vector<512x128xf32>
    %c0_6 = arith.constant 0 : index
    %c0_7 = arith.constant 0 : index
    %8 = vector.load %arg8[%c0_6, %c0_7] : memref<512x128xf32, #tpu.memory_space<vmem>>, vector<512x128xf32>
    tpu.vector_store %arg8[%c0_6, %c0_7], %7 {strides = array<i32>} : memref<512x128xf32, #tpu.memory_space<vmem>>, vector<512x128xf32>,
    %c0_i32_8 = arith.constant 0 : i32
    %9 = arith.cmpi eq, %arg2, %c0_i32_8 : i32
    %10 = arith.extui %9 : i1 to i32
    %c0_i32_9 = arith.constant 0 : i32
    %11 = arith.cmpi ne, %10, %c0_i32_9 : i32
    scf.if %11 {
      %c0_10 = arith.constant 0 : index
      %c0_11 = arith.constant 0 : index
      %12 = vector.load %arg8[%c0_10, %c0_11] : memref<512x128xf32, #tpu.memory_space<vmem>>, vector<512x128xf32>
      %c0_12 = arith.constant 0 : index
      %c0_13 = arith.constant 0 : index
      %13 = vector.load %arg5[%c0_12, %c0_13] : memref<512x128xf32, #tpu.memory_space<vmem>>, vector<512x128xf32>
      tpu.vector_store %arg5[%c0_12, %c0_13], %12 {strides = array<i32>} : memref<512x128xf32, #tpu.memory_space<vmem>>, vector<512x128xf32>,
      %cst_14 = arith.constant dense<0.000000e+00> : vector<128xf32>
      %14 = vector.multi_reduction <add>, %12, %cst_14 [0] : vector<512x128xf32> to vector<128xf32>
      %15 = vector.shape_cast %14 : vector<128xf32> to vector<1x128xf32>
      %c0_15 = arith.constant 0 : index
      %c0_16 = arith.constant 0 : index
      %16 = vector.load %arg6[%c0_15, %c0_16] : memref<1x128xf32, #tpu.memory_space<vmem>>, vector<1x128xf32>
      tpu.vector_store %arg6[%c0_15, %c0_16], %15 {strides = array<i32>} : memref<1x128xf32, #tpu.memory_space<vmem>>, vector<1x128xf32>,
      %17 = arith.mulf %12, %12 : vector<512x128xf32>
      %cst_17 = arith.constant dense<0.000000e+00> : vector<128xf32>
      %18 = vector.multi_reduction <add>, %17, %cst_17 [0] : vector<512x128xf32> to vector<128xf32>
      %19 = vector.shape_cast %18 : vector<128xf32> to vector<1x128xf32>
      %c0_18 = arith.constant 0 : index
      %c0_19 = arith.constant 0 : index
      %20 = vector.load %arg7[%c0_18, %c0_19] : memref<1x128xf32, #tpu.memory_space<vmem>>, vector<1x128xf32>
      tpu.vector_store %arg7[%c0_18, %c0_19], %19 {strides = array<i32>} : memref<1x128xf32, #tpu.memory_space<vmem>>, vector<1x128xf32>,
    } else {
    }
    return
  }
  func.func @transform_0(%arg0: i32, %arg1: i32, %arg2: i32) -> (i32, i32) {
    %c0_i32 = arith.constant 0 : i32
    return %arg0, %arg2 : i32, i32
  }
  func.func @transform_1(%arg0: i32, %arg1: i32, %arg2: i32) -> (i32, i32) {
    %c0_i32 = arith.constant 0 : i32
    return %arg2, %arg1 : i32, i32
  }
  func.func @transform_2(%arg0: i32, %arg1: i32, %arg2: i32) -> (i32, i32) {
    %c0_i32 = arith.constant 0 : i32
    return %arg0, %arg1 : i32, i32
  }
  func.func @transform_3(%arg0: i32, %arg1: i32, %arg2: i32) -> (i32, i32) {
    %c0_i32 = arith.constant 0 : i32
    return %arg0, %arg1 : i32, i32
  }
  func.func @transform_4(%arg0: i32, %arg1: i32, %arg2: i32) -> (i32, i32) {
    %c0_i32 = arith.constant 0 : i32
    return %arg0, %arg1 : i32, i32
  }
}

module attributes {stable_mosaic.version = 11 : i64} {
  func.func @matmul_stats_kernel(%arg0: i32, %arg1: i32, %arg2: i32, %arg3: memref<512x72xbf16, #tpu.memory_space<vmem>>, %arg4: memref<72x128xbf16, #tpu.memory_space<vmem>>, %arg5: memref<512x128xf32, #tpu.memory_space<vmem>>, %arg6: memref<1x128xf32, #tpu.memory_space<vmem>>, %arg7: memref<1x128xf32, #tpu.memory_space<vmem>>, %arg8: memref<512x128xf32, #tpu.memory_space<vmem>>) attributes {dimension_semantics = [#tpu.dimension_semantics<parallel>, #tpu.dimension_semantics<parallel>, #tpu.dimension_semantics<arbitrary>], iteration_bounds = array<i64: 1, 1, 1>, scalar_prefetch = 0 : i64, scratch_operands = 1 : i64, tpu.core_type = #tpu.core_type<tc>, window_params = [{transform_indices = @transform_0, window_bounds = array<i64: 512, 72>}, {transform_indices = @transform_1, window_bounds = array<i64: 72, 128>}, {transform_indices = @transform_2, window_bounds = array<i64: 512, 128>}, {transform_indices = @transform_3, window_bounds = array<i64: 1, 128>}, {transform_indices = @transform_4, window_bounds = array<i64: 1, 128>}]} {
    %c0_i32 = arith.constant 0 : i32
    %0 = arith.cmpi eq, %arg2, %c0_i32 : i32
    %1 = arith.extui %0 : i1 to i32
    %c0_i32_0 = arith.constant 0 : i32
    %2 = arith.cmpi ne, %1, %c0_i32_0 : i32
    scf.if %2 {
      %cst_10 = arith.constant 0.000000e+00 : f32
      %12 = vector.broadcast %cst_10 : f32 to vector<512x128xf32>
      %c0_11 = arith.constant 0 : index
      %c0_12 = arith.constant 0 : index
      %13 = vector.load %arg8[%c0_11, %c0_12] : memref<512x128xf32, #tpu.memory_space<vmem>>, vector<512x128xf32>
      tpu.vector_store %arg8[%c0_11, %c0_12], %12 {strides = array<i32>} : memref<512x128xf32, #tpu.memory_space<vmem>>, vector<512x128xf32>,
    } else {
    }
    %c0 = arith.constant 0 : index
    %c0_1 = arith.constant 0 : index
    %3 = vector.load %arg8[%c0, %c0_1] : memref<512x128xf32, #tpu.memory_space<vmem>>, vector<512x128xf32>
    %c0_2 = arith.constant 0 : index
    %c0_3 = arith.constant 0 : index
    %4 = vector.load %arg3[%c0_2, %c0_3] : memref<512x72xbf16, #tpu.memory_space<vmem>>, vector<512x72xbf16>
    %c0_4 = arith.constant 0 : index
    %c0_5 = arith.constant 0 : index
    %5 = vector.load %arg4[%c0_4, %c0_5] : memref<72x128xbf16, #tpu.memory_space<vmem>>, vector<72x128xbf16>
    %cst = arith.constant dense<0.000000e+00> : vector<512x128xf32>
    %6 = tpu.matmul %4, %5, %cst {dimension_numbers = #tpu.dot_dimension_numbers<[1], [0], [0], [1], [0, 0, 1, 1], [], []>} : vector<512x72xbf16>, vector<72x128xbf16>, vector<512x128xf32> -> vector<512x128xf32>
    %7 = arith.addf %3, %6 : vector<512x128xf32>
    %c0_6 = arith.constant 0 : index
    %c0_7 = arith.constant 0 : index
    %8 = vector.load %arg8[%c0_6, %c0_7] : memref<512x128xf32, #tpu.memory_space<vmem>>, vector<512x128xf32>
    tpu.vector_store %arg8[%c0_6, %c0_7], %7 {strides = array<i32>} : memref<512x128xf32, #tpu.memory_space<vmem>>, vector<512x128xf32>,
    %c0_i32_8 = arith.constant 0 : i32
    %9 = arith.cmpi eq, %arg2, %c0_i32_8 : i32
    %10 = arith.extui %9 : i1 to i32
    %c0_i32_9 = arith.constant 0 : i32
    %11 = arith.cmpi ne, %10, %c0_i32_9 : i32
    scf.if %11 {
      %c0_10 = arith.constant 0 : index
      %c0_11 = arith.constant 0 : index
      %12 = vector.load %arg8[%c0_10, %c0_11] : memref<512x128xf32, #tpu.memory_space<vmem>>, vector<512x128xf32>
      %c0_12 = arith.constant 0 : index
      %c0_13 = arith.constant 0 : index
      %13 = vector.load %arg5[%c0_12, %c0_13] : memref<512x128xf32, #tpu.memory_space<vmem>>, vector<512x128xf32>
      tpu.vector_store %arg5[%c0_12, %c0_13], %12 {strides = array<i32>} : memref<512x128xf32, #tpu.memory_space<vmem>>, vector<512x128xf32>,
      %cst_14 = arith.constant dense<0.000000e+00> : vector<128xf32>
      %14 = vector.multi_reduction <add>, %12, %cst_14 [0] : vector<512x128xf32> to vector<128xf32>
      %15 = vector.shape_cast %14 : vector<128xf32> to vector<1x128xf32>
      %c0_15 = arith.constant 0 : index
      %c0_16 = arith.constant 0 : index
      %16 = vector.load %arg6[%c0_15, %c0_16] : memref<1x128xf32, #tpu.memory_space<vmem>>, vector<1x128xf32>
      tpu.vector_store %arg6[%c0_15, %c0_16], %15 {strides = array<i32>} : memref<1x128xf32, #tpu.memory_space<vmem>>, vector<1x128xf32>,
      %17 = arith.mulf %12, %12 : vector<512x128xf32>
      %cst_17 = arith.constant dense<0.000000e+00> : vector<128xf32>
      %18 = vector.multi_reduction <add>, %17, %cst_17 [0] : vector<512x128xf32> to vector<128xf32>
      %19 = vector.shape_cast %18 : vector<128xf32> to vector<1x128xf32>
      %c0_18 = arith.constant 0 : index
      %c0_19 = arith.constant 0 : index
      %20 = vector.load %arg7[%c0_18, %c0_19] : memref<1x128xf32, #tpu.memory_space<vmem>>, vector<1x128xf32>
      tpu.vector_store %arg7[%c0_18, %c0_19], %19 {strides = array<i32>} : memref<1x128xf32, #tpu.memory_space<vmem>>, vector<1x128xf32>,
    } else {
    }
    return
  }
  func.func @transform_0(%arg0: i32, %arg1: i32, %arg2: i32) -> (i32, i32) {
    %c0_i32 = arith.constant 0 : i32
    return %arg0, %arg2 : i32, i32
  }
  func.func @transform_1(%arg0: i32, %arg1: i32, %arg2: i32) -> (i32, i32) {
    %c0_i32 = arith.constant 0 : i32
    return %arg2, %arg1 : i32, i32
  }
  func.func @transform_2(%arg0: i32, %arg1: i32, %arg2: i32) -> (i32, i32) {
    %c0_i32 = arith.constant 0 : i32
    return %arg0, %arg1 : i32, i32
  }
  func.func @transform_3(%arg0: i32, %arg1: i32, %arg2: i32) -> (i32, i32) {
    %c0_i32 = arith.constant 0 : i32
    return %arg0, %arg1 : i32, i32
  }
  func.func @transform_4(%arg0: i32, %arg1: i32, %arg2: i32) -> (i32, i32) {
    %c0_i32 = arith.constant 0 : i32
    return %arg0, %arg1 : i32, i32
  }
}

module attributes {stable_mosaic.version = 11 : i64} {
  func.func @bn_res_act_kernel(%arg0: i32, %arg1: i32, %arg2: memref<512x128xf32, #tpu.memory_space<vmem>>, %arg3: memref<512x8xf32, #tpu.memory_space<vmem>>, %arg4: memref<8x128xf32, #tpu.memory_space<vmem>>, %arg5: memref<1x128xf32, #tpu.memory_space<vmem>>, %arg6: memref<1x128xf32, #tpu.memory_space<vmem>>, %arg7: memref<1x128xf32, #tpu.memory_space<vmem>>, %arg8: memref<512x128xf32, #tpu.memory_space<vmem>>) attributes {dimension_semantics = [#tpu.dimension_semantics<parallel>, #tpu.dimension_semantics<parallel>], iteration_bounds = array<i64: 1, 1>, scalar_prefetch = 0 : i64, scratch_operands = 0 : i64, tpu.core_type = #tpu.core_type<tc>, window_params = [{transform_indices = @transform_0, window_bounds = array<i64: 512, 128>}, {transform_indices = @transform_1, window_bounds = array<i64: 512, 8>}, {transform_indices = @transform_2, window_bounds = array<i64: 8, 128>}, {transform_indices = @transform_3, window_bounds = array<i64: 1, 128>}, {transform_indices = @transform_4, window_bounds = array<i64: 1, 128>}, {transform_indices = @transform_5, window_bounds = array<i64: 1, 128>}, {transform_indices = @transform_6, window_bounds = array<i64: 512, 128>}]} {
    %c0 = arith.constant 0 : index
    %c0_0 = arith.constant 0 : index
    %0 = vector.load %arg3[%c0, %c0_0] : memref<512x8xf32, #tpu.memory_space<vmem>>, vector<512x8xf32>
    %c0_1 = arith.constant 0 : index
    %c0_2 = arith.constant 0 : index
    %1 = vector.load %arg4[%c0_1, %c0_2] : memref<8x128xf32, #tpu.memory_space<vmem>>, vector<8x128xf32>
    %cst = arith.constant dense<0.000000e+00> : vector<512x128xf32>
    %2 = tpu.matmul %0, %1, %cst {dimension_numbers = #tpu.dot_dimension_numbers<[1], [0], [0], [1], [0, 0, 1, 1], [], []>} : vector<512x8xf32>, vector<8x128xf32>, vector<512x128xf32> -> vector<512x128xf32>
    %c0_3 = arith.constant 0 : index
    %c0_4 = arith.constant 0 : index
    %3 = vector.load %arg5[%c0_3, %c0_4] : memref<1x128xf32, #tpu.memory_space<vmem>>, vector<1x128xf32>
    %4 = vector.broadcast %3 : vector<1x128xf32> to vector<512x128xf32>
    %5 = arith.addf %2, %4 : vector<512x128xf32>
    %c0_5 = arith.constant 0 : index
    %c0_6 = arith.constant 0 : index
    %6 = vector.load %arg2[%c0_5, %c0_6] : memref<512x128xf32, #tpu.memory_space<vmem>>, vector<512x128xf32>
    %c0_7 = arith.constant 0 : index
    %c0_8 = arith.constant 0 : index
    %7 = vector.load %arg6[%c0_7, %c0_8] : memref<1x128xf32, #tpu.memory_space<vmem>>, vector<1x128xf32>
    %8 = vector.broadcast %7 : vector<1x128xf32> to vector<512x128xf32>
    %9 = arith.mulf %6, %8 : vector<512x128xf32>
    %c0_9 = arith.constant 0 : index
    %c0_10 = arith.constant 0 : index
    %10 = vector.load %arg7[%c0_9, %c0_10] : memref<1x128xf32, #tpu.memory_space<vmem>>, vector<1x128xf32>
    %11 = vector.broadcast %10 : vector<1x128xf32> to vector<512x128xf32>
    %12 = arith.addf %9, %11 : vector<512x128xf32>
    %13 = arith.addf %12, %5 : vector<512x128xf32>
    %cst_11 = arith.constant 0.000000e+00 : f32
    %14 = vector.broadcast %cst_11 : f32 to vector<512x128xf32>
    %15 = arith.maximumf %13, %14 : vector<512x128xf32>
    %c0_12 = arith.constant 0 : index
    %c0_13 = arith.constant 0 : index
    %16 = vector.load %arg8[%c0_12, %c0_13] : memref<512x128xf32, #tpu.memory_space<vmem>>, vector<512x128xf32>
    tpu.vector_store %arg8[%c0_12, %c0_13], %15 {strides = array<i32>} : memref<512x128xf32, #tpu.memory_space<vmem>>, vector<512x128xf32>,
    return
  }
  func.func @transform_0(%arg0: i32, %arg1: i32) -> (i32, i32) {
    %c0_i32 = arith.constant 0 : i32
    return %arg0, %arg1 : i32, i32
  }
  func.func @transform_1(%arg0: i32, %arg1: i32) -> (i32, i32) {
    %c0_i32 = arith.constant 0 : i32
    %c0_i32_0 = arith.constant 0 : i32
    return %arg0, %c0_i32 : i32, i32
  }
  func.func @transform_2(%arg0: i32, %arg1: i32) -> (i32, i32) {
    %c0_i32 = arith.constant 0 : i32
    %c0_i32_0 = arith.constant 0 : i32
    return %c0_i32, %arg1 : i32, i32
  }
  func.func @transform_3(%arg0: i32, %arg1: i32) -> (i32, i32) {
    %c0_i32 = arith.constant 0 : i32
    %c0_i32_0 = arith.constant 0 : i32
    return %c0_i32, %arg1 : i32, i32
  }
  func.func @transform_4(%arg0: i32, %arg1: i32) -> (i32, i32) {
    %c0_i32 = arith.constant 0 : i32
    %c0_i32_0 = arith.constant 0 : i32
    return %c0_i32, %arg1 : i32, i32
  }
  func.func @transform_5(%arg0: i32, %arg1: i32) -> (i32, i32) {
    %c0_i32 = arith.constant 0 : i32
    %c0_i32_0 = arith.constant 0 : i32
    return %c0_i32, %arg1 : i32, i32
  }
  func.func @transform_6(%arg0: i32, %arg1: i32) -> (i32, i32) {
    %c0_i32 = arith.constant 0 : i32
    return %arg0, %arg1 : i32, i32
  }
}

module attributes {stable_mosaic.version = 11 : i64} {
  func.func @matmul_stats_kernel(%arg0: i32, %arg1: i32, %arg2: i32, %arg3: memref<128x512xbf16, #tpu.memory_space<vmem>>, %arg4: memref<512x128xbf16, #tpu.memory_space<vmem>>, %arg5: memref<128x128xf32, #tpu.memory_space<vmem>>, %arg6: memref<1x128xf32, #tpu.memory_space<vmem>>, %arg7: memref<1x128xf32, #tpu.memory_space<vmem>>, %arg8: memref<128x128xf32, #tpu.memory_space<vmem>>) attributes {dimension_semantics = [#tpu.dimension_semantics<parallel>, #tpu.dimension_semantics<parallel>, #tpu.dimension_semantics<arbitrary>], iteration_bounds = array<i64: 1, 1, 1>, scalar_prefetch = 0 : i64, scratch_operands = 1 : i64, tpu.core_type = #tpu.core_type<tc>, window_params = [{transform_indices = @transform_0, window_bounds = array<i64: 128, 512>}, {transform_indices = @transform_1, window_bounds = array<i64: 512, 128>}, {transform_indices = @transform_2, window_bounds = array<i64: 128, 128>}, {transform_indices = @transform_3, window_bounds = array<i64: 1, 128>}, {transform_indices = @transform_4, window_bounds = array<i64: 1, 128>}]} {
    %c0_i32 = arith.constant 0 : i32
    %0 = arith.cmpi eq, %arg2, %c0_i32 : i32
    %1 = arith.extui %0 : i1 to i32
    %c0_i32_0 = arith.constant 0 : i32
    %2 = arith.cmpi ne, %1, %c0_i32_0 : i32
    scf.if %2 {
      %cst_10 = arith.constant 0.000000e+00 : f32
      %12 = vector.broadcast %cst_10 : f32 to vector<128x128xf32>
      %c0_11 = arith.constant 0 : index
      %c0_12 = arith.constant 0 : index
      %13 = vector.load %arg8[%c0_11, %c0_12] : memref<128x128xf32, #tpu.memory_space<vmem>>, vector<128x128xf32>
      tpu.vector_store %arg8[%c0_11, %c0_12], %12 {strides = array<i32>} : memref<128x128xf32, #tpu.memory_space<vmem>>, vector<128x128xf32>,
    } else {
    }
    %c0 = arith.constant 0 : index
    %c0_1 = arith.constant 0 : index
    %3 = vector.load %arg8[%c0, %c0_1] : memref<128x128xf32, #tpu.memory_space<vmem>>, vector<128x128xf32>
    %c0_2 = arith.constant 0 : index
    %c0_3 = arith.constant 0 : index
    %4 = vector.load %arg3[%c0_2, %c0_3] : memref<128x512xbf16, #tpu.memory_space<vmem>>, vector<128x512xbf16>
    %c0_4 = arith.constant 0 : index
    %c0_5 = arith.constant 0 : index
    %5 = vector.load %arg4[%c0_4, %c0_5] : memref<512x128xbf16, #tpu.memory_space<vmem>>, vector<512x128xbf16>
    %cst = arith.constant dense<0.000000e+00> : vector<128x128xf32>
    %6 = tpu.matmul %4, %5, %cst {dimension_numbers = #tpu.dot_dimension_numbers<[1], [0], [0], [1], [0, 0, 1, 1], [], []>} : vector<128x512xbf16>, vector<512x128xbf16>, vector<128x128xf32> -> vector<128x128xf32>
    %7 = arith.addf %3, %6 : vector<128x128xf32>
    %c0_6 = arith.constant 0 : index
    %c0_7 = arith.constant 0 : index
    %8 = vector.load %arg8[%c0_6, %c0_7] : memref<128x128xf32, #tpu.memory_space<vmem>>, vector<128x128xf32>
    tpu.vector_store %arg8[%c0_6, %c0_7], %7 {strides = array<i32>} : memref<128x128xf32, #tpu.memory_space<vmem>>, vector<128x128xf32>,
    %c0_i32_8 = arith.constant 0 : i32
    %9 = arith.cmpi eq, %arg2, %c0_i32_8 : i32
    %10 = arith.extui %9 : i1 to i32
    %c0_i32_9 = arith.constant 0 : i32
    %11 = arith.cmpi ne, %10, %c0_i32_9 : i32
    scf.if %11 {
      %c0_10 = arith.constant 0 : index
      %c0_11 = arith.constant 0 : index
      %12 = vector.load %arg8[%c0_10, %c0_11] : memref<128x128xf32, #tpu.memory_space<vmem>>, vector<128x128xf32>
      %c0_12 = arith.constant 0 : index
      %c0_13 = arith.constant 0 : index
      %13 = vector.load %arg5[%c0_12, %c0_13] : memref<128x128xf32, #tpu.memory_space<vmem>>, vector<128x128xf32>
      tpu.vector_store %arg5[%c0_12, %c0_13], %12 {strides = array<i32>} : memref<128x128xf32, #tpu.memory_space<vmem>>, vector<128x128xf32>,
      %cst_14 = arith.constant dense<0.000000e+00> : vector<128xf32>
      %14 = vector.multi_reduction <add>, %12, %cst_14 [0] : vector<128x128xf32> to vector<128xf32>
      %15 = vector.shape_cast %14 : vector<128xf32> to vector<1x128xf32>
      %c0_15 = arith.constant 0 : index
      %c0_16 = arith.constant 0 : index
      %16 = vector.load %arg6[%c0_15, %c0_16] : memref<1x128xf32, #tpu.memory_space<vmem>>, vector<1x128xf32>
      tpu.vector_store %arg6[%c0_15, %c0_16], %15 {strides = array<i32>} : memref<1x128xf32, #tpu.memory_space<vmem>>, vector<1x128xf32>,
      %17 = arith.mulf %12, %12 : vector<128x128xf32>
      %cst_17 = arith.constant dense<0.000000e+00> : vector<128xf32>
      %18 = vector.multi_reduction <add>, %17, %cst_17 [0] : vector<128x128xf32> to vector<128xf32>
      %19 = vector.shape_cast %18 : vector<128xf32> to vector<1x128xf32>
      %c0_18 = arith.constant 0 : index
      %c0_19 = arith.constant 0 : index
      %20 = vector.load %arg7[%c0_18, %c0_19] : memref<1x128xf32, #tpu.memory_space<vmem>>, vector<1x128xf32>
      tpu.vector_store %arg7[%c0_18, %c0_19], %19 {strides = array<i32>} : memref<1x128xf32, #tpu.memory_space<vmem>>, vector<1x128xf32>,
    } else {
    }
    return
  }
  func.func @transform_0(%arg0: i32, %arg1: i32, %arg2: i32) -> (i32, i32) {
    %c0_i32 = arith.constant 0 : i32
    return %arg0, %arg2 : i32, i32
  }
  func.func @transform_1(%arg0: i32, %arg1: i32, %arg2: i32) -> (i32, i32) {
    %c0_i32 = arith.constant 0 : i32
    return %arg2, %arg1 : i32, i32
  }
  func.func @transform_2(%arg0: i32, %arg1: i32, %arg2: i32) -> (i32, i32) {
    %c0_i32 = arith.constant 0 : i32
    return %arg0, %arg1 : i32, i32
  }
  func.func @transform_3(%arg0: i32, %arg1: i32, %arg2: i32) -> (i32, i32) {
    %c0_i32 = arith.constant 0 : i32
    return %arg0, %arg1 : i32, i32
  }
  func.func @transform_4(%arg0: i32, %arg1: i32, %arg2: i32) -> (i32, i32) {
    %c0_i32 = arith.constant 0 : i32
    return %arg0, %arg1 : i32, i32
  }
}

module attributes {stable_mosaic.version = 11 : i64} {
  func.func @bn_act_kernel(%arg0: i32, %arg1: i32, %arg2: memref<128x128xf32, #tpu.memory_space<vmem>>, %arg3: memref<1x128xf32, #tpu.memory_space<vmem>>, %arg4: memref<1x128xf32, #tpu.memory_space<vmem>>, %arg5: memref<128x128xf32, #tpu.memory_space<vmem>>) attributes {dimension_semantics = [#tpu.dimension_semantics<parallel>, #tpu.dimension_semantics<parallel>], iteration_bounds = array<i64: 1, 1>, scalar_prefetch = 0 : i64, scratch_operands = 0 : i64, tpu.core_type = #tpu.core_type<tc>, window_params = [{transform_indices = @transform_0, window_bounds = array<i64: 128, 128>}, {transform_indices = @transform_1, window_bounds = array<i64: 1, 128>}, {transform_indices = @transform_2, window_bounds = array<i64: 1, 128>}, {transform_indices = @transform_3, window_bounds = array<i64: 128, 128>}]} {
    %c0 = arith.constant 0 : index
    %c0_0 = arith.constant 0 : index
    %0 = vector.load %arg2[%c0, %c0_0] : memref<128x128xf32, #tpu.memory_space<vmem>>, vector<128x128xf32>
    %c0_1 = arith.constant 0 : index
    %c0_2 = arith.constant 0 : index
    %1 = vector.load %arg3[%c0_1, %c0_2] : memref<1x128xf32, #tpu.memory_space<vmem>>, vector<1x128xf32>
    %2 = vector.broadcast %1 : vector<1x128xf32> to vector<128x128xf32>
    %3 = arith.mulf %0, %2 : vector<128x128xf32>
    %c0_3 = arith.constant 0 : index
    %c0_4 = arith.constant 0 : index
    %4 = vector.load %arg4[%c0_3, %c0_4] : memref<1x128xf32, #tpu.memory_space<vmem>>, vector<1x128xf32>
    %5 = vector.broadcast %4 : vector<1x128xf32> to vector<128x128xf32>
    %6 = arith.addf %3, %5 : vector<128x128xf32>
    %cst = arith.constant 0.000000e+00 : f32
    %7 = vector.broadcast %cst : f32 to vector<128x128xf32>
    %8 = arith.maximumf %6, %7 : vector<128x128xf32>
    %c0_5 = arith.constant 0 : index
    %c0_6 = arith.constant 0 : index
    %9 = vector.load %arg5[%c0_5, %c0_6] : memref<128x128xf32, #tpu.memory_space<vmem>>, vector<128x128xf32>
    tpu.vector_store %arg5[%c0_5, %c0_6], %8 {strides = array<i32>} : memref<128x128xf32, #tpu.memory_space<vmem>>, vector<128x128xf32>,
    return
  }
  func.func @transform_0(%arg0: i32, %arg1: i32) -> (i32, i32) {
    %c0_i32 = arith.constant 0 : i32
    return %arg0, %arg1 : i32, i32
  }
  func.func @transform_1(%arg0: i32, %arg1: i32) -> (i32, i32) {
    %c0_i32 = arith.constant 0 : i32
    %c0_i32_0 = arith.constant 0 : i32
    return %c0_i32, %arg1 : i32, i32
  }
  func.func @transform_2(%arg0: i32, %arg1: i32) -> (i32, i32) {
    %c0_i32 = arith.constant 0 : i32
    %c0_i32_0 = arith.constant 0 : i32
    return %c0_i32, %arg1 : i32, i32
  }
  func.func @transform_3(%arg0: i32, %arg1: i32) -> (i32, i32) {
    %c0_i32 = arith.constant 0 : i32
    return %arg0, %arg1 : i32, i32
  }
}

module attributes {stable_mosaic.version = 11 : i64} {
  func.func @matmul_stats_kernel(%arg0: i32, %arg1: i32, %arg2: i32, %arg3: memref<128x72xbf16, #tpu.memory_space<vmem>>, %arg4: memref<72x128xbf16, #tpu.memory_space<vmem>>, %arg5: memref<128x128xf32, #tpu.memory_space<vmem>>, %arg6: memref<1x128xf32, #tpu.memory_space<vmem>>, %arg7: memref<1x128xf32, #tpu.memory_space<vmem>>, %arg8: memref<128x128xf32, #tpu.memory_space<vmem>>) attributes {dimension_semantics = [#tpu.dimension_semantics<parallel>, #tpu.dimension_semantics<parallel>, #tpu.dimension_semantics<arbitrary>], iteration_bounds = array<i64: 1, 1, 1>, scalar_prefetch = 0 : i64, scratch_operands = 1 : i64, tpu.core_type = #tpu.core_type<tc>, window_params = [{transform_indices = @transform_0, window_bounds = array<i64: 128, 72>}, {transform_indices = @transform_1, window_bounds = array<i64: 72, 128>}, {transform_indices = @transform_2, window_bounds = array<i64: 128, 128>}, {transform_indices = @transform_3, window_bounds = array<i64: 1, 128>}, {transform_indices = @transform_4, window_bounds = array<i64: 1, 128>}]} {
    %c0_i32 = arith.constant 0 : i32
    %0 = arith.cmpi eq, %arg2, %c0_i32 : i32
    %1 = arith.extui %0 : i1 to i32
    %c0_i32_0 = arith.constant 0 : i32
    %2 = arith.cmpi ne, %1, %c0_i32_0 : i32
    scf.if %2 {
      %cst_10 = arith.constant 0.000000e+00 : f32
      %12 = vector.broadcast %cst_10 : f32 to vector<128x128xf32>
      %c0_11 = arith.constant 0 : index
      %c0_12 = arith.constant 0 : index
      %13 = vector.load %arg8[%c0_11, %c0_12] : memref<128x128xf32, #tpu.memory_space<vmem>>, vector<128x128xf32>
      tpu.vector_store %arg8[%c0_11, %c0_12], %12 {strides = array<i32>} : memref<128x128xf32, #tpu.memory_space<vmem>>, vector<128x128xf32>,
    } else {
    }
    %c0 = arith.constant 0 : index
    %c0_1 = arith.constant 0 : index
    %3 = vector.load %arg8[%c0, %c0_1] : memref<128x128xf32, #tpu.memory_space<vmem>>, vector<128x128xf32>
    %c0_2 = arith.constant 0 : index
    %c0_3 = arith.constant 0 : index
    %4 = vector.load %arg3[%c0_2, %c0_3] : memref<128x72xbf16, #tpu.memory_space<vmem>>, vector<128x72xbf16>
    %c0_4 = arith.constant 0 : index
    %c0_5 = arith.constant 0 : index
    %5 = vector.load %arg4[%c0_4, %c0_5] : memref<72x128xbf16, #tpu.memory_space<vmem>>, vector<72x128xbf16>
    %cst = arith.constant dense<0.000000e+00> : vector<128x128xf32>
    %6 = tpu.matmul %4, %5, %cst {dimension_numbers = #tpu.dot_dimension_numbers<[1], [0], [0], [1], [0, 0, 1, 1], [], []>} : vector<128x72xbf16>, vector<72x128xbf16>, vector<128x128xf32> -> vector<128x128xf32>
    %7 = arith.addf %3, %6 : vector<128x128xf32>
    %c0_6 = arith.constant 0 : index
    %c0_7 = arith.constant 0 : index
    %8 = vector.load %arg8[%c0_6, %c0_7] : memref<128x128xf32, #tpu.memory_space<vmem>>, vector<128x128xf32>
    tpu.vector_store %arg8[%c0_6, %c0_7], %7 {strides = array<i32>} : memref<128x128xf32, #tpu.memory_space<vmem>>, vector<128x128xf32>,
    %c0_i32_8 = arith.constant 0 : i32
    %9 = arith.cmpi eq, %arg2, %c0_i32_8 : i32
    %10 = arith.extui %9 : i1 to i32
    %c0_i32_9 = arith.constant 0 : i32
    %11 = arith.cmpi ne, %10, %c0_i32_9 : i32
    scf.if %11 {
      %c0_10 = arith.constant 0 : index
      %c0_11 = arith.constant 0 : index
      %12 = vector.load %arg8[%c0_10, %c0_11] : memref<128x128xf32, #tpu.memory_space<vmem>>, vector<128x128xf32>
      %c0_12 = arith.constant 0 : index
      %c0_13 = arith.constant 0 : index
      %13 = vector.load %arg5[%c0_12, %c0_13] : memref<128x128xf32, #tpu.memory_space<vmem>>, vector<128x128xf32>
      tpu.vector_store %arg5[%c0_12, %c0_13], %12 {strides = array<i32>} : memref<128x128xf32, #tpu.memory_space<vmem>>, vector<128x128xf32>,
      %cst_14 = arith.constant dense<0.000000e+00> : vector<128xf32>
      %14 = vector.multi_reduction <add>, %12, %cst_14 [0] : vector<128x128xf32> to vector<128xf32>
      %15 = vector.shape_cast %14 : vector<128xf32> to vector<1x128xf32>
      %c0_15 = arith.constant 0 : index
      %c0_16 = arith.constant 0 : index
      %16 = vector.load %arg6[%c0_15, %c0_16] : memref<1x128xf32, #tpu.memory_space<vmem>>, vector<1x128xf32>
      tpu.vector_store %arg6[%c0_15, %c0_16], %15 {strides = array<i32>} : memref<1x128xf32, #tpu.memory_space<vmem>>, vector<1x128xf32>,
      %17 = arith.mulf %12, %12 : vector<128x128xf32>
      %cst_17 = arith.constant dense<0.000000e+00> : vector<128xf32>
      %18 = vector.multi_reduction <add>, %17, %cst_17 [0] : vector<128x128xf32> to vector<128xf32>
      %19 = vector.shape_cast %18 : vector<128xf32> to vector<1x128xf32>
      %c0_18 = arith.constant 0 : index
      %c0_19 = arith.constant 0 : index
      %20 = vector.load %arg7[%c0_18, %c0_19] : memref<1x128xf32, #tpu.memory_space<vmem>>, vector<1x128xf32>
      tpu.vector_store %arg7[%c0_18, %c0_19], %19 {strides = array<i32>} : memref<1x128xf32, #tpu.memory_space<vmem>>, vector<1x128xf32>,
    } else {
    }
    return
  }
  func.func @transform_0(%arg0: i32, %arg1: i32, %arg2: i32) -> (i32, i32) {
    %c0_i32 = arith.constant 0 : i32
    return %arg0, %arg2 : i32, i32
  }
  func.func @transform_1(%arg0: i32, %arg1: i32, %arg2: i32) -> (i32, i32) {
    %c0_i32 = arith.constant 0 : i32
    return %arg2, %arg1 : i32, i32
  }
  func.func @transform_2(%arg0: i32, %arg1: i32, %arg2: i32) -> (i32, i32) {
    %c0_i32 = arith.constant 0 : i32
    return %arg0, %arg1 : i32, i32
  }
  func.func @transform_3(%arg0: i32, %arg1: i32, %arg2: i32) -> (i32, i32) {
    %c0_i32 = arith.constant 0 : i32
    return %arg0, %arg1 : i32, i32
  }
  func.func @transform_4(%arg0: i32, %arg1: i32, %arg2: i32) -> (i32, i32) {
    %c0_i32 = arith.constant 0 : i32
    return %arg0, %arg1 : i32, i32
  }
}

module attributes {stable_mosaic.version = 11 : i64} {
  func.func @bn_res_act_kernel(%arg0: i32, %arg1: i32, %arg2: memref<128x128xf32, #tpu.memory_space<vmem>>, %arg3: memref<128x32xf32, #tpu.memory_space<vmem>>, %arg4: memref<32x128xf32, #tpu.memory_space<vmem>>, %arg5: memref<1x128xf32, #tpu.memory_space<vmem>>, %arg6: memref<1x128xf32, #tpu.memory_space<vmem>>, %arg7: memref<1x128xf32, #tpu.memory_space<vmem>>, %arg8: memref<128x128xf32, #tpu.memory_space<vmem>>) attributes {dimension_semantics = [#tpu.dimension_semantics<parallel>, #tpu.dimension_semantics<parallel>], iteration_bounds = array<i64: 1, 1>, scalar_prefetch = 0 : i64, scratch_operands = 0 : i64, tpu.core_type = #tpu.core_type<tc>, window_params = [{transform_indices = @transform_0, window_bounds = array<i64: 128, 128>}, {transform_indices = @transform_1, window_bounds = array<i64: 128, 32>}, {transform_indices = @transform_2, window_bounds = array<i64: 32, 128>}, {transform_indices = @transform_3, window_bounds = array<i64: 1, 128>}, {transform_indices = @transform_4, window_bounds = array<i64: 1, 128>}, {transform_indices = @transform_5, window_bounds = array<i64: 1, 128>}, {transform_indices = @transform_6, window_bounds = array<i64: 128, 128>}]} {
    %c0 = arith.constant 0 : index
    %c0_0 = arith.constant 0 : index
    %0 = vector.load %arg3[%c0, %c0_0] : memref<128x32xf32, #tpu.memory_space<vmem>>, vector<128x32xf32>
    %c0_1 = arith.constant 0 : index
    %c0_2 = arith.constant 0 : index
    %1 = vector.load %arg4[%c0_1, %c0_2] : memref<32x128xf32, #tpu.memory_space<vmem>>, vector<32x128xf32>
    %cst = arith.constant dense<0.000000e+00> : vector<128x128xf32>
    %2 = tpu.matmul %0, %1, %cst {dimension_numbers = #tpu.dot_dimension_numbers<[1], [0], [0], [1], [0, 0, 1, 1], [], []>} : vector<128x32xf32>, vector<32x128xf32>, vector<128x128xf32> -> vector<128x128xf32>
    %c0_3 = arith.constant 0 : index
    %c0_4 = arith.constant 0 : index
    %3 = vector.load %arg5[%c0_3, %c0_4] : memref<1x128xf32, #tpu.memory_space<vmem>>, vector<1x128xf32>
    %4 = vector.broadcast %3 : vector<1x128xf32> to vector<128x128xf32>
    %5 = arith.addf %2, %4 : vector<128x128xf32>
    %c0_5 = arith.constant 0 : index
    %c0_6 = arith.constant 0 : index
    %6 = vector.load %arg2[%c0_5, %c0_6] : memref<128x128xf32, #tpu.memory_space<vmem>>, vector<128x128xf32>
    %c0_7 = arith.constant 0 : index
    %c0_8 = arith.constant 0 : index
    %7 = vector.load %arg6[%c0_7, %c0_8] : memref<1x128xf32, #tpu.memory_space<vmem>>, vector<1x128xf32>
    %8 = vector.broadcast %7 : vector<1x128xf32> to vector<128x128xf32>
    %9 = arith.mulf %6, %8 : vector<128x128xf32>
    %c0_9 = arith.constant 0 : index
    %c0_10 = arith.constant 0 : index
    %10 = vector.load %arg7[%c0_9, %c0_10] : memref<1x128xf32, #tpu.memory_space<vmem>>, vector<1x128xf32>
    %11 = vector.broadcast %10 : vector<1x128xf32> to vector<128x128xf32>
    %12 = arith.addf %9, %11 : vector<128x128xf32>
    %13 = arith.addf %12, %5 : vector<128x128xf32>
    %cst_11 = arith.constant 0.000000e+00 : f32
    %14 = vector.broadcast %cst_11 : f32 to vector<128x128xf32>
    %15 = arith.maximumf %13, %14 : vector<128x128xf32>
    %c0_12 = arith.constant 0 : index
    %c0_13 = arith.constant 0 : index
    %16 = vector.load %arg8[%c0_12, %c0_13] : memref<128x128xf32, #tpu.memory_space<vmem>>, vector<128x128xf32>
    tpu.vector_store %arg8[%c0_12, %c0_13], %15 {strides = array<i32>} : memref<128x128xf32, #tpu.memory_space<vmem>>, vector<128x128xf32>,
    return
  }
  func.func @transform_0(%arg0: i32, %arg1: i32) -> (i32, i32) {
    %c0_i32 = arith.constant 0 : i32
    return %arg0, %arg1 : i32, i32
  }
  func.func @transform_1(%arg0: i32, %arg1: i32) -> (i32, i32) {
    %c0_i32 = arith.constant 0 : i32
    %c0_i32_0 = arith.constant 0 : i32
    return %arg0, %c0_i32 : i32, i32
  }
  func.func @transform_2(%arg0: i32, %arg1: i32) -> (i32, i32) {
    %c0_i32 = arith.constant 0 : i32
    %c0_i32_0 = arith.constant 0 : i32
    return %c0_i32, %arg1 : i32, i32
  }
  func.func @transform_3(%arg0: i32, %arg1: i32) -> (i32, i32) {
    %c0_i32 = arith.constant 0 : i32
    %c0_i32_0 = arith.constant 0 : i32
    return %c0_i32, %arg1 : i32, i32
  }
  func.func @transform_4(%arg0: i32, %arg1: i32) -> (i32, i32) {
    %c0_i32 = arith.constant 0 : i32
    %c0_i32_0 = arith.constant 0 : i32
    return %c0_i32, %arg1 : i32, i32
  }
  func.func @transform_5(%arg0: i32, %arg1: i32) -> (i32, i32) {
    %c0_i32 = arith.constant 0 : i32
    %c0_i32_0 = arith.constant 0 : i32
    return %c0_i32, %arg1 : i32, i32
  }
  func.func @transform_6(%arg0: i32, %arg1: i32) -> (i32, i32) {
    %c0_i32 = arith.constant 0 : i32
    return %arg0, %arg1 : i32, i32
  }
}

module attributes {stable_mosaic.version = 11 : i64} {
  func.func @matmul_stats_kernel(%arg0: i32, %arg1: i32, %arg2: i32, %arg3: memref<32x1024xbf16, #tpu.memory_space<vmem>>, %arg4: memref<1024x128xbf16, #tpu.memory_space<vmem>>, %arg5: memref<32x128xf32, #tpu.memory_space<vmem>>, %arg6: memref<1x128xf32, #tpu.memory_space<vmem>>, %arg7: memref<1x128xf32, #tpu.memory_space<vmem>>, %arg8: memref<32x128xf32, #tpu.memory_space<vmem>>) attributes {dimension_semantics = [#tpu.dimension_semantics<parallel>, #tpu.dimension_semantics<parallel>, #tpu.dimension_semantics<arbitrary>], iteration_bounds = array<i64: 1, 1, 1>, scalar_prefetch = 0 : i64, scratch_operands = 1 : i64, tpu.core_type = #tpu.core_type<tc>, window_params = [{transform_indices = @transform_0, window_bounds = array<i64: 32, 1024>}, {transform_indices = @transform_1, window_bounds = array<i64: 1024, 128>}, {transform_indices = @transform_2, window_bounds = array<i64: 32, 128>}, {transform_indices = @transform_3, window_bounds = array<i64: 1, 128>}, {transform_indices = @transform_4, window_bounds = array<i64: 1, 128>}]} {
    %c0_i32 = arith.constant 0 : i32
    %0 = arith.cmpi eq, %arg2, %c0_i32 : i32
    %1 = arith.extui %0 : i1 to i32
    %c0_i32_0 = arith.constant 0 : i32
    %2 = arith.cmpi ne, %1, %c0_i32_0 : i32
    scf.if %2 {
      %cst_10 = arith.constant 0.000000e+00 : f32
      %12 = vector.broadcast %cst_10 : f32 to vector<32x128xf32>
      %c0_11 = arith.constant 0 : index
      %c0_12 = arith.constant 0 : index
      %13 = vector.load %arg8[%c0_11, %c0_12] : memref<32x128xf32, #tpu.memory_space<vmem>>, vector<32x128xf32>
      tpu.vector_store %arg8[%c0_11, %c0_12], %12 {strides = array<i32>} : memref<32x128xf32, #tpu.memory_space<vmem>>, vector<32x128xf32>,
    } else {
    }
    %c0 = arith.constant 0 : index
    %c0_1 = arith.constant 0 : index
    %3 = vector.load %arg8[%c0, %c0_1] : memref<32x128xf32, #tpu.memory_space<vmem>>, vector<32x128xf32>
    %c0_2 = arith.constant 0 : index
    %c0_3 = arith.constant 0 : index
    %4 = vector.load %arg3[%c0_2, %c0_3] : memref<32x1024xbf16, #tpu.memory_space<vmem>>, vector<32x1024xbf16>
    %c0_4 = arith.constant 0 : index
    %c0_5 = arith.constant 0 : index
    %5 = vector.load %arg4[%c0_4, %c0_5] : memref<1024x128xbf16, #tpu.memory_space<vmem>>, vector<1024x128xbf16>
    %cst = arith.constant dense<0.000000e+00> : vector<32x128xf32>
    %6 = tpu.matmul %4, %5, %cst {dimension_numbers = #tpu.dot_dimension_numbers<[1], [0], [0], [1], [0, 0, 1, 1], [], []>} : vector<32x1024xbf16>, vector<1024x128xbf16>, vector<32x128xf32> -> vector<32x128xf32>
    %7 = arith.addf %3, %6 : vector<32x128xf32>
    %c0_6 = arith.constant 0 : index
    %c0_7 = arith.constant 0 : index
    %8 = vector.load %arg8[%c0_6, %c0_7] : memref<32x128xf32, #tpu.memory_space<vmem>>, vector<32x128xf32>
    tpu.vector_store %arg8[%c0_6, %c0_7], %7 {strides = array<i32>} : memref<32x128xf32, #tpu.memory_space<vmem>>, vector<32x128xf32>,
    %c0_i32_8 = arith.constant 0 : i32
    %9 = arith.cmpi eq, %arg2, %c0_i32_8 : i32
    %10 = arith.extui %9 : i1 to i32
    %c0_i32_9 = arith.constant 0 : i32
    %11 = arith.cmpi ne, %10, %c0_i32_9 : i32
    scf.if %11 {
      %c0_10 = arith.constant 0 : index
      %c0_11 = arith.constant 0 : index
      %12 = vector.load %arg8[%c0_10, %c0_11] : memref<32x128xf32, #tpu.memory_space<vmem>>, vector<32x128xf32>
      %c0_12 = arith.constant 0 : index
      %c0_13 = arith.constant 0 : index
      %13 = vector.load %arg5[%c0_12, %c0_13] : memref<32x128xf32, #tpu.memory_space<vmem>>, vector<32x128xf32>
      tpu.vector_store %arg5[%c0_12, %c0_13], %12 {strides = array<i32>} : memref<32x128xf32, #tpu.memory_space<vmem>>, vector<32x128xf32>,
      %cst_14 = arith.constant dense<0.000000e+00> : vector<128xf32>
      %14 = vector.multi_reduction <add>, %12, %cst_14 [0] : vector<32x128xf32> to vector<128xf32>
      %15 = vector.shape_cast %14 : vector<128xf32> to vector<1x128xf32>
      %c0_15 = arith.constant 0 : index
      %c0_16 = arith.constant 0 : index
      %16 = vector.load %arg6[%c0_15, %c0_16] : memref<1x128xf32, #tpu.memory_space<vmem>>, vector<1x128xf32>
      tpu.vector_store %arg6[%c0_15, %c0_16], %15 {strides = array<i32>} : memref<1x128xf32, #tpu.memory_space<vmem>>, vector<1x128xf32>,
      %17 = arith.mulf %12, %12 : vector<32x128xf32>
      %cst_17 = arith.constant dense<0.000000e+00> : vector<128xf32>
      %18 = vector.multi_reduction <add>, %17, %cst_17 [0] : vector<32x128xf32> to vector<128xf32>
      %19 = vector.shape_cast %18 : vector<128xf32> to vector<1x128xf32>
      %c0_18 = arith.constant 0 : index
      %c0_19 = arith.constant 0 : index
      %20 = vector.load %arg7[%c0_18, %c0_19] : memref<1x128xf32, #tpu.memory_space<vmem>>, vector<1x128xf32>
      tpu.vector_store %arg7[%c0_18, %c0_19], %19 {strides = array<i32>} : memref<1x128xf32, #tpu.memory_space<vmem>>, vector<1x128xf32>,
    } else {
    }
    return
  }
  func.func @transform_0(%arg0: i32, %arg1: i32, %arg2: i32) -> (i32, i32) {
    %c0_i32 = arith.constant 0 : i32
    return %arg0, %arg2 : i32, i32
  }
  func.func @transform_1(%arg0: i32, %arg1: i32, %arg2: i32) -> (i32, i32) {
    %c0_i32 = arith.constant 0 : i32
    return %arg2, %arg1 : i32, i32
  }
  func.func @transform_2(%arg0: i32, %arg1: i32, %arg2: i32) -> (i32, i32) {
    %c0_i32 = arith.constant 0 : i32
    return %arg0, %arg1 : i32, i32
  }
  func.func @transform_3(%arg0: i32, %arg1: i32, %arg2: i32) -> (i32, i32) {
    %c0_i32 = arith.constant 0 : i32
    return %arg0, %arg1 : i32, i32
  }
  func.func @transform_4(%arg0: i32, %arg1: i32, %arg2: i32) -> (i32, i32) {
    %c0_i32 = arith.constant 0 : i32
    return %arg0, %arg1 : i32, i32
  }
}

module attributes {stable_mosaic.version = 11 : i64} {
  func.func @bn_act_kernel(%arg0: i32, %arg1: i32, %arg2: memref<32x128xf32, #tpu.memory_space<vmem>>, %arg3: memref<1x128xf32, #tpu.memory_space<vmem>>, %arg4: memref<1x128xf32, #tpu.memory_space<vmem>>, %arg5: memref<32x128xf32, #tpu.memory_space<vmem>>) attributes {dimension_semantics = [#tpu.dimension_semantics<parallel>, #tpu.dimension_semantics<parallel>], iteration_bounds = array<i64: 1, 1>, scalar_prefetch = 0 : i64, scratch_operands = 0 : i64, tpu.core_type = #tpu.core_type<tc>, window_params = [{transform_indices = @transform_0, window_bounds = array<i64: 32, 128>}, {transform_indices = @transform_1, window_bounds = array<i64: 1, 128>}, {transform_indices = @transform_2, window_bounds = array<i64: 1, 128>}, {transform_indices = @transform_3, window_bounds = array<i64: 32, 128>}]} {
    %c0 = arith.constant 0 : index
    %c0_0 = arith.constant 0 : index
    %0 = vector.load %arg2[%c0, %c0_0] : memref<32x128xf32, #tpu.memory_space<vmem>>, vector<32x128xf32>
    %c0_1 = arith.constant 0 : index
    %c0_2 = arith.constant 0 : index
    %1 = vector.load %arg3[%c0_1, %c0_2] : memref<1x128xf32, #tpu.memory_space<vmem>>, vector<1x128xf32>
    %2 = vector.broadcast %1 : vector<1x128xf32> to vector<32x128xf32>
    %3 = arith.mulf %0, %2 : vector<32x128xf32>
    %c0_3 = arith.constant 0 : index
    %c0_4 = arith.constant 0 : index
    %4 = vector.load %arg4[%c0_3, %c0_4] : memref<1x128xf32, #tpu.memory_space<vmem>>, vector<1x128xf32>
    %5 = vector.broadcast %4 : vector<1x128xf32> to vector<32x128xf32>
    %6 = arith.addf %3, %5 : vector<32x128xf32>
    %cst = arith.constant 0.000000e+00 : f32
    %7 = vector.broadcast %cst : f32 to vector<32x128xf32>
    %8 = arith.maximumf %6, %7 : vector<32x128xf32>
    %c0_5 = arith.constant 0 : index
    %c0_6 = arith.constant 0 : index
    %9 = vector.load %arg5[%c0_5, %c0_6] : memref<32x128xf32, #tpu.memory_space<vmem>>, vector<32x128xf32>
    tpu.vector_store %arg5[%c0_5, %c0_6], %8 {strides = array<i32>} : memref<32x128xf32, #tpu.memory_space<vmem>>, vector<32x128xf32>,
    return
  }
  func.func @transform_0(%arg0: i32, %arg1: i32) -> (i32, i32) {
    %c0_i32 = arith.constant 0 : i32
    return %arg0, %arg1 : i32, i32
  }
  func.func @transform_1(%arg0: i32, %arg1: i32) -> (i32, i32) {
    %c0_i32 = arith.constant 0 : i32
    %c0_i32_0 = arith.constant 0 : i32
    return %c0_i32, %arg1 : i32, i32
  }
  func.func @transform_2(%arg0: i32, %arg1: i32) -> (i32, i32) {
    %c0_i32 = arith.constant 0 : i32
    %c0_i32_0 = arith.constant 0 : i32
    return %c0_i32, %arg1 : i32, i32
  }
  func.func @transform_3(%arg0: i32, %arg1: i32) -> (i32, i32) {
    %c0_i32 = arith.constant 0 : i32
    return %arg0, %arg1 : i32, i32
  }
}

module attributes {stable_mosaic.version = 11 : i64} {
  func.func @matmul_stats_kernel(%arg0: i32, %arg1: i32, %arg2: i32, %arg3: memref<32x72xbf16, #tpu.memory_space<vmem>>, %arg4: memref<72x128xbf16, #tpu.memory_space<vmem>>, %arg5: memref<32x128xf32, #tpu.memory_space<vmem>>, %arg6: memref<1x128xf32, #tpu.memory_space<vmem>>, %arg7: memref<1x128xf32, #tpu.memory_space<vmem>>, %arg8: memref<32x128xf32, #tpu.memory_space<vmem>>) attributes {dimension_semantics = [#tpu.dimension_semantics<parallel>, #tpu.dimension_semantics<parallel>, #tpu.dimension_semantics<arbitrary>], iteration_bounds = array<i64: 1, 1, 1>, scalar_prefetch = 0 : i64, scratch_operands = 1 : i64, tpu.core_type = #tpu.core_type<tc>, window_params = [{transform_indices = @transform_0, window_bounds = array<i64: 32, 72>}, {transform_indices = @transform_1, window_bounds = array<i64: 72, 128>}, {transform_indices = @transform_2, window_bounds = array<i64: 32, 128>}, {transform_indices = @transform_3, window_bounds = array<i64: 1, 128>}, {transform_indices = @transform_4, window_bounds = array<i64: 1, 128>}]} {
    %c0_i32 = arith.constant 0 : i32
    %0 = arith.cmpi eq, %arg2, %c0_i32 : i32
    %1 = arith.extui %0 : i1 to i32
    %c0_i32_0 = arith.constant 0 : i32
    %2 = arith.cmpi ne, %1, %c0_i32_0 : i32
    scf.if %2 {
      %cst_10 = arith.constant 0.000000e+00 : f32
      %12 = vector.broadcast %cst_10 : f32 to vector<32x128xf32>
      %c0_11 = arith.constant 0 : index
      %c0_12 = arith.constant 0 : index
      %13 = vector.load %arg8[%c0_11, %c0_12] : memref<32x128xf32, #tpu.memory_space<vmem>>, vector<32x128xf32>
      tpu.vector_store %arg8[%c0_11, %c0_12], %12 {strides = array<i32>} : memref<32x128xf32, #tpu.memory_space<vmem>>, vector<32x128xf32>,
    } else {
    }
    %c0 = arith.constant 0 : index
    %c0_1 = arith.constant 0 : index
    %3 = vector.load %arg8[%c0, %c0_1] : memref<32x128xf32, #tpu.memory_space<vmem>>, vector<32x128xf32>
    %c0_2 = arith.constant 0 : index
    %c0_3 = arith.constant 0 : index
    %4 = vector.load %arg3[%c0_2, %c0_3] : memref<32x72xbf16, #tpu.memory_space<vmem>>, vector<32x72xbf16>
    %c0_4 = arith.constant 0 : index
    %c0_5 = arith.constant 0 : index
    %5 = vector.load %arg4[%c0_4, %c0_5] : memref<72x128xbf16, #tpu.memory_space<vmem>>, vector<72x128xbf16>
    %cst = arith.constant dense<0.000000e+00> : vector<32x128xf32>
    %6 = tpu.matmul %4, %5, %cst {dimension_numbers = #tpu.dot_dimension_numbers<[1], [0], [0], [1], [0, 0, 1, 1], [], []>} : vector<32x72xbf16>, vector<72x128xbf16>, vector<32x128xf32> -> vector<32x128xf32>
    %7 = arith.addf %3, %6 : vector<32x128xf32>
    %c0_6 = arith.constant 0 : index
    %c0_7 = arith.constant 0 : index
    %8 = vector.load %arg8[%c0_6, %c0_7] : memref<32x128xf32, #tpu.memory_space<vmem>>, vector<32x128xf32>
    tpu.vector_store %arg8[%c0_6, %c0_7], %7 {strides = array<i32>} : memref<32x128xf32, #tpu.memory_space<vmem>>, vector<32x128xf32>,
    %c0_i32_8 = arith.constant 0 : i32
    %9 = arith.cmpi eq, %arg2, %c0_i32_8 : i32
    %10 = arith.extui %9 : i1 to i32
    %c0_i32_9 = arith.constant 0 : i32
    %11 = arith.cmpi ne, %10, %c0_i32_9 : i32
    scf.if %11 {
      %c0_10 = arith.constant 0 : index
      %c0_11 = arith.constant 0 : index
      %12 = vector.load %arg8[%c0_10, %c0_11] : memref<32x128xf32, #tpu.memory_space<vmem>>, vector<32x128xf32>
      %c0_12 = arith.constant 0 : index
      %c0_13 = arith.constant 0 : index
      %13 = vector.load %arg5[%c0_12, %c0_13] : memref<32x128xf32, #tpu.memory_space<vmem>>, vector<32x128xf32>
      tpu.vector_store %arg5[%c0_12, %c0_13], %12 {strides = array<i32>} : memref<32x128xf32, #tpu.memory_space<vmem>>, vector<32x128xf32>,
      %cst_14 = arith.constant dense<0.000000e+00> : vector<128xf32>
      %14 = vector.multi_reduction <add>, %12, %cst_14 [0] : vector<32x128xf32> to vector<128xf32>
      %15 = vector.shape_cast %14 : vector<128xf32> to vector<1x128xf32>
      %c0_15 = arith.constant 0 : index
      %c0_16 = arith.constant 0 : index
      %16 = vector.load %arg6[%c0_15, %c0_16] : memref<1x128xf32, #tpu.memory_space<vmem>>, vector<1x128xf32>
      tpu.vector_store %arg6[%c0_15, %c0_16], %15 {strides = array<i32>} : memref<1x128xf32, #tpu.memory_space<vmem>>, vector<1x128xf32>,
      %17 = arith.mulf %12, %12 : vector<32x128xf32>
      %cst_17 = arith.constant dense<0.000000e+00> : vector<128xf32>
      %18 = vector.multi_reduction <add>, %17, %cst_17 [0] : vector<32x128xf32> to vector<128xf32>
      %19 = vector.shape_cast %18 : vector<128xf32> to vector<1x128xf32>
      %c0_18 = arith.constant 0 : index
      %c0_19 = arith.constant 0 : index
      %20 = vector.load %arg7[%c0_18, %c0_19] : memref<1x128xf32, #tpu.memory_space<vmem>>, vector<1x128xf32>
      tpu.vector_store %arg7[%c0_18, %c0_19], %19 {strides = array<i32>} : memref<1x128xf32, #tpu.memory_space<vmem>>, vector<1x128xf32>,
    } else {
    }
    return
  }
  func.func @transform_0(%arg0: i32, %arg1: i32, %arg2: i32) -> (i32, i32) {
    %c0_i32 = arith.constant 0 : i32
    return %arg0, %arg2 : i32, i32
  }
  func.func @transform_1(%arg0: i32, %arg1: i32, %arg2: i32) -> (i32, i32) {
    %c0_i32 = arith.constant 0 : i32
    return %arg2, %arg1 : i32, i32
  }
  func.func @transform_2(%arg0: i32, %arg1: i32, %arg2: i32) -> (i32, i32) {
    %c0_i32 = arith.constant 0 : i32
    return %arg0, %arg1 : i32, i32
  }
  func.func @transform_3(%arg0: i32, %arg1: i32, %arg2: i32) -> (i32, i32) {
    %c0_i32 = arith.constant 0 : i32
    return %arg0, %arg1 : i32, i32
  }
  func.func @transform_4(%arg0: i32, %arg1: i32, %arg2: i32) -> (i32, i32) {
    %c0_i32 = arith.constant 0 : i32
    return %arg0, %arg1 : i32, i32
  }
}

module attributes {stable_mosaic.version = 11 : i64} {
  func.func @bn_res_act_kernel(%arg0: i32, %arg1: i32, %arg2: memref<32x128xf32, #tpu.memory_space<vmem>>, %arg3: memref<32x64xf32, #tpu.memory_space<vmem>>, %arg4: memref<64x128xf32, #tpu.memory_space<vmem>>, %arg5: memref<1x128xf32, #tpu.memory_space<vmem>>, %arg6: memref<1x128xf32, #tpu.memory_space<vmem>>, %arg7: memref<1x128xf32, #tpu.memory_space<vmem>>, %arg8: memref<32x128xf32, #tpu.memory_space<vmem>>) attributes {dimension_semantics = [#tpu.dimension_semantics<parallel>, #tpu.dimension_semantics<parallel>], iteration_bounds = array<i64: 1, 1>, scalar_prefetch = 0 : i64, scratch_operands = 0 : i64, tpu.core_type = #tpu.core_type<tc>, window_params = [{transform_indices = @transform_0, window_bounds = array<i64: 32, 128>}, {transform_indices = @transform_1, window_bounds = array<i64: 32, 64>}, {transform_indices = @transform_2, window_bounds = array<i64: 64, 128>}, {transform_indices = @transform_3, window_bounds = array<i64: 1, 128>}, {transform_indices = @transform_4, window_bounds = array<i64: 1, 128>}, {transform_indices = @transform_5, window_bounds = array<i64: 1, 128>}, {transform_indices = @transform_6, window_bounds = array<i64: 32, 128>}]} {
    %c0 = arith.constant 0 : index
    %c0_0 = arith.constant 0 : index
    %0 = vector.load %arg3[%c0, %c0_0] : memref<32x64xf32, #tpu.memory_space<vmem>>, vector<32x64xf32>
    %c0_1 = arith.constant 0 : index
    %c0_2 = arith.constant 0 : index
    %1 = vector.load %arg4[%c0_1, %c0_2] : memref<64x128xf32, #tpu.memory_space<vmem>>, vector<64x128xf32>
    %cst = arith.constant dense<0.000000e+00> : vector<32x128xf32>
    %2 = tpu.matmul %0, %1, %cst {dimension_numbers = #tpu.dot_dimension_numbers<[1], [0], [0], [1], [0, 0, 1, 1], [], []>} : vector<32x64xf32>, vector<64x128xf32>, vector<32x128xf32> -> vector<32x128xf32>
    %c0_3 = arith.constant 0 : index
    %c0_4 = arith.constant 0 : index
    %3 = vector.load %arg5[%c0_3, %c0_4] : memref<1x128xf32, #tpu.memory_space<vmem>>, vector<1x128xf32>
    %4 = vector.broadcast %3 : vector<1x128xf32> to vector<32x128xf32>
    %5 = arith.addf %2, %4 : vector<32x128xf32>
    %c0_5 = arith.constant 0 : index
    %c0_6 = arith.constant 0 : index
    %6 = vector.load %arg2[%c0_5, %c0_6] : memref<32x128xf32, #tpu.memory_space<vmem>>, vector<32x128xf32>
    %c0_7 = arith.constant 0 : index
    %c0_8 = arith.constant 0 : index
    %7 = vector.load %arg6[%c0_7, %c0_8] : memref<1x128xf32, #tpu.memory_space<vmem>>, vector<1x128xf32>
    %8 = vector.broadcast %7 : vector<1x128xf32> to vector<32x128xf32>
    %9 = arith.mulf %6, %8 : vector<32x128xf32>
    %c0_9 = arith.constant 0 : index
    %c0_10 = arith.constant 0 : index
    %10 = vector.load %arg7[%c0_9, %c0_10] : memref<1x128xf32, #tpu.memory_space<vmem>>, vector<1x128xf32>
    %11 = vector.broadcast %10 : vector<1x128xf32> to vector<32x128xf32>
    %12 = arith.addf %9, %11 : vector<32x128xf32>
    %13 = arith.addf %12, %5 : vector<32x128xf32>
    %cst_11 = arith.constant 0.000000e+00 : f32
    %14 = vector.broadcast %cst_11 : f32 to vector<32x128xf32>
    %15 = arith.maximumf %13, %14 : vector<32x128xf32>
    %c0_12 = arith.constant 0 : index
    %c0_13 = arith.constant 0 : index
    %16 = vector.load %arg8[%c0_12, %c0_13] : memref<32x128xf32, #tpu.memory_space<vmem>>, vector<32x128xf32>
    tpu.vector_store %arg8[%c0_12, %c0_13], %15 {strides = array<i32>} : memref<32x128xf32, #tpu.memory_space<vmem>>, vector<32x128xf32>,
    return
  }
  func.func @transform_0(%arg0: i32, %arg1: i32) -> (i32, i32) {
    %c0_i32 = arith.constant 0 : i32
    return %arg0, %arg1 : i32, i32
  }
  func.func @transform_1(%arg0: i32, %arg1: i32) -> (i32, i32) {
    %c0_i32 = arith.constant 0 : i32
    %c0_i32_0 = arith.constant 0 : i32
    return %arg0, %c0_i32 : i32, i32
  }
  func.func @transform_2(%arg0: i32, %arg1: i32) -> (i32, i32) {
    %c0_i32 = arith.constant 0 : i32
    %c0_i32_0 = arith.constant 0 : i32
    return %c0_i32, %arg1 : i32, i32
  }
  func.func @transform_3(%arg0: i32, %arg1: i32) -> (i32, i32) {
    %c0_i32 = arith.constant 0 : i32
    %c0_i32_0 = arith.constant 0 : i32
    return %c0_i32, %arg1 : i32, i32
  }
  func.func @transform_4(%arg0: i32, %arg1: i32) -> (i32, i32) {
    %c0_i32 = arith.constant 0 : i32
    %c0_i32_0 = arith.constant 0 : i32
    return %c0_i32, %arg1 : i32, i32
  }
  func.func @transform_5(%arg0: i32, %arg1: i32) -> (i32, i32) {
    %c0_i32 = arith.constant 0 : i32
    %c0_i32_0 = arith.constant 0 : i32
    return %c0_i32, %arg1 : i32, i32
  }
  func.func @transform_6(%arg0: i32, %arg1: i32) -> (i32, i32) {
    %c0_i32 = arith.constant 0 : i32
    return %arg0, %arg1 : i32, i32
  }
}

module attributes {stable_mosaic.version = 11 : i64} {
  func.func @avgpool_kernel(%arg0: i32, %arg1: i32, %arg2: memref<2x16x64xf32, #tpu.memory_space<vmem>>, %arg3: memref<2x64xf32, #tpu.memory_space<vmem>>) attributes {dimension_semantics = [#tpu.dimension_semantics<parallel>, #tpu.dimension_semantics<arbitrary>], iteration_bounds = array<i64: 1, 1>, scalar_prefetch = 0 : i64, scratch_operands = 0 : i64, tpu.core_type = #tpu.core_type<tc>, window_params = [{transform_indices = @transform_0, window_bounds = array<i64: 2, 16, 64>}, {transform_indices = @transform_1, window_bounds = array<i64: 2, 64>}]} {
    %c0_i32 = arith.constant 0 : i32
    %0 = arith.cmpi eq, %arg1, %c0_i32 : i32
    %1 = arith.extui %0 : i1 to i32
    %c0_i32_0 = arith.constant 0 : i32
    %2 = arith.cmpi ne, %1, %c0_i32_0 : i32
    scf.if %2 {
      %cst_9 = arith.constant 0.000000e+00 : f32
      %11 = vector.broadcast %cst_9 : f32 to vector<2x64xf32>
      %c0_10 = arith.constant 0 : index
      %c0_11 = arith.constant 0 : index
      %12 = vector.load %arg3[%c0_10, %c0_11] : memref<2x64xf32, #tpu.memory_space<vmem>>, vector<2x64xf32>
      tpu.vector_store %arg3[%c0_10, %c0_11], %11 {strides = array<i32>} : memref<2x64xf32, #tpu.memory_space<vmem>>, vector<2x64xf32>,
    } else {
    }
    %c0 = arith.constant 0 : index
    %c0_1 = arith.constant 0 : index
    %3 = vector.load %arg3[%c0, %c0_1] : memref<2x64xf32, #tpu.memory_space<vmem>>, vector<2x64xf32>
    %c0_2 = arith.constant 0 : index
    %c0_3 = arith.constant 0 : index
    %c0_4 = arith.constant 0 : index
    %4 = vector.load %arg2[%c0_2, %c0_3, %c0_4] : memref<2x16x64xf32, #tpu.memory_space<vmem>>, vector<2x16x64xf32>
    %cst = arith.constant dense<0.000000e+00> : vector<2x64xf32>
    %5 = vector.multi_reduction <add>, %4, %cst [1] : vector<2x16x64xf32> to vector<2x64xf32>
    %6 = arith.addf %3, %5 : vector<2x64xf32>
    %c0_5 = arith.constant 0 : index
    %c0_6 = arith.constant 0 : index
    %7 = vector.load %arg3[%c0_5, %c0_6] : memref<2x64xf32, #tpu.memory_space<vmem>>, vector<2x64xf32>
    tpu.vector_store %arg3[%c0_5, %c0_6], %6 {strides = array<i32>} : memref<2x64xf32, #tpu.memory_space<vmem>>, vector<2x64xf32>,
    %c0_i32_7 = arith.constant 0 : i32
    %8 = arith.cmpi eq, %arg1, %c0_i32_7 : i32
    %9 = arith.extui %8 : i1 to i32
    %c0_i32_8 = arith.constant 0 : i32
    %10 = arith.cmpi ne, %9, %c0_i32_8 : i32
    scf.if %10 {
      %c0_9 = arith.constant 0 : index
      %c0_10 = arith.constant 0 : index
      %11 = vector.load %arg3[%c0_9, %c0_10] : memref<2x64xf32, #tpu.memory_space<vmem>>, vector<2x64xf32>
      %cst_11 = arith.constant 6.250000e-02 : f32
      %12 = vector.broadcast %cst_11 : f32 to vector<2x64xf32>
      %13 = arith.mulf %11, %12 : vector<2x64xf32>
      %c0_12 = arith.constant 0 : index
      %c0_13 = arith.constant 0 : index
      %14 = vector.load %arg3[%c0_12, %c0_13] : memref<2x64xf32, #tpu.memory_space<vmem>>, vector<2x64xf32>
      tpu.vector_store %arg3[%c0_12, %c0_13], %13 {strides = array<i32>} : memref<2x64xf32, #tpu.memory_space<vmem>>, vector<2x64xf32>,
    } else {
    }
    return
  }
  func.func @transform_0(%arg0: i32, %arg1: i32) -> (i32, i32, i32) {
    %c0_i32 = arith.constant 0 : i32
    %c0_i32_0 = arith.constant 0 : i32
    return %c0_i32, %arg1, %arg0 : i32, i32, i32
  }
  func.func @transform_1(%arg0: i32, %arg1: i32) -> (i32, i32) {
    %c0_i32 = arith.constant 0 : i32
    %c0_i32_0 = arith.constant 0 : i32
    return %c0_i32, %arg0 : i32, i32
  }
}

</mosaic_0001>

<bundles_post_ra>
// kernel: encoder_forward.14
= control target key start
LH: loop header
LB: loop body
LE: loop exit
PB: predicated region body
PF: predicated region fallthrough
CT: control target
= control target key end

     0   :  { %s896_s0 = inlined_call_operand.vmem [shape: f32[512,128], index: 0, kind: input, shape index: {}]   ;;  %s897_s1 = inlined_call_operand.vmem [shape: f32[1,128], index: 1, kind: input, shape index: {}]   ;;  %s898_s2 = inlined_call_operand.vmem [shape: f32[1,128], index: 2, kind: input, shape index: {}]   ;;  %s899_s3 = inlined_call_operand.vmem [shape: f32[512,128], index: 3, kind: output, shape index: {}]  }
   0x1   :  { %v14_v0 = vld [vmem:[%s896_s0] sm:$0xff]  ;;  %v15_v4 = vld [vmem:[%s896_s0 + $0x8] sm:$0xff]  ;;  %v16_v5 = vld [vmem:[%s896_s0 + $0x10] sm:$0xff] }
   0x2   :  { %v380_v1 = vld [vmem:[%s897_s1] ss:$0 sm:$0xff]  ;;  %v17_v6 = vld [vmem:[%s896_s0 + $0x18] sm:$0xff]  ;;  %v19_v11 = vld [vmem:[%s896_s0 + $0x28] sm:$0xff] }
   0x3   :  { %v385_v2 = vld [vmem:[%s898_s2] ss:$0 sm:$0xff]  ;;  %v85_v3 = vmul.f32 %v380_v1, %v14_v0  ;;  %v86_v7 = vmul.f32 %v380_v1, %v15_v4  ;;  %v87_v8 = vmul.f32 %v380_v1, %v16_v5  ;;  %v88_v9 = vmul.f32 %v380_v1, %v17_v6  ;;  %v20_v12 = vld [vmem:[%s896_s0 + $0x30] sm:$0xff]  ;;  %v21_v17 = vld [vmem:[%s896_s0 + $0x38] sm:$0xff] }
   0x4   :  { %v18_v10 = vld [vmem:[%s896_s0 + $0x20] sm:$0xff]  ;;  %v90_v15 = vmul.f32 %v380_v1, %v19_v11  ;;  %v91_v16 = vmul.f32 %v380_v1, %v20_v12  ;;  %v92_v21 = vmul.f32 %v380_v1, %v21_v17  ;;  %v23_v27 = vld [vmem:[%s896_s0 + $0x48] sm:$0xff]  ;;  %v24_v28 = vld [vmem:[%s896_s0 + $0x50] sm:$0xff] }
   0x5   :  { %v156_v13 = vadd.f32 %v385_v2, %v85_v3  ;;  %v89_v14 = vmul.f32 %v380_v1, %v18_v10  ;;  %v157_v18 = vadd.f32 %v385_v2, %v86_v7  ;;  %v158_v19 = vadd.f32 %v385_v2, %v87_v8  ;;  %v22_v22 = vld [vmem:[%s896_s0 + $0x40] sm:$0xff]  ;;  %v25_v29 = vld [vmem:[%s896_s0 + $0x58] sm:$0xff]  ;;  %v27_v35 = vld [vmem:[%s896_s0 + $0x68] sm:$0xff] }
   0x6   :  { %v159_v20 = vadd.f32 %v385_v2, %v88_v9  ;;  %v161_v25 = vadd.f32 %v385_v2, %v90_v15  ;;  %v162_v26 = vadd.f32 %v385_v2, %v91_v16  ;;  %v163_v33 = vadd.f32 %v385_v2, %v92_v21  ;;  %v26_v34 = vld [vmem:[%s896_s0 + $0x60] sm:$0xff]  ;;  %v28_v36 = vld [vmem:[%s896_s0 + $0x70] sm:$0xff]  ;;  %v29_v41 = vld [vmem:[%s896_s0 + $0x78] sm:$0xff] }
   0x7   :  { %v220_v23 = vmax.f32 %v156_v13, 0.0  ;;  %v160_v24 = vadd.f32 %v385_v2, %v89_v14  ;;  %v221_v30 = vmax.f32 %v157_v18, 0.0  ;;  %v222_v31 = vmax.f32 %v158_v19, 0.0  ;;  %v30_v54 = vld [vmem:[%s896_s0 + $0x80] sm:$0xff]  ;;  %v31_v59 = vld [vmem:[%s896_s0 + $0x88] sm:$0xff]  ;;  %v32_v60 = vld [vmem:[%s896_s0 + $0x90] sm:$0xff] }
   0x8   :  { %v223_v32 = vmax.f32 %v159_v20, 0.0  ;;  %v225_v38 = vmax.f32 %v161_v25, 0.0  ;;  %v226_v39 = vmax.f32 %v162_v26, 0.0  ;;  %v93_v40 = vmul.f32 %v380_v1, %v22_v22  ;;  %v33_v61 = vld [vmem:[%s896_s0 + $0x98] sm:$0xff]  ;;  %v34_v4 = vld [vmem:[%s896_s0 + $0xa0] sm:$0xff]  ;;  %v35_v5 = vld [vmem:[%s896_s0 + $0xa8] sm:$0xff] }
   0x9   :  { %284 = vst [vmem:[%s899_s3] sm:$0xff] %v220_v23  ;;  %v224_v37 = vmax.f32 %v160_v24, 0.0  ;;  %285 = vst [vmem:[%s899_s3 + $0x8] sm:$0xff] %v221_v30  ;;  %v227_v42 = vmax.f32 %v163_v33, 0.0  ;;  %v94_v43 = vmul.f32 %v380_v1, %v23_v27  ;;  %v95_v44 = vmul.f32 %v380_v1, %v24_v28  ;;  %v36_v6 = vld [vmem:[%s896_s0 + $0xb0] sm:$0xff]  ;;  %v37_v11 = vld [vmem:[%s896_s0 + $0xb8] sm:$0xff] }
   0xa   :  { %286 = vst [vmem:[%s899_s3 + $0x10] sm:$0xff] %v222_v31  ;;  %287 = vst [vmem:[%s899_s3 + $0x18] sm:$0xff] %v223_v32  ;;  %v96_v45 = vmul.f32 %v380_v1, %v25_v29  ;;  %v164_v46 = vadd.f32 %v385_v2, %v93_v40  ;;  %v97_v47 = vmul.f32 %v380_v1, %v26_v34  ;;  %v38_v24 = vld [vmem:[%s896_s0 + $0xc0] sm:$0xff]  ;;  %v39_v29 = vld [vmem:[%s896_s0 + $0xc8] sm:$0xff] }
   0xb   :  { %288 = vst [vmem:[%s899_s3 + $0x20] sm:$0xff] %v224_v37  ;;  %289 = vst [vmem:[%s899_s3 + $0x28] sm:$0xff] %v225_v38  ;;  %v98_v48 = vmul.f32 %v380_v1, %v27_v35  ;;  %v99_v49 = vmul.f32 %v380_v1, %v28_v36  ;;  %v165_v50 = vadd.f32 %v385_v2, %v94_v43  ;;  %v40_v30 = vld [vmem:[%s896_s0 + $0xd0] sm:$0xff]  ;;  %v41_v31 = vld [vmem:[%s896_s0 + $0xd8] sm:$0xff] }
   0xc   :  { %290 = vst [vmem:[%s899_s3 + $0x30] sm:$0xff] %v226_v39  ;;  %291 = vst [vmem:[%s899_s3 + $0x38] sm:$0xff] %v227_v42  ;;  %v166_v51 = vadd.f32 %v385_v2, %v95_v44  ;;  %v167_v52 = vadd.f32 %v385_v2, %v96_v45  ;;  %v100_v53 = vmul.f32 %v380_v1, %v29_v41  ;;  %v228_v55 = vmax.f32 %v164_v46, 0.0  ;;  %v42_v36 = vld [vmem:[%s896_s0 + $0xe0] sm:$0xff]  ;;  %v43_v37 = vld [vmem:[%s896_s0 + $0xe8] sm:$0xff] }
   0xd   :  { %v168_v56 = vadd.f32 %v385_v2, %v97_v47  ;;  %v169_v57 = vadd.f32 %v385_v2, %v98_v48  ;;  %v170_v58 = vadd.f32 %v385_v2, %v99_v49  ;;  %v229_v62 = vmax.f32 %v165_v50, 0.0  ;;  %v44_v38 = vld [vmem:[%s896_s0 + $0xf0] sm:$0xff]  ;;  %v45_v43 = vld [vmem:[%s896_s0 + $0xf8] sm:$0xff] }
   0xe   :  { %v230_v63 = vmax.f32 %v166_v51, 0.0  ;;  %v231_v0 = vmax.f32 %v167_v52, 0.0  ;;  %v171_v3 = vadd.f32 %v385_v2, %v100_v53  ;;  %292 = vst [vmem:[%s899_s3 + $0x40] sm:$0xff] %v228_v55  ;;  %v101_v10 = vmul.f32 %v380_v1, %v30_v54 }
   0xf   :  { %v232_v7 = vmax.f32 %v168_v56, 0.0  ;;  %v233_v8 = vmax.f32 %v169_v57, 0.0  ;;  %v234_v9 = vmax.f32 %v170_v58, 0.0  ;;  %293 = vst [vmem:[%s899_s3 + $0x48] sm:$0xff] %v229_v62  ;;  %v102_v13 = vmul.f32 %v380_v1, %v31_v59  ;;  %v46_v56 = vld [vmem:[%s896_s0 + $0x100] sm:$0xff]  ;;  %v48_v62 = vld [vmem:[%s896_s0 + $0x110] sm:$0xff] }
  0x10   :  { %294 = vst [vmem:[%s899_s3 + $0x50] sm:$0xff] %v230_v63  ;;  %295 = vst [vmem:[%s899_s3 + $0x58] sm:$0xff] %v231_v0  ;;  %v235_v12 = vmax.f32 %v171_v3, 0.0  ;;  %v103_v14 = vmul.f32 %v380_v1, %v32_v60  ;;  %v104_v15 = vmul.f32 %v380_v1, %v33_v61  ;;  %v172_v16 = vadd.f32 %v385_v2, %v101_v10  ;;  %v47_v61 = vld [vmem:[%s896_s0 + $0x108] sm:$0xff]  ;;  %v49_v63 = vld [vmem:[%s896_s0 + $0x118] sm:$0xff] }
  0x11   :  { %296 = vst [vmem:[%s899_s3 + $0x60] sm:$0xff] %v232_v7  ;;  %297 = vst [vmem:[%s899_s3 + $0x68] sm:$0xff] %v233_v8  ;;  %v105_v17 = vmul.f32 %v380_v1, %v34_v4  ;;  %v106_v18 = vmul.f32 %v380_v1, %v35_v5  ;;  %v107_v19 = vmul.f32 %v380_v1, %v36_v6  ;;  %v50_v6 = vld [vmem:[%s896_s0 + $0x120] sm:$0xff]  ;;  %v51_v7 = vld [vmem:[%s896_s0 + $0x128] sm:$0xff] }
  0x12   :  { %298 = vst [vmem:[%s899_s3 + $0x70] sm:$0xff] %v234_v9  ;;  %299 = vst [vmem:[%s899_s3 + $0x78] sm:$0xff] %v235_v12  ;;  %v173_v20 = vadd.f32 %v385_v2, %v102_v13  ;;  %v174_v21 = vadd.f32 %v385_v2, %v103_v14  ;;  %v175_v22 = vadd.f32 %v385_v2, %v104_v15  ;;  %v236_v25 = vmax.f32 %v172_v16, 0.0  ;;  %v52_v8 = vld [vmem:[%s896_s0 + $0x130] sm:$0xff]  ;;  %v53_v13 = vld [vmem:[%s896_s0 + $0x138] sm:$0xff] }
  0x13   :  { %v108_v23 = vmul.f32 %v380_v1, %v37_v11  ;;  %v176_v26 = vadd.f32 %v385_v2, %v105_v17  ;;  %v177_v27 = vadd.f32 %v385_v2, %v106_v18  ;;  %v178_v28 = vadd.f32 %v385_v2, %v107_v19 }
  0x14   :  { %v237_v32 = vmax.f32 %v173_v20, 0.0  ;;  %v238_v33 = vmax.f32 %v174_v21, 0.0  ;;  %v239_v34 = vmax.f32 %v175_v22, 0.0  ;;  %300 = vst [vmem:[%s899_s3 + $0x80] sm:$0xff] %v236_v25  ;;  %v109_v42 = vmul.f32 %v380_v1, %v38_v24 }
  0x15   :  { %v179_v35 = vadd.f32 %v385_v2, %v108_v23  ;;  %v240_v39 = vmax.f32 %v176_v26, 0.0  ;;  %v241_v40 = vmax.f32 %v177_v27, 0.0  ;;  %v242_v41 = vmax.f32 %v178_v28, 0.0  ;;  %v54_v26 = vld [vmem:[%s896_s0 + $0x140] sm:$0xff] }
  0x16   :  { %301 = vst [vmem:[%s899_s3 + $0x88] sm:$0xff] %v237_v32  ;;  %302 = vst [vmem:[%s899_s3 + $0x90] sm:$0xff] %v238_v33  ;;  %v110_v45 = vmul.f32 %v380_v1, %v39_v29  ;;  %v111_v46 = vmul.f32 %v380_v1, %v40_v30  ;;  %v112_v47 = vmul.f32 %v380_v1, %v41_v31  ;;  %v55_v31 = vld [vmem:[%s896_s0 + $0x148] sm:$0xff]  ;;  %v56_v32 = vld [vmem:[%s896_s0 + $0x150] sm:$0xff] }
  0x17   :  { %303 = vst [vmem:[%s899_s3 + $0x98] sm:$0xff] %v239_v34  ;;  %v243_v44 = vmax.f32 %v179_v35, 0.0  ;;  %304 = vst [vmem:[%s899_s3 + $0xa0] sm:$0xff] %v240_v39  ;;  %v180_v48 = vadd.f32 %v385_v2, %v109_v42  ;;  %v113_v49 = vmul.f32 %v380_v1, %v42_v36  ;;  %v114_v50 = vmul.f32 %v380_v1, %v43_v37  ;;  %v57_v33 = vld [vmem:[%s896_s0 + $0x158] sm:$0xff]  ;;  %v59_v39 = vld [vmem:[%s896_s0 + $0x168] sm:$0xff] }
  0x18   :  { %305 = vst [vmem:[%s899_s3 + $0xa8] sm:$0xff] %v241_v40  ;;  %306 = vst [vmem:[%s899_s3 + $0xb0] sm:$0xff] %v242_v41  ;;  %v115_v51 = vmul.f32 %v380_v1, %v44_v38  ;;  %v181_v52 = vadd.f32 %v385_v2, %v110_v45  ;;  %v182_v53 = vadd.f32 %v385_v2, %v111_v46  ;;  %v58_v38 = vld [vmem:[%s896_s0 + $0x160] sm:$0xff]  ;;  %v60_v40 = vld [vmem:[%s896_s0 + $0x170] sm:$0xff] }
  0x19   :  { %307 = vst [vmem:[%s899_s3 + $0xb8] sm:$0xff] %v243_v44  ;;  %v183_v54 = vadd.f32 %v385_v2, %v112_v47  ;;  %v116_v55 = vmul.f32 %v380_v1, %v45_v43  ;;  %v244_v57 = vmax.f32 %v180_v48, 0.0  ;;  %v184_v58 = vadd.f32 %v385_v2, %v113_v49  ;;  %v61_v45 = vld [vmem:[%s896_s0 + $0x178] sm:$0xff] }
  0x1a   :  { %v185_v59 = vadd.f32 %v385_v2, %v114_v50  ;;  %v186_v60 = vadd.f32 %v385_v2, %v115_v51  ;;  %v245_v0 = vmax.f32 %v181_v52, 0.0  ;;  %v246_v3 = vmax.f32 %v182_v53, 0.0 }
  0x1b   :  { %v247_v4 = vmax.f32 %v183_v54, 0.0  ;;  %v187_v5 = vadd.f32 %v385_v2, %v116_v55  ;;  %308 = vst [vmem:[%s899_s3 + $0xc0] sm:$0xff] %v244_v57  ;;  %v248_v9 = vmax.f32 %v184_v58, 0.0  ;;  %v117_v12 = vmul.f32 %v380_v1, %v46_v56  ;;  %v62_v58 = vld [vmem:[%s896_s0 + $0x180] sm:$0xff] }
  0x1c   :  { %v249_v10 = vmax.f32 %v185_v59, 0.0  ;;  %v250_v11 = vmax.f32 %v186_v60, 0.0  ;;  %309 = vst [vmem:[%s899_s3 + $0xc8] sm:$0xff] %v245_v0  ;;  %310 = vst [vmem:[%s899_s3 + $0xd0] sm:$0xff] %v246_v3  ;;  %v118_v15 = vmul.f32 %v380_v1, %v47_v61  ;;  %v119_v16 = vmul.f32 %v380_v1, %v48_v62  ;;  %v64_v0 = vld [vmem:[%s896_s0 + $0x190] sm:$0xff]  ;;  %v65_v3 = vld [vmem:[%s896_s0 + $0x198] sm:$0xff] }
  0x1d   :  { %311 = vst [vmem:[%s899_s3 + $0xd8] sm:$0xff] %v247_v4  ;;  %v251_v14 = vmax.f32 %v187_v5, 0.0  ;;  %v120_v17 = vmul.f32 %v380_v1, %v49_v63  ;;  %312 = vst [vmem:[%s899_s3 + $0xe0] sm:$0xff] %v248_v9  ;;  %v188_v18 = vadd.f32 %v385_v2, %v117_v12  ;;  %v121_v19 = vmul.f32 %v380_v1, %v50_v6  ;;  %v63_v63 = vld [vmem:[%s896_s0 + $0x188] sm:$0xff] }
  0x1e   :  { %313 = vst [vmem:[%s899_s3 + $0xe8] sm:$0xff] %v249_v10  ;;  %314 = vst [vmem:[%s899_s3 + $0xf0] sm:$0xff] %v250_v11  ;;  %v122_v20 = vmul.f32 %v380_v1, %v51_v7  ;;  %v123_v21 = vmul.f32 %v380_v1, %v52_v8  ;;  %v189_v22 = vadd.f32 %v385_v2, %v118_v15  ;;  %v66_v8 = vld [vmem:[%s896_s0 + $0x1a0] sm:$0xff]  ;;  %v67_v9 = vld [vmem:[%s896_s0 + $0x1a8] sm:$0xff] }
  0x1f   :  { %315 = vst [vmem:[%s899_s3 + $0xf8] sm:$0xff] %v251_v14  ;;  %v190_v23 = vadd.f32 %v385_v2, %v119_v16  ;;  %v191_v24 = vadd.f32 %v385_v2, %v120_v17  ;;  %v124_v25 = vmul.f32 %v380_v1, %v53_v13  ;;  %v252_v27 = vmax.f32 %v188_v18, 0.0  ;;  %v68_v10 = vld [vmem:[%s896_s0 + $0x1b0] sm:$0xff]  ;;  %v69_v15 = vld [vmem:[%s896_s0 + $0x1b8] sm:$0xff] }
  0x20   :  { %v192_v28 = vadd.f32 %v385_v2, %v121_v19  ;;  %v193_v29 = vadd.f32 %v385_v2, %v122_v20  ;;  %v194_v30 = vadd.f32 %v385_v2, %v123_v21  ;;  %v253_v34 = vmax.f32 %v189_v22, 0.0 }
  0x21   :  { %v254_v35 = vmax.f32 %v190_v23, 0.0  ;;  %v255_v36 = vmax.f32 %v191_v24, 0.0  ;;  %v195_v37 = vadd.f32 %v385_v2, %v124_v25  ;;  %316 = vst [vmem:[%s899_s3 + $0x100] sm:$0xff] %v252_v27  ;;  %v125_v44 = vmul.f32 %v380_v1, %v54_v26 }
  0x22   :  { %v256_v41 = vmax.f32 %v192_v28, 0.0  ;;  %v257_v42 = vmax.f32 %v193_v29, 0.0  ;;  %v258_v43 = vmax.f32 %v194_v30, 0.0  ;;  %317 = vst [vmem:[%s899_s3 + $0x108] sm:$0xff] %v253_v34  ;;  %v126_v47 = vmul.f32 %v380_v1, %v55_v31  ;;  %v70_v28 = vld [vmem:[%s896_s0 + $0x1c0] sm:$0xff]  ;;  %v72_v34 = vld [vmem:[%s896_s0 + $0x1d0] sm:$0xff] }
  0x23   :  { %318 = vst [vmem:[%s899_s3 + $0x110] sm:$0xff] %v254_v35  ;;  %319 = vst [vmem:[%s899_s3 + $0x118] sm:$0xff] %v255_v36  ;;  %v259_v46 = vmax.f32 %v195_v37, 0.0  ;;  %v127_v48 = vmul.f32 %v380_v1, %v56_v32  ;;  %v128_v49 = vmul.f32 %v380_v1, %v57_v33  ;;  %v196_v50 = vadd.f32 %v385_v2, %v125_v44  ;;  %v71_v33 = vld [vmem:[%s896_s0 + $0x1c8] sm:$0xff]  ;;  %v73_v35 = vld [vmem:[%s896_s0 + $0x1d8] sm:$0xff] }
  0x24   :  { %320 = vst [vmem:[%s899_s3 + $0x120] sm:$0xff] %v256_v41  ;;  %321 = vst [vmem:[%s899_s3 + $0x128] sm:$0xff] %v257_v42  ;;  %v129_v51 = vmul.f32 %v380_v1, %v58_v38  ;;  %v130_v52 = vmul.f32 %v380_v1, %v59_v39  ;;  %v131_v53 = vmul.f32 %v380_v1, %v60_v40  ;;  %v74_v40 = vld [vmem:[%s896_s0 + $0x1e0] sm:$0xff]  ;;  %v75_v41 = vld [vmem:[%s896_s0 + $0x1e8] sm:$0xff] }
  0x25   :  { %322 = vst [vmem:[%s899_s3 + $0x130] sm:$0xff] %v258_v43  ;;  %323 = vst [vmem:[%s899_s3 + $0x138] sm:$0xff] %v259_v46  ;;  %v197_v54 = vadd.f32 %v385_v2, %v126_v47  ;;  %v198_v55 = vadd.f32 %v385_v2, %v127_v48  ;;  %v199_v56 = vadd.f32 %v385_v2, %v128_v49  ;;  %v260_v59 = vmax.f32 %v196_v50, 0.0  ;;  %v76_v42 = vld [vmem:[%s896_s0 + $0x1f0] sm:$0xff]  ;;  %v77_v47 = vld [vmem:[%s896_s0 + $0x1f8] sm:$0xff] }
  0x26   :  { %v132_v57 = vmul.f32 %v380_v1, %v61_v45  ;;  %v200_v60 = vadd.f32 %v385_v2, %v129_v51  ;;  %v201_v61 = vadd.f32 %v385_v2, %v130_v52  ;;  %v202_v62 = vadd.f32 %v385_v2, %v131_v53 }
  0x27   :  { %v261_v4 = vmax.f32 %v197_v54, 0.0  ;;  %v262_v5 = vmax.f32 %v198_v55, 0.0  ;;  %v263_v6 = vmax.f32 %v199_v56, 0.0  ;;  %324 = vst [vmem:[%s899_s3 + $0x140] sm:$0xff] %v260_v59  ;;  %v133_v14 = vmul.f32 %v380_v1, %v62_v58 }
  0x28   :  { %v203_v7 = vadd.f32 %v385_v2, %v132_v57  ;;  %v264_v11 = vmax.f32 %v200_v60, 0.0  ;;  %v265_v12 = vmax.f32 %v201_v61, 0.0  ;;  %v266_v13 = vmax.f32 %v202_v62, 0.0 }
  0x29   :  { %325 = vst [vmem:[%s899_s3 + $0x148] sm:$0xff] %v261_v4  ;;  %326 = vst [vmem:[%s899_s3 + $0x150] sm:$0xff] %v262_v5  ;;  %v134_v17 = vmul.f32 %v380_v1, %v63_v63  ;;  %v135_v18 = vmul.f32 %v380_v1, %v64_v0  ;;  %v136_v19 = vmul.f32 %v380_v1, %v65_v3 }
  0x2a   :  { %327 = vst [vmem:[%s899_s3 + $0x158] sm:$0xff] %v263_v6  ;;  %v267_v16 = vmax.f32 %v203_v7, 0.0  ;;  %328 = vst [vmem:[%s899_s3 + $0x160] sm:$0xff] %v264_v11  ;;  %v204_v20 = vadd.f32 %v385_v2, %v133_v14  ;;  %v137_v21 = vmul.f32 %v380_v1, %v66_v8  ;;  %v138_v22 = vmul.f32 %v380_v1, %v67_v9 }
  0x2b   :  { %329 = vst [vmem:[%s899_s3 + $0x168] sm:$0xff] %v265_v12  ;;  %330 = vst [vmem:[%s899_s3 + $0x170] sm:$0xff] %v266_v13  ;;  %v139_v23 = vmul.f32 %v380_v1, %v68_v10  ;;  %v205_v24 = vadd.f32 %v385_v2, %v134_v17  ;;  %v206_v25 = vadd.f32 %v385_v2, %v135_v18 }
  0x2c   :  { %331 = vst [vmem:[%s899_s3 + $0x178] sm:$0xff] %v267_v16  ;;  %v207_v26 = vadd.f32 %v385_v2, %v136_v19  ;;  %v140_v27 = vmul.f32 %v380_v1, %v69_v15  ;;  %v268_v29 = vmax.f32 %v204_v20, 0.0  ;;  %v208_v30 = vadd.f32 %v385_v2, %v137_v21 }
  0x2d   :  { %v209_v31 = vadd.f32 %v385_v2, %v138_v22  ;;  %v210_v32 = vadd.f32 %v385_v2, %v139_v23  ;;  %v269_v36 = vmax.f32 %v205_v24, 0.0  ;;  %v270_v37 = vmax.f32 %v206_v25, 0.0 }
  0x2e   :  { %v271_v38 = vmax.f32 %v207_v26, 0.0  ;;  %v211_v39 = vadd.f32 %v385_v2, %v140_v27  ;;  %332 = vst [vmem:[%s899_s3 + $0x180] sm:$0xff] %v268_v29  ;;  %v272_v43 = vmax.f32 %v208_v30, 0.0  ;;  %v141_v46 = vmul.f32 %v380_v1, %v70_v28 }
  0x2f   :  { %v273_v44 = vmax.f32 %v209_v31, 0.0  ;;  %v274_v45 = vmax.f32 %v210_v32, 0.0  ;;  %333 = vst [vmem:[%s899_s3 + $0x188] sm:$0xff] %v269_v36  ;;  %334 = vst [vmem:[%s899_s3 + $0x190] sm:$0xff] %v270_v37  ;;  %v142_v49 = vmul.f32 %v380_v1, %v71_v33  ;;  %v143_v50 = vmul.f32 %v380_v1, %v72_v34 }
  0x30   :  { %335 = vst [vmem:[%s899_s3 + $0x198] sm:$0xff] %v271_v38  ;;  %v275_v48 = vmax.f32 %v211_v39, 0.0  ;;  %v144_v51 = vmul.f32 %v380_v1, %v73_v35  ;;  %336 = vst [vmem:[%s899_s3 + $0x1a0] sm:$0xff] %v272_v43  ;;  %v212_v52 = vadd.f32 %v385_v2, %v141_v46  ;;  %v145_v53 = vmul.f32 %v380_v1, %v74_v40 }
  0x31   :  { %337 = vst [vmem:[%s899_s3 + $0x1a8] sm:$0xff] %v273_v44  ;;  %338 = vst [vmem:[%s899_s3 + $0x1b0] sm:$0xff] %v274_v45  ;;  %v146_v54 = vmul.f32 %v380_v1, %v75_v41  ;;  %v147_v55 = vmul.f32 %v380_v1, %v76_v42  ;;  %v213_v56 = vadd.f32 %v385_v2, %v142_v49 }
  0x32   :  { %339 = vst [vmem:[%s899_s3 + $0x1b8] sm:$0xff] %v275_v48  ;;  %v214_v57 = vadd.f32 %v385_v2, %v143_v50  ;;  %v215_v58 = vadd.f32 %v385_v2, %v144_v51  ;;  %v148_v59 = vmul.f32 %v380_v1, %v77_v47  ;;  %v276_v60 = vmax.f32 %v212_v52, 0.0 }
  0x33   :  { %v216_v61 = vadd.f32 %v385_v2, %v145_v53  ;;  %v217_v62 = vadd.f32 %v385_v2, %v146_v54  ;;  %v218_v63 = vadd.f32 %v385_v2, %v147_v55  ;;  %v277_v0 = vmax.f32 %v213_v56, 0.0 }
  0x34   :  { %v278_v3 = vmax.f32 %v214_v57, 0.0  ;;  %v279_v4 = vmax.f32 %v215_v58, 0.0  ;;  %v219_v5 = vadd.f32 %v385_v2, %v148_v59  ;;  %340 = vst [vmem:[%s899_s3 + $0x1c0] sm:$0xff] %v276_v60 }
  0x35   :  { %v280_v6 = vmax.f32 %v216_v61, 0.0  ;;  %v281_v7 = vmax.f32 %v217_v62, 0.0  ;;  %v282_v8 = vmax.f32 %v218_v63, 0.0  ;;  %341 = vst [vmem:[%s899_s3 + $0x1c8] sm:$0xff] %v277_v0 }
  0x36   :  { %342 = vst [vmem:[%s899_s3 + $0x1d0] sm:$0xff] %v278_v3  ;;  %343 = vst [vmem:[%s899_s3 + $0x1d8] sm:$0xff] %v279_v4  ;;  %v283_v1 = vmax.f32 %v219_v5, 0.0 }
  0x37   :  { %344 = vst [vmem:[%s899_s3 + $0x1e0] sm:$0xff] %v280_v6  ;;  %345 = vst [vmem:[%s899_s3 + $0x1e8] sm:$0xff] %v281_v7 }
  0x38   :  { %346 = vst [vmem:[%s899_s3 + $0x1f0] sm:$0xff] %v282_v8  ;;  %347 = vst [vmem:[%s899_s3 + $0x1f8] sm:$0xff] %v283_v1 }

// kernel: encoder_forward.13
= control target key start
LH: loop header
LB: loop body
LE: loop exit
PB: predicated region body
PF: predicated region fallthrough
CT: control target
= control target key end

     0   :  { %vm395_vm0 = vcmask 392192   ;;  %s2021_s1 = inlined_call_operand.vmem [shape: bf16[48,128], index: 1, kind: input, shape index: {}]   ;;  %s2022_s0 = inlined_call_operand.vmem [shape: bf16[512,48], index: 0, kind: input, shape index: {}]   ;;  %s2023_s2 = inlined_call_operand.vmem [shape: f32[512,128], index: 2, kind: output, shape index: {0}]   ;;  %s2024_s3 = inlined_call_operand.vmem [shape: f32[1,128], index: 3, kind: output, shape index: {1}]   ;;  %s2025_s4 = inlined_call_operand.vmem [shape: f32[1,128], index: 4, kind: output, shape index: {2}]  }
   0x1   :  { %v1434_v0 = vld [vmem:[%s2021_s1] sm:$0xff]   ;;  %v1435_v1 = vld [vmem:[%s2021_s1 + $0x8] sm:$0xff]   ;;  %v1436_v3 = vld [vmem:[%s2021_s1 + $0x10] sm:$0xff]  }
   0x2   :  { %1358 = vmatprep.subr.bf16.mxu0 %v1434_v0  ;;  %1428 = vmatprep.subr.bf16.mxu1 %v1434_v0  ;;  %v1437_v2 = vld [vmem:[%s2022_s0] sm:$0xff]   ;;  %v1438_v4 = vld [vmem:[%s2022_s0 + $0x8] sm:$0xff]   ;;  %v1439_v5 = vld [vmem:[%s2022_s0 + $0x10] sm:$0xff]  }
   0x3   :  { %1359 = vmatpush3.bf16.msra.mxu0 %v1434_v0  ;;  %1431 = vmatpush3.bf16.msra.mxu1 %v1434_v0  ;;  %v1440_v6 = vld [vmem:[%s2022_s0 + $0x18] sm:$0xff]   ;;  %v1441_v7 = vld [vmem:[%s2022_s0 + $0x20] sm:$0xff]   ;;  %v1454_v9 = vld [vmem:[%s2022_s0 + $0x88] sm:$0xff]  }
   0x4   :  { %1360 = vmatprep.subr.bf16.mxu0 %v1435_v1  ;;  %1429 = vmatprep.subr.bf16.mxu1 %v1435_v1  ;;  %v1453_v8 = vld [vmem:[%s2022_s0 + $0x80] sm:$0xff]   ;;  %v1455_v10 = vld [vmem:[%s2022_s0 + $0x90] sm:$0xff]   ;;  %v1442_v11 = vld [vmem:[%s2022_s0 + $0x28] sm:$0xff]  }
   0x5   :  { %1364 = vmatprep.mubr.msk.bf16.mxu0 %vm395_vm0, %v1437_v2  ;;  %1396 = vmatprep.mubr.msk.bf16.mxu1 %vm395_vm0, %v1453_v8  ;;  %v1443_v12 = vld [vmem:[%s2022_s0 + $0x30] sm:$0xff]   ;;  %v1456_v13 = vld [vmem:[%s2022_s0 + $0x98] sm:$0xff]   ;;  %v1457_v14 = vld [vmem:[%s2022_s0 + $0xa0] sm:$0xff]  }
   0x6   :  { %v1444_v15 = vld [vmem:[%s2022_s0 + $0x38] sm:$0xff]   ;;  %v1458_v16 = vld [vmem:[%s2022_s0 + $0xa8] sm:$0xff]   ;;  %v1445_v17 = vld [vmem:[%s2022_s0 + $0x40] sm:$0xff]  }
   0x7   :  { %1361 = vmatpush3.bf16.msra.mxu0 %v1435_v1  ;;  %1432 = vmatpush3.bf16.msra.mxu1 %v1435_v1  ;;  %v1459_v18 = vld [vmem:[%s2022_s0 + $0xb0] sm:$0xff]   ;;  %v1446_v19 = vld [vmem:[%s2022_s0 + $0x48] sm:$0xff]   ;;  %v1460_v20 = vld [vmem:[%s2022_s0 + $0xb8] sm:$0xff]  }
   0x8   :  { %1362 = vmatprep.subr.bf16.mxu0 %v1436_v3  ;;  %1430 = vmatprep.subr.bf16.mxu1 %v1436_v3  ;;  %v1447_v21 = vld [vmem:[%s2022_s0 + $0x50] sm:$0xff]   ;;  %v1461_v22 = vld [vmem:[%s2022_s0 + $0xc0] sm:$0xff]   ;;  %v1448_v23 = vld [vmem:[%s2022_s0 + $0x58] sm:$0xff]  }
   0x9   :  { %v1462_v24 = vld [vmem:[%s2022_s0 + $0xc8] sm:$0xff]   ;;  %v1449_v25 = vld [vmem:[%s2022_s0 + $0x60] sm:$0xff]   ;;  %v1463_v26 = vld [vmem:[%s2022_s0 + $0xd0] sm:$0xff]  }
   0xa   :  { %v1450_v27 = vld [vmem:[%s2022_s0 + $0x68] sm:$0xff]   ;;  %v1464_v28 = vld [vmem:[%s2022_s0 + $0xd8] sm:$0xff]   ;;  %v1451_v29 = vld [vmem:[%s2022_s0 + $0x70] sm:$0xff]  }
   0xb   :  { %1363 = vmatpush3.bf16.msra.mxu0 %v1436_v3  ;;  %1433 = vmatpush3.bf16.msra.mxu1 %v1436_v3  ;;  %v1465_v30 = vld [vmem:[%s2022_s0 + $0xe0] sm:$0xff]   ;;  %v1452_v31 = vld [vmem:[%s2022_s0 + $0x78] sm:$0xff]   ;;  %v1466_v32 = vld [vmem:[%s2022_s0 + $0xe8] sm:$0xff]  }
   0xc   :  { %v1467_v33 = vld [vmem:[%s2022_s0 + $0xf0] sm:$0xff]   ;;  %v1468_v34 = vld [vmem:[%s2022_s0 + $0xf8] sm:$0xff]  }
   0xe   :  { %1365 = vmatmul.mubr.msk.bf16.vlgmr.msra.gmra.mrb[0].mxu0 %vm395_vm0, %v1438_v4  ;;  %1397 = vmatmul.mubr.msk.bf16.vlgmr.msra.gmra.mrb[0].mxu1 %vm395_vm0, %v1454_v9 }
   0xf   :  { %1368 = vmatprep.mubr.msk.bf16.mxu0 %vm395_vm0, %v1439_v5  ;;  %1400 = vmatprep.mubr.msk.bf16.mxu1 %vm395_vm0, %v1455_v10 }
  0x16   :  { %1369 = vmatmul.mubr.msk.bf16.gmra.mrb[4].mxu0 %vm395_vm0, %v1440_v6  ;;  %1401 = vmatmul.mubr.msk.bf16.gmra.mrb[4].mxu1 %vm395_vm0, %v1456_v13 }
  0x17   :  { %1372 = vmatprep.mubr.msk.bf16.mxu0 %vm395_vm0, %v1441_v7  ;;  %1404 = vmatprep.mubr.msk.bf16.mxu1 %vm395_vm0, %v1457_v14 }
  0x1e   :  { %1373 = vmatmul.mubr.msk.bf16.gmra.mrb[8].mxu0 %vm395_vm0, %v1442_v11  ;;  %1405 = vmatmul.mubr.msk.bf16.gmra.mrb[8].mxu1 %vm395_vm0, %v1458_v16 }
  0x1f   :  { %1376 = vmatprep.mubr.msk.bf16.mxu0 %vm395_vm0, %v1443_v12  ;;  %1408 = vmatprep.mubr.msk.bf16.mxu1 %vm395_vm0, %v1459_v18 }
  0x26   :  { %1377 = vmatmul.mubr.msk.bf16.gmra.mrb[12].mxu0 %vm395_vm0, %v1444_v15  ;;  %1409 = vmatmul.mubr.msk.bf16.gmra.mrb[12].mxu1 %vm395_vm0, %v1460_v20 }
  0x27   :  { %1380 = vmatprep.mubr.msk.bf16.mxu0 %vm395_vm0, %v1445_v17  ;;  %1412 = vmatprep.mubr.msk.bf16.mxu1 %vm395_vm0, %v1461_v22 }
  0x2e   :  { %1381 = vmatmul.mubr.msk.bf16.gmra.mrb[16].mxu0 %vm395_vm0, %v1446_v19  ;;  %1413 = vmatmul.mubr.msk.bf16.gmra.mrb[16].mxu1 %vm395_vm0, %v1462_v24 }
  0x2f   :  { %1384 = vmatprep.mubr.msk.bf16.mxu0 %vm395_vm0, %v1447_v21  ;;  %1416 = vmatprep.mubr.msk.bf16.mxu1 %vm395_vm0, %v1463_v26 }
  0x36   :  { %1385 = vmatmul.mubr.msk.bf16.gmra.mrb[20].mxu0 %vm395_vm0, %v1448_v23  ;;  %1417 = vmatmul.mubr.msk.bf16.gmra.mrb[20].mxu1 %vm395_vm0, %v1464_v28 }
  0x37   :  { %1388 = vmatprep.mubr.msk.bf16.mxu0 %vm395_vm0, %v1449_v25  ;;  %1420 = vmatprep.mubr.msk.bf16.mxu1 %vm395_vm0, %v1465_v30 }
  0x3e   :  { %1389 = vmatmul.mubr.msk.bf16.gmra.mrb[24].mxu0 %vm395_vm0, %v1450_v27  ;;  %1421 = vmatmul.mubr.msk.bf16.gmra.mrb[24].mxu1 %vm395_vm0, %v1466_v32 }
  0x3f   :  { %1392 = vmatprep.mubr.msk.bf16.mxu0 %vm395_vm0, %v1451_v29  ;;  %1424 = vmatprep.mubr.msk.bf16.mxu1 %vm395_vm0, %v1467_v33 }
  0x46   :  { %1393 = vmatmul.mubr.msk.bf16.gmra.mrb[28].mxu0 %vm395_vm0, %v1452_v31  ;;  %1425 = vmatmul.mubr.msk.bf16.gmra.mrb[28].mxu1 %vm395_vm0, %v1468_v34 }
  0xe1   :  { %v1366_v35 = vpop.f32.mrb[0].mxu0  ;;  %v1643_v49 = vpop.f32.mrb[0].mxu1 }
  0xe2   :  { %978 = vst [vmem:[%s2023_s2 + $0x10] sm:$0xff] %v1366_v35  ;;  %v526_v36 = vpop.f32.mrb[1].mxu0  ;;  %v1112_v42 = vmul.f32 %v1366_v35, %v1366_v35  ;;  %1010 = vst [vmem:[%s2023_s2 + $0x110] sm:$0xff] %v1643_v49  ;;  %v1652_v51 = vpop.f32.mrb[1].mxu1 }
  0xe3   :  { %976 = vst [vmem:[%s2023_s2] sm:$0xff] %v526_v36  ;;  %v1367_v37 = vpop.f32.mrb[2].mxu0  ;;  %v1110_v39 = vmul.f32 %v526_v36, %v526_v36  ;;  %1008 = vst [vmem:[%s2023_s2 + $0x100] sm:$0xff] %v1652_v51  ;;  %v1661_v56 = vpop.f32.mrb[2].mxu1 }
  0xe4   :  { %979 = vst [vmem:[%s2023_s2 + $0x18] sm:$0xff] %v1367_v37  ;;  %v529_v38 = vpop.f32.mrb[3].mxu0  ;;  %v1113_v45 = vmul.f32 %v1367_v37, %v1367_v37  ;;  %1011 = vst [vmem:[%s2023_s2 + $0x118] sm:$0xff] %v1661_v56  ;;  %v1670_v58 = vpop.f32.mrb[3].mxu1 }
  0xe5   :  { %977 = vst [vmem:[%s2023_s2 + $0x8] sm:$0xff] %v529_v38  ;;  %v1040_v40 = vadd.f32 %v529_v38, %v526_v36  ;;  %v1111_v41 = vmul.f32 %v529_v38, %v529_v38  ;;  %1009 = vst [vmem:[%s2023_s2 + $0x108] sm:$0xff] %v1670_v58 }
  0xe7   :  { %v1041_v43 = vadd.f32 %v1366_v35, %v1040_v40  ;;  %v1174_v44 = vadd.f32 %v1111_v41, %v1110_v39 }
  0xe9   :  { %v1175_v46 = vadd.f32 %v1174_v44, %v1112_v42  ;;  %v1370_v47 = vpop.f32.mrb[4].mxu0  ;;  %v1042_v48 = vadd.f32 %v1367_v37, %v1041_v43  ;;  %v1679_v5 = vpop.f32.mrb[4].mxu1 }
  0xea   :  { %982 = vst [vmem:[%s2023_s2 + $0x30] sm:$0xff] %v1370_v47  ;;  %v542_v50 = vpop.f32.mrb[5].mxu0  ;;  %v1116_v62 = vmul.f32 %v1370_v47, %v1370_v47  ;;  %1014 = vst [vmem:[%s2023_s2 + $0x130] sm:$0xff] %v1679_v5  ;;  %v1688_v7 = vpop.f32.mrb[5].mxu1 }
  0xeb   :  { %980 = vst [vmem:[%s2023_s2 + $0x20] sm:$0xff] %v542_v50  ;;  %v1043_v52 = vadd.f32 %v1042_v48, %v542_v50  ;;  %v1114_v53 = vmul.f32 %v542_v50, %v542_v50  ;;  %v1176_v54 = vadd.f32 %v1175_v46, %v1113_v45  ;;  %v1371_v55 = vpop.f32.mrb[6].mxu0  ;;  %1012 = vst [vmem:[%s2023_s2 + $0x120] sm:$0xff] %v1688_v7  ;;  %v1697_v12 = vpop.f32.mrb[6].mxu1 }
  0xec   :  { %983 = vst [vmem:[%s2023_s2 + $0x38] sm:$0xff] %v1371_v55  ;;  %v545_v57 = vpop.f32.mrb[7].mxu0  ;;  %v1117_v1 = vmul.f32 %v1371_v55, %v1371_v55  ;;  %1015 = vst [vmem:[%s2023_s2 + $0x138] sm:$0xff] %v1697_v12  ;;  %v1706_v14 = vpop.f32.mrb[7].mxu1 }
  0xed   :  { %v1177_v59 = vadd.f32 %v1176_v54, %v1114_v53  ;;  %981 = vst [vmem:[%s2023_s2 + $0x28] sm:$0xff] %v545_v57  ;;  %v1044_v60 = vadd.f32 %v1043_v52, %v545_v57  ;;  %v1115_v61 = vmul.f32 %v545_v57, %v545_v57  ;;  %1013 = vst [vmem:[%s2023_s2 + $0x128] sm:$0xff] %v1706_v14 }
  0xef   :  { %v1045_v63 = vadd.f32 %v1370_v47, %v1044_v60  ;;  %v1178_v0 = vadd.f32 %v1177_v59, %v1115_v61 }
  0xf1   :  { %v1179_v2 = vadd.f32 %v1178_v0, %v1116_v62  ;;  %v1374_v3 = vpop.f32.mrb[8].mxu0  ;;  %v1046_v4 = vadd.f32 %v1371_v55, %v1045_v63  ;;  %v1715_v25 = vpop.f32.mrb[8].mxu1 }
  0xf2   :  { %986 = vst [vmem:[%s2023_s2 + $0x50] sm:$0xff] %v1374_v3  ;;  %v558_v6 = vpop.f32.mrb[9].mxu0  ;;  %v1120_v18 = vmul.f32 %v1374_v3, %v1374_v3  ;;  %1018 = vst [vmem:[%s2023_s2 + $0x150] sm:$0xff] %v1715_v25  ;;  %v1724_v27 = vpop.f32.mrb[9].mxu1 }
  0xf3   :  { %984 = vst [vmem:[%s2023_s2 + $0x40] sm:$0xff] %v558_v6  ;;  %v1047_v8 = vadd.f32 %v1046_v4, %v558_v6  ;;  %v1118_v9 = vmul.f32 %v558_v6, %v558_v6  ;;  %v1180_v10 = vadd.f32 %v1179_v2, %v1117_v1  ;;  %v1375_v11 = vpop.f32.mrb[10].mxu0  ;;  %1016 = vst [vmem:[%s2023_s2 + $0x140] sm:$0xff] %v1724_v27  ;;  %v1733_v32 = vpop.f32.mrb[10].mxu1 }
  0xf4   :  { %987 = vst [vmem:[%s2023_s2 + $0x58] sm:$0xff] %v1375_v11  ;;  %v561_v13 = vpop.f32.mrb[11].mxu0  ;;  %v1121_v21 = vmul.f32 %v1375_v11, %v1375_v11  ;;  %1019 = vst [vmem:[%s2023_s2 + $0x158] sm:$0xff] %v1733_v32  ;;  %v1742_v34 = vpop.f32.mrb[11].mxu1 }
  0xf5   :  { %v1181_v15 = vadd.f32 %v1180_v10, %v1118_v9  ;;  %985 = vst [vmem:[%s2023_s2 + $0x48] sm:$0xff] %v561_v13  ;;  %v1048_v16 = vadd.f32 %v1047_v8, %v561_v13  ;;  %v1119_v17 = vmul.f32 %v561_v13, %v561_v13  ;;  %1017 = vst [vmem:[%s2023_s2 + $0x148] sm:$0xff] %v1742_v34 }
  0xf7   :  { %v1049_v19 = vadd.f32 %v1374_v3, %v1048_v16  ;;  %v1182_v20 = vadd.f32 %v1181_v15, %v1119_v17 }
  0xf9   :  { %v1183_v22 = vadd.f32 %v1182_v20, %v1120_v18  ;;  %v1378_v23 = vpop.f32.mrb[12].mxu0  ;;  %v1050_v24 = vadd.f32 %v1375_v11, %v1049_v19  ;;  %v1751_v45 = vpop.f32.mrb[12].mxu1 }
  0xfa   :  { %990 = vst [vmem:[%s2023_s2 + $0x70] sm:$0xff] %v1378_v23  ;;  %v574_v26 = vpop.f32.mrb[13].mxu0  ;;  %v1124_v38 = vmul.f32 %v1378_v23, %v1378_v23  ;;  %1022 = vst [vmem:[%s2023_s2 + $0x170] sm:$0xff] %v1751_v45  ;;  %v1760_v47 = vpop.f32.mrb[13].mxu1 }
  0xfb   :  { %988 = vst [vmem:[%s2023_s2 + $0x60] sm:$0xff] %v574_v26  ;;  %v1051_v28 = vadd.f32 %v1050_v24, %v574_v26  ;;  %v1122_v29 = vmul.f32 %v574_v26, %v574_v26  ;;  %v1184_v30 = vadd.f32 %v1183_v22, %v1121_v21  ;;  %v1379_v31 = vpop.f32.mrb[14].mxu0  ;;  %1020 = vst [vmem:[%s2023_s2 + $0x160] sm:$0xff] %v1760_v47  ;;  %v1769_v54 = vpop.f32.mrb[14].mxu1 }
  0xfc   :  { %991 = vst [vmem:[%s2023_s2 + $0x78] sm:$0xff] %v1379_v31  ;;  %v577_v33 = vpop.f32.mrb[15].mxu0  ;;  %v1125_v41 = vmul.f32 %v1379_v31, %v1379_v31  ;;  %1023 = vst [vmem:[%s2023_s2 + $0x178] sm:$0xff] %v1769_v54  ;;  %v1778_v57 = vpop.f32.mrb[15].mxu1 }
  0xfd   :  { %v1185_v35 = vadd.f32 %v1184_v30, %v1122_v29  ;;  %989 = vst [vmem:[%s2023_s2 + $0x68] sm:$0xff] %v577_v33  ;;  %v1052_v36 = vadd.f32 %v1051_v28, %v577_v33  ;;  %v1123_v37 = vmul.f32 %v577_v33, %v577_v33  ;;  %1021 = vst [vmem:[%s2023_s2 + $0x168] sm:$0xff] %v1778_v57 }
  0xff   :  { %v1053_v39 = vadd.f32 %v1378_v23, %v1052_v36  ;;  %v1186_v40 = vadd.f32 %v1185_v35, %v1123_v37 }
 0x101   :  { %v1187_v42 = vadd.f32 %v1186_v40, %v1124_v38  ;;  %v1382_v43 = vpop.f32.mrb[16].mxu0  ;;  %v1054_v44 = vadd.f32 %v1379_v31, %v1053_v39  ;;  %v1787_v6 = vpop.f32.mrb[16].mxu1 }
 0x102   :  { %994 = vst [vmem:[%s2023_s2 + $0x90] sm:$0xff] %v1382_v43  ;;  %v590_v46 = vpop.f32.mrb[17].mxu0  ;;  %v1128_v62 = vmul.f32 %v1382_v43, %v1382_v43  ;;  %1026 = vst [vmem:[%s2023_s2 + $0x190] sm:$0xff] %v1787_v6  ;;  %v1796_v9 = vpop.f32.mrb[17].mxu1 }
 0x103   :  { %992 = vst [vmem:[%s2023_s2 + $0x80] sm:$0xff] %v590_v46  ;;  %v1055_v48 = vadd.f32 %v1054_v44, %v590_v46  ;;  %v1126_v50 = vmul.f32 %v590_v46, %v590_v46  ;;  %v1188_v52 = vadd.f32 %v1187_v42, %v1125_v41  ;;  %v1383_v53 = vpop.f32.mrb[18].mxu0  ;;  %1024 = vst [vmem:[%s2023_s2 + $0x180] sm:$0xff] %v1796_v9  ;;  %v1805_v16 = vpop.f32.mrb[18].mxu1 }
 0x104   :  { %995 = vst [vmem:[%s2023_s2 + $0x98] sm:$0xff] %v1383_v53  ;;  %v593_v55 = vpop.f32.mrb[19].mxu0  ;;  %v1129_v1 = vmul.f32 %v1383_v53, %v1383_v53  ;;  %1027 = vst [vmem:[%s2023_s2 + $0x198] sm:$0xff] %v1805_v16  ;;  %v1814_v18 = vpop.f32.mrb[19].mxu1 }
 0x105   :  { %v1189_v59 = vadd.f32 %v1188_v52, %v1126_v50  ;;  %993 = vst [vmem:[%s2023_s2 + $0x88] sm:$0xff] %v593_v55  ;;  %v1056_v60 = vadd.f32 %v1055_v48, %v593_v55  ;;  %v1127_v61 = vmul.f32 %v593_v55, %v593_v55  ;;  %1025 = vst [vmem:[%s2023_s2 + $0x188] sm:$0xff] %v1814_v18 }
 0x107   :  { %v1057_v63 = vadd.f32 %v1382_v43, %v1056_v60  ;;  %v1190_v0 = vadd.f32 %v1189_v59, %v1127_v61 }
 0x109   :  { %v1191_v2 = vadd.f32 %v1190_v0, %v1128_v62  ;;  %v1386_v3 = vpop.f32.mrb[20].mxu0  ;;  %v1058_v4 = vadd.f32 %v1383_v53, %v1057_v63  ;;  %v1823_v31 = vpop.f32.mrb[20].mxu1 }
 0x10a   :  { %998 = vst [vmem:[%s2023_s2 + $0xb0] sm:$0xff] %v1386_v3  ;;  %v606_v8 = vpop.f32.mrb[21].mxu0  ;;  %v1132_v22 = vmul.f32 %v1386_v3, %v1386_v3  ;;  %1030 = vst [vmem:[%s2023_s2 + $0x1b0] sm:$0xff] %v1823_v31  ;;  %v1832_v35 = vpop.f32.mrb[21].mxu1 }
 0x10b   :  { %996 = vst [vmem:[%s2023_s2 + $0xa0] sm:$0xff] %v606_v8  ;;  %v1059_v10 = vadd.f32 %v1058_v4, %v606_v8  ;;  %v1130_v11 = vmul.f32 %v606_v8, %v606_v8  ;;  %v1192_v13 = vadd.f32 %v1191_v2, %v1129_v1  ;;  %v1387_v15 = vpop.f32.mrb[22].mxu0  ;;  %1028 = vst [vmem:[%s2023_s2 + $0x1a0] sm:$0xff] %v1832_v35  ;;  %v1841_v40 = vpop.f32.mrb[22].mxu1 }
 0x10c   :  { %999 = vst [vmem:[%s2023_s2 + $0xb8] sm:$0xff] %v1387_v15  ;;  %v609_v17 = vpop.f32.mrb[23].mxu0  ;;  %v1133_v26 = vmul.f32 %v1387_v15, %v1387_v15  ;;  %1031 = vst [vmem:[%s2023_s2 + $0x1b8] sm:$0xff] %v1841_v40  ;;  %v1850_v42 = vpop.f32.mrb[23].mxu1 }
 0x10d   :  { %v1193_v19 = vadd.f32 %v1192_v13, %v1130_v11  ;;  %997 = vst [vmem:[%s2023_s2 + $0xa8] sm:$0xff] %v609_v17  ;;  %v1060_v20 = vadd.f32 %v1059_v10, %v609_v17  ;;  %v1131_v21 = vmul.f32 %v609_v17, %v609_v17  ;;  %1029 = vst [vmem:[%s2023_s2 + $0x1a8] sm:$0xff] %v1850_v42 }
 0x10f   :  { %v1061_v23 = vadd.f32 %v1386_v3, %v1060_v20  ;;  %v1194_v24 = vadd.f32 %v1193_v19, %v1131_v21 }
 0x111   :  { %v1195_v28 = vadd.f32 %v1194_v24, %v1132_v22  ;;  %v1390_v29 = vpop.f32.mrb[24].mxu0  ;;  %v1062_v30 = vadd.f32 %v1387_v15, %v1061_v23  ;;  %v1859_v61 = vpop.f32.mrb[24].mxu1  ;;  %v1142_v24 = vmul.f32 %v1652_v51, %v1652_v51 }
 0x112   :  { %1002 = vst [vmem:[%s2023_s2 + $0xd0] sm:$0xff] %v1390_v29  ;;  %v622_v33 = vpop.f32.mrb[25].mxu0  ;;  %v1136_v48 = vmul.f32 %v1390_v29, %v1390_v29  ;;  %1034 = vst [vmem:[%s2023_s2 + $0x1d0] sm:$0xff] %v1859_v61  ;;  %v1868_v63 = vpop.f32.mrb[25].mxu1 }
 0x113   :  { %1000 = vst [vmem:[%s2023_s2 + $0xc0] sm:$0xff] %v622_v33  ;;  %v1063_v36 = vadd.f32 %v1062_v30, %v622_v33  ;;  %v1134_v37 = vmul.f32 %v622_v33, %v622_v33  ;;  %v1196_v38 = vadd.f32 %v1195_v28, %v1133_v26  ;;  %v1391_v39 = vpop.f32.mrb[26].mxu0  ;;  %1032 = vst [vmem:[%s2023_s2 + $0x1c0] sm:$0xff] %v1868_v63  ;;  %v1877_v4 = vpop.f32.mrb[26].mxu1 }
 0x114   :  { %1003 = vst [vmem:[%s2023_s2 + $0xd8] sm:$0xff] %v1391_v39  ;;  %v625_v41 = vpop.f32.mrb[27].mxu0  ;;  %v1137_v53 = vmul.f32 %v1391_v39, %v1391_v39  ;;  %1035 = vst [vmem:[%s2023_s2 + $0x1d8] sm:$0xff] %v1877_v4  ;;  %v1886_v10 = vpop.f32.mrb[27].mxu1 }
 0x115   :  { %v1197_v43 = vadd.f32 %v1196_v38, %v1134_v37  ;;  %1001 = vst [vmem:[%s2023_s2 + $0xc8] sm:$0xff] %v625_v41  ;;  %v1064_v44 = vadd.f32 %v1063_v36, %v625_v41  ;;  %v1135_v46 = vmul.f32 %v625_v41, %v625_v41  ;;  %1033 = vst [vmem:[%s2023_s2 + $0x1c8] sm:$0xff] %v1886_v10 }
 0x117   :  { %v1065_v50 = vadd.f32 %v1390_v29, %v1064_v44  ;;  %v1198_v52 = vadd.f32 %v1197_v43, %v1135_v46  ;;  %v1145_v44 = vmul.f32 %v1661_v56, %v1661_v56 }
 0x119   :  { %v1199_v55 = vadd.f32 %v1198_v52, %v1136_v48  ;;  %v1394_v59 = vpop.f32.mrb[28].mxu0  ;;  %v1066_v60 = vadd.f32 %v1391_v39, %v1065_v50  ;;  %v1897_v26 = vpop.f32.mrb[28].mxu1  ;;  %v1144_v39 = vmul.f32 %v1643_v49, %v1643_v49 }
 0x11a   :  { %1006 = vst [vmem:[%s2023_s2 + $0xf0] sm:$0xff] %v1394_v59  ;;  %v638_v62 = vpop.f32.mrb[29].mxu0  ;;  %v1140_v17 = vmul.f32 %v1394_v59, %v1394_v59  ;;  %1038 = vst [vmem:[%s2023_s2 + $0x1f0] sm:$0xff] %v1897_v26  ;;  %v1903_v28 = vpop.f32.mrb[29].mxu1 }
 0x11b   :  { %1004 = vst [vmem:[%s2023_s2 + $0xe0] sm:$0xff] %v638_v62  ;;  %v1067_v0 = vadd.f32 %v1066_v60, %v638_v62  ;;  %v1138_v1 = vmul.f32 %v638_v62, %v638_v62  ;;  %v1200_v2 = vadd.f32 %v1199_v55, %v1137_v53  ;;  %v1395_v3 = vpop.f32.mrb[30].mxu0  ;;  %1036 = vst [vmem:[%s2023_s2 + $0x1e0] sm:$0xff] %v1903_v28  ;;  %v1910_v33 = vpop.f32.mrb[30].mxu1 }
 0x11c   :  { %1007 = vst [vmem:[%s2023_s2 + $0xf8] sm:$0xff] %v1395_v3  ;;  %v641_v8 = vpop.f32.mrb[31].mxu0  ;;  %v1141_v21 = vmul.f32 %v1395_v3, %v1395_v3  ;;  %1039 = vst [vmem:[%s2023_s2 + $0x1f8] sm:$0xff] %v1910_v33  ;;  %v1916_v36 = vpop.f32.mrb[31].mxu1 }
 0x11d   :  { %v1201_v11 = vadd.f32 %v1200_v2, %v1138_v1  ;;  %1005 = vst [vmem:[%s2023_s2 + $0xe8] sm:$0xff] %v641_v8  ;;  %v1068_v13 = vadd.f32 %v1067_v0, %v641_v8  ;;  %v1139_v15 = vmul.f32 %v641_v8, %v641_v8  ;;  %1037 = vst [vmem:[%s2023_s2 + $0x1e8] sm:$0xff] %v1916_v36 }
 0x11f   :  { %v1069_v19 = vadd.f32 %v1394_v59, %v1068_v13  ;;  %v1202_v20 = vadd.f32 %v1201_v11, %v1139_v15  ;;  %v1147_v59 = vmul.f32 %v1706_v14, %v1706_v14  ;;  %v1151_v11 = vmul.f32 %v1742_v34, %v1742_v34 }
 0x121   :  { %v1203_v22 = vadd.f32 %v1202_v20, %v1140_v17  ;;  %v1070_v23 = vadd.f32 %v1395_v3, %v1069_v19 }
 0x123   :  { %v1071_v29 = vadd.f32 %v1070_v23, %v1652_v51  ;;  %v1204_v30 = vadd.f32 %v1203_v22, %v1141_v21  ;;  %v1143_v51 = vmul.f32 %v1670_v58, %v1670_v58  ;;  %v1155_v23 = vmul.f32 %v1778_v57, %v1778_v57 }
 0x125   :  { %v1205_v37 = vadd.f32 %v1204_v30, %v1142_v24  ;;  %v1072_v38 = vadd.f32 %v1071_v29, %v1670_v58  ;;  %v1146_v58 = vmul.f32 %v1688_v7, %v1688_v7 }
 0x127   :  { %v1073_v41 = vadd.f32 %v1643_v49, %v1072_v38  ;;  %v1206_v43 = vadd.f32 %v1205_v37, %v1143_v51  ;;  %v1148_v49 = vmul.f32 %v1679_v5, %v1679_v5 }
 0x129   :  { %v1207_v46 = vadd.f32 %v1206_v43, %v1144_v39  ;;  %v1074_v48 = vadd.f32 %v1661_v56, %v1073_v41  ;;  %v1149_v56 = vmul.f32 %v1697_v12, %v1697_v12  ;;  %v1159_v41 = vmul.f32 %v1814_v18, %v1814_v18 }
 0x12b   :  { %v1075_v50 = vadd.f32 %v1074_v48, %v1688_v7  ;;  %v1208_v52 = vadd.f32 %v1207_v46, %v1145_v44  ;;  %v1150_v7 = vmul.f32 %v1724_v27, %v1724_v27 }
 0x12d   :  { %v1209_v53 = vadd.f32 %v1208_v52, %v1146_v58  ;;  %v1076_v55 = vadd.f32 %v1075_v50, %v1706_v14 }
 0x12f   :  { %v1077_v60 = vadd.f32 %v1679_v5, %v1076_v55  ;;  %v1210_v62 = vadd.f32 %v1209_v53, %v1147_v59  ;;  %v1152_v5 = vmul.f32 %v1715_v25, %v1715_v25  ;;  %v1163_v53 = vmul.f32 %v1850_v42, %v1850_v42 }
 0x131   :  { %v1211_v0 = vadd.f32 %v1210_v62, %v1148_v49  ;;  %v1078_v1 = vadd.f32 %v1697_v12, %v1077_v60  ;;  %v1153_v12 = vmul.f32 %v1733_v32, %v1733_v32 }
 0x133   :  { %v1079_v2 = vadd.f32 %v1078_v1, %v1724_v27  ;;  %v1212_v3 = vadd.f32 %v1211_v0, %v1149_v56  ;;  %v1154_v27 = vmul.f32 %v1760_v47, %v1760_v47  ;;  %v1167_v1 = vmul.f32 %v1886_v10, %v1886_v10 }
 0x135   :  { %v1213_v8 = vadd.f32 %v1212_v3, %v1150_v7  ;;  %v1080_v14 = vadd.f32 %v1079_v2, %v1742_v34 }
 0x137   :  { %v1081_v13 = vadd.f32 %v1715_v25, %v1080_v14  ;;  %v1214_v15 = vadd.f32 %v1213_v8, %v1151_v11  ;;  %v1156_v25 = vmul.f32 %v1751_v45, %v1751_v45 }
 0x139   :  { %v1215_v17 = vadd.f32 %v1214_v15, %v1152_v5  ;;  %v1082_v19 = vadd.f32 %v1733_v32, %v1081_v13  ;;  %v1157_v32 = vmul.f32 %v1769_v54, %v1769_v54  ;;  %v1171_v13 = vmul.f32 %v1916_v36, %v1916_v36 }
 0x13b   :  { %v1083_v20 = vadd.f32 %v1082_v19, %v1760_v47  ;;  %v1216_v21 = vadd.f32 %v1215_v17, %v1153_v12  ;;  %v1158_v47 = vmul.f32 %v1796_v9, %v1796_v9 }
 0x13d   :  { %v1217_v22 = vadd.f32 %v1216_v21, %v1154_v27  ;;  %v1084_v34 = vadd.f32 %v1083_v20, %v1778_v57 }
 0x13f   :  { %v1085_v24 = vadd.f32 %v1751_v45, %v1084_v34  ;;  %v1218_v29 = vadd.f32 %v1217_v22, %v1155_v23  ;;  %v1160_v45 = vmul.f32 %v1787_v6, %v1787_v6 }
 0x141   :  { %v1219_v30 = vadd.f32 %v1218_v29, %v1156_v25  ;;  %v1086_v37 = vadd.f32 %v1769_v54, %v1085_v24  ;;  %v1161_v54 = vmul.f32 %v1805_v16, %v1805_v16 }
 0x143   :  { %v1087_v38 = vadd.f32 %v1086_v37, %v1796_v9  ;;  %v1220_v51 = vadd.f32 %v1219_v30, %v1157_v32  ;;  %v1162_v9 = vmul.f32 %v1832_v35, %v1832_v35 }
 0x145   :  { %v1221_v39 = vadd.f32 %v1220_v51, %v1158_v47  ;;  %v1088_v57 = vadd.f32 %v1087_v38, %v1814_v18 }
 0x147   :  { %v1089_v43 = vadd.f32 %v1787_v6, %v1088_v57  ;;  %v1222_v44 = vadd.f32 %v1221_v39, %v1159_v41  ;;  %v1164_v6 = vmul.f32 %v1823_v31, %v1823_v31 }
 0x149   :  { %v1223_v46 = vadd.f32 %v1222_v44, %v1160_v45  ;;  %v1090_v48 = vadd.f32 %v1805_v16, %v1089_v43  ;;  %v1165_v16 = vmul.f32 %v1841_v40, %v1841_v40 }
 0x14b   :  { %v1091_v58 = vadd.f32 %v1090_v48, %v1832_v35  ;;  %v1224_v50 = vadd.f32 %v1223_v46, %v1161_v54  ;;  %v1166_v35 = vmul.f32 %v1868_v63, %v1868_v63 }
 0x14d   :  { %v1225_v52 = vadd.f32 %v1224_v50, %v1162_v9  ;;  %v1092_v18 = vadd.f32 %v1091_v58, %v1850_v42 }
 0x14f   :  { %v1093_v55 = vadd.f32 %v1823_v31, %v1092_v18  ;;  %v1226_v59 = vadd.f32 %v1225_v52, %v1163_v53  ;;  %v1168_v31 = vmul.f32 %v1859_v61, %v1859_v61 }
 0x151   :  { %v1227_v49 = vadd.f32 %v1226_v59, %v1164_v6  ;;  %v1094_v60 = vadd.f32 %v1841_v40, %v1093_v55  ;;  %v1169_v40 = vmul.f32 %v1877_v4, %v1877_v4 }
 0x153   :  { %v1095_v62 = vadd.f32 %v1094_v60, %v1868_v63  ;;  %v1228_v56 = vadd.f32 %v1227_v49, %v1165_v16  ;;  %v1170_v63 = vmul.f32 %v1903_v28, %v1903_v28 }
 0x155   :  { %v1229_v0 = vadd.f32 %v1228_v56, %v1166_v35  ;;  %v1096_v42 = vadd.f32 %v1095_v62, %v1886_v10 }
 0x157   :  { %v1097_v7 = vadd.f32 %v1859_v61, %v1096_v42  ;;  %v1230_v2 = vadd.f32 %v1229_v0, %v1167_v1  ;;  %v1172_v61 = vmul.f32 %v1897_v26, %v1897_v26 }
 0x159   :  { %v1231_v3 = vadd.f32 %v1230_v2, %v1168_v31  ;;  %v1098_v8 = vadd.f32 %v1877_v4, %v1097_v7  ;;  %v1173_v4 = vmul.f32 %v1910_v33, %v1910_v33 }
 0x15b   :  { %v1099_v14 = vadd.f32 %v1098_v8, %v1903_v28  ;;  %v1232_v11 = vadd.f32 %v1231_v3, %v1169_v40 }
 0x15d   :  { %v1233_v5 = vadd.f32 %v1232_v11, %v1170_v63  ;;  %v1100_v10 = vadd.f32 %v1099_v14, %v1916_v36 }
 0x15f   :  { %v1101_v15 = vadd.f32 %v1897_v26, %v1100_v10  ;;  %v1234_v12 = vadd.f32 %v1233_v5, %v1171_v13 }
 0x161   :  { %v1102_v17 = vadd.f32 %v1910_v33, %v1101_v15  ;;  %v1235_v19 = vadd.f32 %v1234_v12, %v1172_v61 }
 0x163   :  { %v1103_v28 = vrot.slane %v1102_v17, 4  ;;  %v1236_v27 = vadd.f32 %v1235_v19, %v1173_v4 }
 0x165   :  { %v1104_v20 = vadd.f32 %v1103_v28, %v1102_v17  ;;  %v1237_v21 = vrot.slane %v1236_v27, 4 }
 0x167   :  { %v1105_v22 = vrot.slane %v1104_v20, 2  ;;  %v1238_v34 = vadd.f32 %v1237_v21, %v1236_v27 }
 0x169   :  { %v1106_v23 = vadd.f32 %v1105_v22, %v1104_v20  ;;  %v1239_v36 = vrot.slane %v1238_v34, 2 }
 0x16b   :  { %v1107_v25 = vrot.slane %v1106_v23, 1  ;;  %v1240_v24 = vadd.f32 %v1239_v36, %v1238_v34 }
 0x16d   :  { %v1108_v29 = vadd.f32 %v1107_v25, %v1106_v23  ;;  %v1241_v32 = vrot.slane %v1240_v24, 1 }
 0x16f   :  { %1109 = vst [vmem:[%s2024_s3] sm:$0x1] %v1108_v29  ;;  %v1242_v26 = vadd.f32 %v1241_v32, %v1240_v24 }
 0x171   :  { %1243 = vst [vmem:[%s2025_s4] sm:$0x1] %v1242_v26 }

// kernel: encoder_forward.15
= control target key start
LH: loop header
LB: loop body
LE: loop exit
PB: predicated region body
PF: predicated region fallthrough
CT: control target
= control target key end

     0   :  { %vm407_vm0 = vcmask 588800   ;;  %vm504_vm1 = vcmask 1043456   ;;  %s2059_s1 = inlined_call_operand.vmem [shape: bf16[72,128], index: 1, kind: input, shape index: {}]   ;;  %s2060_s0 = inlined_call_operand.vmem [shape: bf16[512,72], index: 0, kind: input, shape index: {}]   ;;  %s2061_s2 = inlined_call_operand.vmem [shape: f32[512,128], index: 2, kind: output, shape index: {0}]   ;;  %s2062_s3 = inlined_call_operand.vmem [shape: f32[1,128], index: 3, kind: output, shape index: {1}]   ;;  %s2063_s4 = inlined_call_operand.vmem [shape: f32[1,128], index: 4, kind: output, shape index: {2}]  }
   0x1   :  { %v1464_v0 = vld [vmem:[%s2059_s1] sm:$0xff]   ;;  %v1465_v1 = vld [vmem:[%s2059_s1 + $0x8] sm:$0xff]   ;;  %v1466_v2 = vld [vmem:[%s2059_s1 + $0x10] sm:$0xff]  }
   0x2   :  { %1378 = vmatprep.subr.bf16.mxu0 %v1464_v0  ;;  %1452 = vmatprep.subr.bf16.mxu1 %v1464_v0  ;;  %v1469_v3 = vld [vmem:[%s2060_s0] sm:$0xff]   ;;  %v1467_v4 = vld [vmem:[%s2059_s1 + $0x18] sm:$0xff]   ;;  %v1470_v7 = vld [vmem:[%s2060_s0 + $0x8] sm:$0xff]  }
   0x3   :  { %1379 = vmatpush3.bf16.msra.mxu0 %v1464_v0  ;;  %1457 = vmatpush3.bf16.msra.mxu1 %v1464_v0  ;;  %v1468_v5 = vld [vmem:[%s2059_s1 + $0x20] ss:$0 sps:$4 sm:$0xff]   ;;  %v1471_v8 = vld [vmem:[%s2060_s0 + $0x10] sm:$0xff]   ;;  %v1486_v10 = vld [vmem:[%s2060_s0 + $0x88] sm:$0xff]  }
   0x4   :  { %1380 = vmatprep.subr.bf16.mxu0 %v1465_v1  ;;  %1453 = vmatprep.subr.bf16.mxu1 %v1465_v1  ;;  %v506_v6 = vsel %vm504_vm1, %v1468_v5, 0  ;;  %v1485_v9 = vld [vmem:[%s2060_s0 + $0x80] sm:$0xff]   ;;  %v1487_v11 = vld [vmem:[%s2060_s0 + $0x90] sm:$0xff]   ;;  %v1472_v12 = vld [vmem:[%s2060_s0 + $0x18] sm:$0xff]  }
   0x5   :  { %1388 = vmatprep.mubr.msk.bf16.mxu0 %vm407_vm0, %v1469_v3  ;;  %1420 = vmatprep.mubr.msk.bf16.mxu1 %vm407_vm0, %v1485_v9  ;;  %v1473_v13 = vld [vmem:[%s2060_s0 + $0x20] sm:$0xff]   ;;  %v1488_v14 = vld [vmem:[%s2060_s0 + $0x98] sm:$0xff]   ;;  %v1474_v16 = vld [vmem:[%s2060_s0 + $0x28] sm:$0xff]  }
   0x6   :  { %v1489_v15 = vld [vmem:[%s2060_s0 + $0xa0] sm:$0xff]   ;;  %v1475_v17 = vld [vmem:[%s2060_s0 + $0x30] sm:$0xff]   ;;  %v1490_v18 = vld [vmem:[%s2060_s0 + $0xa8] sm:$0xff]  }
   0x7   :  { %1381 = vmatpush3.bf16.msra.mxu0 %v1465_v1  ;;  %1458 = vmatpush3.bf16.msra.mxu1 %v1465_v1  ;;  %v1491_v19 = vld [vmem:[%s2060_s0 + $0xb0] sm:$0xff]   ;;  %v1476_v20 = vld [vmem:[%s2060_s0 + $0x38] sm:$0xff]   ;;  %v1477_v21 = vld [vmem:[%s2060_s0 + $0x40] sm:$0xff]  }
   0x8   :  { %1382 = vmatprep.subr.bf16.mxu0 %v1466_v2  ;;  %1454 = vmatprep.subr.bf16.mxu1 %v1466_v2  ;;  %v1492_v22 = vld [vmem:[%s2060_s0 + $0xb8] sm:$0xff]   ;;  %v1493_v23 = vld [vmem:[%s2060_s0 + $0xc0] sm:$0xff]   ;;  %v1478_v24 = vld [vmem:[%s2060_s0 + $0x48] sm:$0xff]  }
   0x9   :  { %v1479_v25 = vld [vmem:[%s2060_s0 + $0x50] sm:$0xff]   ;;  %v1494_v26 = vld [vmem:[%s2060_s0 + $0xc8] sm:$0xff]   ;;  %v1480_v28 = vld [vmem:[%s2060_s0 + $0x58] sm:$0xff]  }
   0xa   :  { %v1495_v27 = vld [vmem:[%s2060_s0 + $0xd0] sm:$0xff]   ;;  %v1481_v29 = vld [vmem:[%s2060_s0 + $0x60] sm:$0xff]   ;;  %v1496_v30 = vld [vmem:[%s2060_s0 + $0xd8] sm:$0xff]  }
   0xb   :  { %1383 = vmatpush3.bf16.msra.mxu0 %v1466_v2  ;;  %1459 = vmatpush3.bf16.msra.mxu1 %v1466_v2  ;;  %v1497_v31 = vld [vmem:[%s2060_s0 + $0xe0] sm:$0xff]   ;;  %v1482_v32 = vld [vmem:[%s2060_s0 + $0x68] sm:$0xff]   ;;  %v1483_v33 = vld [vmem:[%s2060_s0 + $0x70] sm:$0xff]  }
   0xc   :  { %1384 = vmatprep.subr.bf16.mxu0 %v1467_v4  ;;  %1455 = vmatprep.subr.bf16.mxu1 %v1467_v4  ;;  %v1498_v34 = vld [vmem:[%s2060_s0 + $0xe8] sm:$0xff]   ;;  %v1499_v35 = vld [vmem:[%s2060_s0 + $0xf0] sm:$0xff]   ;;  %v1484_v36 = vld [vmem:[%s2060_s0 + $0x78] sm:$0xff]  }
   0xd   :  { %v1500_v37 = vld [vmem:[%s2060_s0 + $0xf8] sm:$0xff]  }
   0xf   :  { %1385 = vmatpush3.bf16.msra.mxu0 %v1467_v4  ;;  %1460 = vmatpush3.bf16.msra.mxu1 %v1467_v4 }
  0x10   :  { %1462 = vmatprep.subr.msk.bf16.mxu0 %vm504_vm1, %v1468_v5  ;;  %1463 = vmatprep.subr.msk.bf16.mxu1 %vm504_vm1, %v1468_v5 }
  0x13   :  { %1387 = vmatpush3.bf16.msra.mxu0 %v506_v6  ;;  %1461 = vmatpush3.bf16.msra.mxu1 %v506_v6 }
  0x16   :  { %1389 = vmatmul.mubr.msk.bf16.vlgmr.msra.gmra.mrb[0].mxu0 %vm407_vm0, %v1470_v7  ;;  %1421 = vmatmul.mubr.msk.bf16.vlgmr.msra.gmra.mrb[0].mxu1 %vm407_vm0, %v1486_v10 }
  0x17   :  { %1392 = vmatprep.mubr.msk.bf16.mxu0 %vm407_vm0, %v1471_v8  ;;  %1424 = vmatprep.mubr.msk.bf16.mxu1 %vm407_vm0, %v1487_v11 }
  0x1e   :  { %1393 = vmatmul.mubr.msk.bf16.gmra.mrb[4].mxu0 %vm407_vm0, %v1472_v12  ;;  %1425 = vmatmul.mubr.msk.bf16.gmra.mrb[4].mxu1 %vm407_vm0, %v1488_v14 }
  0x1f   :  { %1396 = vmatprep.mubr.msk.bf16.mxu0 %vm407_vm0, %v1473_v13  ;;  %1428 = vmatprep.mubr.msk.bf16.mxu1 %vm407_vm0, %v1489_v15 }
  0x26   :  { %1397 = vmatmul.mubr.msk.bf16.gmra.mrb[8].mxu0 %vm407_vm0, %v1474_v16  ;;  %1429 = vmatmul.mubr.msk.bf16.gmra.mrb[8].mxu1 %vm407_vm0, %v1490_v18 }
  0x27   :  { %1400 = vmatprep.mubr.msk.bf16.mxu0 %vm407_vm0, %v1475_v17  ;;  %1432 = vmatprep.mubr.msk.bf16.mxu1 %vm407_vm0, %v1491_v19 }
  0x2e   :  { %1401 = vmatmul.mubr.msk.bf16.gmra.mrb[12].mxu0 %vm407_vm0, %v1476_v20  ;;  %1433 = vmatmul.mubr.msk.bf16.gmra.mrb[12].mxu1 %vm407_vm0, %v1492_v22 }
  0x2f   :  { %1404 = vmatprep.mubr.msk.bf16.mxu0 %vm407_vm0, %v1477_v21  ;;  %1436 = vmatprep.mubr.msk.bf16.mxu1 %vm407_vm0, %v1493_v23 }
  0x36   :  { %1405 = vmatmul.mubr.msk.bf16.gmra.mrb[16].mxu0 %vm407_vm0, %v1478_v24  ;;  %1437 = vmatmul.mubr.msk.bf16.gmra.mrb[16].mxu1 %vm407_vm0, %v1494_v26 }
  0x37   :  { %1408 = vmatprep.mubr.msk.bf16.mxu0 %vm407_vm0, %v1479_v25  ;;  %1440 = vmatprep.mubr.msk.bf16.mxu1 %vm407_vm0, %v1495_v27 }
  0x3e   :  { %1409 = vmatmul.mubr.msk.bf16.gmra.mrb[20].mxu0 %vm407_vm0, %v1480_v28  ;;  %1441 = vmatmul.mubr.msk.bf16.gmra.mrb[20].mxu1 %vm407_vm0, %v1496_v30 }
  0x3f   :  { %1412 = vmatprep.mubr.msk.bf16.mxu0 %vm407_vm0, %v1481_v29  ;;  %1444 = vmatprep.mubr.msk.bf16.mxu1 %vm407_vm0, %v1497_v31 }
  0x46   :  { %1413 = vmatmul.mubr.msk.bf16.gmra.mrb[24].mxu0 %vm407_vm0, %v1482_v32  ;;  %1445 = vmatmul.mubr.msk.bf16.gmra.mrb[24].mxu1 %vm407_vm0, %v1498_v34 }
  0x47   :  { %1416 = vmatprep.mubr.msk.bf16.mxu0 %vm407_vm0, %v1483_v33  ;;  %1448 = vmatprep.mubr.msk.bf16.mxu1 %vm407_vm0, %v1499_v35 }
  0x4e   :  { %1417 = vmatmul.mubr.msk.bf16.gmra.mrb[28].mxu0 %vm407_vm0, %v1484_v36  ;;  %1449 = vmatmul.mubr.msk.bf16.gmra.mrb[28].mxu1 %vm407_vm0, %v1500_v37 }
  0xe9   :  { %v1390_v38 = vpop.f32.mrb[0].mxu0  ;;  %v1675_v41 = vpop.f32.mrb[0].mxu1 }
  0xea   :  { %994 = vst [vmem:[%s2061_s2 + $0x10] sm:$0xff] %v1390_v38  ;;  %v542_v39 = vpop.f32.mrb[1].mxu0  ;;  %1026 = vst [vmem:[%s2061_s2 + $0x110] sm:$0xff] %v1675_v41  ;;  %v1684_v43 = vpop.f32.mrb[1].mxu1  ;;  %v1128_v49 = vmul.f32 %v1390_v38, %v1390_v38 }
  0xeb   :  { %992 = vst [vmem:[%s2061_s2] sm:$0xff] %v542_v39  ;;  %v1391_v40 = vpop.f32.mrb[2].mxu0  ;;  %v1126_v44 = vmul.f32 %v542_v39, %v542_v39  ;;  %1024 = vst [vmem:[%s2061_s2 + $0x100] sm:$0xff] %v1684_v43  ;;  %v1693_v47 = vpop.f32.mrb[2].mxu1 }
  0xec   :  { %995 = vst [vmem:[%s2061_s2 + $0x18] sm:$0xff] %v1391_v40  ;;  %v545_v42 = vpop.f32.mrb[3].mxu0  ;;  %1027 = vst [vmem:[%s2061_s2 + $0x118] sm:$0xff] %v1693_v47  ;;  %v1699_v48 = vpop.f32.mrb[3].mxu1  ;;  %v1129_v52 = vmul.f32 %v1391_v40, %v1391_v40 }
  0xed   :  { %993 = vst [vmem:[%s2061_s2 + $0x8] sm:$0xff] %v545_v42  ;;  %v1056_v45 = vadd.f32 %v545_v42, %v542_v39  ;;  %v1127_v46 = vmul.f32 %v545_v42, %v545_v42  ;;  %1025 = vst [vmem:[%s2061_s2 + $0x108] sm:$0xff] %v1699_v48 }
  0xef   :  { %v1057_v50 = vadd.f32 %v1390_v38, %v1056_v45  ;;  %v1190_v51 = vadd.f32 %v1127_v46, %v1126_v44 }
  0xf1   :  { %v1191_v53 = vadd.f32 %v1190_v51, %v1128_v49  ;;  %v1394_v54 = vpop.f32.mrb[4].mxu0  ;;  %v1058_v55 = vadd.f32 %v1391_v40, %v1057_v50  ;;  %v1711_v61 = vpop.f32.mrb[4].mxu1 }
  0xf2   :  { %998 = vst [vmem:[%s2061_s2 + $0x30] sm:$0xff] %v1394_v54  ;;  %v558_v56 = vpop.f32.mrb[5].mxu0  ;;  %1030 = vst [vmem:[%s2061_s2 + $0x130] sm:$0xff] %v1711_v61  ;;  %v1720_v63 = vpop.f32.mrb[5].mxu1  ;;  %v1132_v5 = vmul.f32 %v1394_v54, %v1394_v54 }
  0xf3   :  { %996 = vst [vmem:[%s2061_s2 + $0x20] sm:$0xff] %v558_v56  ;;  %v1059_v57 = vadd.f32 %v1058_v55, %v558_v56  ;;  %v1130_v58 = vmul.f32 %v558_v56, %v558_v56  ;;  %v1192_v59 = vadd.f32 %v1191_v53, %v1129_v52  ;;  %v1395_v60 = vpop.f32.mrb[6].mxu0  ;;  %1028 = vst [vmem:[%s2061_s2 + $0x120] sm:$0xff] %v1720_v63  ;;  %v1729_v3 = vpop.f32.mrb[6].mxu1 }
  0xf4   :  { %999 = vst [vmem:[%s2061_s2 + $0x38] sm:$0xff] %v1395_v60  ;;  %v561_v62 = vpop.f32.mrb[7].mxu0  ;;  %1031 = vst [vmem:[%s2061_s2 + $0x138] sm:$0xff] %v1729_v3  ;;  %v1735_v4 = vpop.f32.mrb[7].mxu1  ;;  %v1133_v8 = vmul.f32 %v1395_v60, %v1395_v60 }
  0xf5   :  { %v1193_v0 = vadd.f32 %v1192_v59, %v1130_v58  ;;  %997 = vst [vmem:[%s2061_s2 + $0x28] sm:$0xff] %v561_v62  ;;  %v1060_v1 = vadd.f32 %v1059_v57, %v561_v62  ;;  %v1131_v2 = vmul.f32 %v561_v62, %v561_v62  ;;  %1029 = vst [vmem:[%s2061_s2 + $0x128] sm:$0xff] %v1735_v4 }
  0xf7   :  { %v1061_v6 = vadd.f32 %v1394_v54, %v1060_v1  ;;  %v1194_v7 = vadd.f32 %v1193_v0, %v1131_v2 }
  0xf9   :  { %v1195_v9 = vadd.f32 %v1194_v7, %v1132_v5  ;;  %v1398_v10 = vpop.f32.mrb[8].mxu0  ;;  %v1062_v11 = vadd.f32 %v1395_v60, %v1061_v6  ;;  %v1747_v17 = vpop.f32.mrb[8].mxu1 }
  0xfa   :  { %1002 = vst [vmem:[%s2061_s2 + $0x50] sm:$0xff] %v1398_v10  ;;  %v574_v12 = vpop.f32.mrb[9].mxu0  ;;  %1034 = vst [vmem:[%s2061_s2 + $0x150] sm:$0xff] %v1747_v17  ;;  %v1756_v19 = vpop.f32.mrb[9].mxu1  ;;  %v1136_v25 = vmul.f32 %v1398_v10, %v1398_v10 }
  0xfb   :  { %1000 = vst [vmem:[%s2061_s2 + $0x40] sm:$0xff] %v574_v12  ;;  %v1063_v13 = vadd.f32 %v1062_v11, %v574_v12  ;;  %v1134_v14 = vmul.f32 %v574_v12, %v574_v12  ;;  %v1196_v15 = vadd.f32 %v1195_v9, %v1133_v8  ;;  %v1399_v16 = vpop.f32.mrb[10].mxu0  ;;  %1032 = vst [vmem:[%s2061_s2 + $0x140] sm:$0xff] %v1756_v19  ;;  %v1765_v23 = vpop.f32.mrb[10].mxu1 }
  0xfc   :  { %1003 = vst [vmem:[%s2061_s2 + $0x58] sm:$0xff] %v1399_v16  ;;  %v577_v18 = vpop.f32.mrb[11].mxu0  ;;  %1035 = vst [vmem:[%s2061_s2 + $0x158] sm:$0xff] %v1765_v23  ;;  %v1771_v24 = vpop.f32.mrb[11].mxu1  ;;  %v1137_v28 = vmul.f32 %v1399_v16, %v1399_v16 }
  0xfd   :  { %v1197_v20 = vadd.f32 %v1196_v15, %v1134_v14  ;;  %1001 = vst [vmem:[%s2061_s2 + $0x48] sm:$0xff] %v577_v18  ;;  %v1064_v21 = vadd.f32 %v1063_v13, %v577_v18  ;;  %v1135_v22 = vmul.f32 %v577_v18, %v577_v18  ;;  %1033 = vst [vmem:[%s2061_s2 + $0x148] sm:$0xff] %v1771_v24 }
  0xff   :  { %v1065_v26 = vadd.f32 %v1398_v10, %v1064_v21  ;;  %v1198_v27 = vadd.f32 %v1197_v20, %v1135_v22 }
 0x101   :  { %v1199_v29 = vadd.f32 %v1198_v27, %v1136_v25  ;;  %v1402_v30 = vpop.f32.mrb[12].mxu0  ;;  %v1066_v31 = vadd.f32 %v1399_v16, %v1065_v26  ;;  %v1783_v37 = vpop.f32.mrb[12].mxu1 }
 0x102   :  { %1006 = vst [vmem:[%s2061_s2 + $0x70] sm:$0xff] %v1402_v30  ;;  %v590_v32 = vpop.f32.mrb[13].mxu0  ;;  %1038 = vst [vmem:[%s2061_s2 + $0x170] sm:$0xff] %v1783_v37  ;;  %v1792_v39 = vpop.f32.mrb[13].mxu1  ;;  %v1140_v49 = vmul.f32 %v1402_v30, %v1402_v30 }
 0x103   :  { %1004 = vst [vmem:[%s2061_s2 + $0x60] sm:$0xff] %v590_v32  ;;  %v1067_v33 = vadd.f32 %v1066_v31, %v590_v32  ;;  %v1138_v34 = vmul.f32 %v590_v32, %v590_v32  ;;  %v1200_v35 = vadd.f32 %v1199_v29, %v1137_v28  ;;  %v1403_v36 = vpop.f32.mrb[14].mxu0  ;;  %1036 = vst [vmem:[%s2061_s2 + $0x160] sm:$0xff] %v1792_v39  ;;  %v1801_v45 = vpop.f32.mrb[14].mxu1 }
 0x104   :  { %1007 = vst [vmem:[%s2061_s2 + $0x78] sm:$0xff] %v1403_v36  ;;  %v593_v38 = vpop.f32.mrb[15].mxu0  ;;  %1039 = vst [vmem:[%s2061_s2 + $0x178] sm:$0xff] %v1801_v45  ;;  %v1807_v46 = vpop.f32.mrb[15].mxu1  ;;  %v1141_v52 = vmul.f32 %v1403_v36, %v1403_v36 }
 0x105   :  { %v1201_v40 = vadd.f32 %v1200_v35, %v1138_v34  ;;  %1005 = vst [vmem:[%s2061_s2 + $0x68] sm:$0xff] %v593_v38  ;;  %v1068_v42 = vadd.f32 %v1067_v33, %v593_v38  ;;  %v1139_v44 = vmul.f32 %v593_v38, %v593_v38  ;;  %1037 = vst [vmem:[%s2061_s2 + $0x168] sm:$0xff] %v1807_v46 }
 0x107   :  { %v1069_v50 = vadd.f32 %v1402_v30, %v1068_v42  ;;  %v1202_v51 = vadd.f32 %v1201_v40, %v1139_v44 }
 0x109   :  { %v1203_v53 = vadd.f32 %v1202_v51, %v1140_v49  ;;  %v1406_v54 = vpop.f32.mrb[16].mxu0  ;;  %v1070_v55 = vadd.f32 %v1403_v36, %v1069_v50  ;;  %v1819_v62 = vpop.f32.mrb[16].mxu1 }
 0x10a   :  { %1010 = vst [vmem:[%s2061_s2 + $0x90] sm:$0xff] %v1406_v54  ;;  %v606_v56 = vpop.f32.mrb[17].mxu0  ;;  %1042 = vst [vmem:[%s2061_s2 + $0x190] sm:$0xff] %v1819_v62  ;;  %v1828_v1 = vpop.f32.mrb[17].mxu1  ;;  %v1144_v9 = vmul.f32 %v1406_v54, %v1406_v54 }
 0x10b   :  { %1008 = vst [vmem:[%s2061_s2 + $0x80] sm:$0xff] %v606_v56  ;;  %v1071_v57 = vadd.f32 %v1070_v55, %v606_v56  ;;  %v1142_v58 = vmul.f32 %v606_v56, %v606_v56  ;;  %v1204_v59 = vadd.f32 %v1203_v53, %v1141_v52  ;;  %v1407_v60 = vpop.f32.mrb[18].mxu0  ;;  %1040 = vst [vmem:[%s2061_s2 + $0x180] sm:$0xff] %v1828_v1  ;;  %v1837_v7 = vpop.f32.mrb[18].mxu1 }
 0x10c   :  { %1011 = vst [vmem:[%s2061_s2 + $0x98] sm:$0xff] %v1407_v60  ;;  %v609_v0 = vpop.f32.mrb[19].mxu0  ;;  %1043 = vst [vmem:[%s2061_s2 + $0x198] sm:$0xff] %v1837_v7  ;;  %v1843_v8 = vpop.f32.mrb[19].mxu1  ;;  %v1145_v12 = vmul.f32 %v1407_v60, %v1407_v60 }
 0x10d   :  { %v1205_v2 = vadd.f32 %v1204_v59, %v1142_v58  ;;  %1009 = vst [vmem:[%s2061_s2 + $0x88] sm:$0xff] %v609_v0  ;;  %v1072_v5 = vadd.f32 %v1071_v57, %v609_v0  ;;  %v1143_v6 = vmul.f32 %v609_v0, %v609_v0  ;;  %1041 = vst [vmem:[%s2061_s2 + $0x188] sm:$0xff] %v1843_v8 }
 0x10f   :  { %v1073_v10 = vadd.f32 %v1406_v54, %v1072_v5  ;;  %v1206_v11 = vadd.f32 %v1205_v2, %v1143_v6 }
 0x111   :  { %v1207_v13 = vadd.f32 %v1206_v11, %v1144_v9  ;;  %v1410_v14 = vpop.f32.mrb[20].mxu0  ;;  %v1074_v15 = vadd.f32 %v1407_v60, %v1073_v10  ;;  %v1855_v25 = vpop.f32.mrb[20].mxu1 }
 0x112   :  { %1014 = vst [vmem:[%s2061_s2 + $0xb0] sm:$0xff] %v1410_v14  ;;  %v622_v16 = vpop.f32.mrb[21].mxu0  ;;  %1046 = vst [vmem:[%s2061_s2 + $0x1b0] sm:$0xff] %v1855_v25  ;;  %v1864_v27 = vpop.f32.mrb[21].mxu1  ;;  %v1148_v33 = vmul.f32 %v1410_v14, %v1410_v14 }
 0x113   :  { %1012 = vst [vmem:[%s2061_s2 + $0xa0] sm:$0xff] %v622_v16  ;;  %v1075_v18 = vadd.f32 %v1074_v15, %v622_v16  ;;  %v1146_v20 = vmul.f32 %v622_v16, %v622_v16  ;;  %v1208_v21 = vadd.f32 %v1207_v13, %v1145_v12  ;;  %v1411_v22 = vpop.f32.mrb[22].mxu0  ;;  %1044 = vst [vmem:[%s2061_s2 + $0x1a0] sm:$0xff] %v1864_v27  ;;  %v1873_v31 = vpop.f32.mrb[22].mxu1 }
 0x114   :  { %1015 = vst [vmem:[%s2061_s2 + $0xb8] sm:$0xff] %v1411_v22  ;;  %v625_v26 = vpop.f32.mrb[23].mxu0  ;;  %1047 = vst [vmem:[%s2061_s2 + $0x1b8] sm:$0xff] %v1873_v31  ;;  %v1879_v32 = vpop.f32.mrb[23].mxu1  ;;  %v1149_v36 = vmul.f32 %v1411_v22, %v1411_v22 }
 0x115   :  { %v1209_v28 = vadd.f32 %v1208_v21, %v1146_v20  ;;  %1013 = vst [vmem:[%s2061_s2 + $0xa8] sm:$0xff] %v625_v26  ;;  %v1076_v29 = vadd.f32 %v1075_v18, %v625_v26  ;;  %v1147_v30 = vmul.f32 %v625_v26, %v625_v26  ;;  %1045 = vst [vmem:[%s2061_s2 + $0x1a8] sm:$0xff] %v1879_v32 }
 0x117   :  { %v1077_v34 = vadd.f32 %v1410_v14, %v1076_v29  ;;  %v1210_v35 = vadd.f32 %v1209_v28, %v1147_v30 }
 0x119   :  { %v1211_v38 = vadd.f32 %v1210_v35, %v1148_v33  ;;  %v1414_v40 = vpop.f32.mrb[24].mxu0  ;;  %v1078_v42 = vadd.f32 %v1411_v22, %v1077_v34  ;;  %v1891_v53 = vpop.f32.mrb[24].mxu1 }
 0x11a   :  { %1018 = vst [vmem:[%s2061_s2 + $0xd0] sm:$0xff] %v1414_v40  ;;  %v638_v44 = vpop.f32.mrb[25].mxu0  ;;  %1050 = vst [vmem:[%s2061_s2 + $0x1d0] sm:$0xff] %v1891_v53  ;;  %v1900_v55 = vpop.f32.mrb[25].mxu1  ;;  %v1152_v0 = vmul.f32 %v1414_v40, %v1414_v40 }
 0x11b   :  { %1016 = vst [vmem:[%s2061_s2 + $0xc0] sm:$0xff] %v638_v44  ;;  %v1079_v49 = vadd.f32 %v1078_v42, %v638_v44  ;;  %v1150_v50 = vmul.f32 %v638_v44, %v638_v44  ;;  %v1212_v51 = vadd.f32 %v1211_v38, %v1149_v36  ;;  %v1415_v52 = vpop.f32.mrb[26].mxu0  ;;  %1048 = vst [vmem:[%s2061_s2 + $0x1c0] sm:$0xff] %v1900_v55  ;;  %v1909_v59 = vpop.f32.mrb[26].mxu1 }
 0x11c   :  { %1019 = vst [vmem:[%s2061_s2 + $0xd8] sm:$0xff] %v1415_v52  ;;  %v641_v54 = vpop.f32.mrb[27].mxu0  ;;  %1051 = vst [vmem:[%s2061_s2 + $0x1d8] sm:$0xff] %v1909_v59  ;;  %v1915_v60 = vpop.f32.mrb[27].mxu1  ;;  %v1153_v6 = vmul.f32 %v1415_v52, %v1415_v52  ;;  %v1158_v42 = vmul.f32 %v1684_v43, %v1684_v43 }
 0x11d   :  { %v1213_v56 = vadd.f32 %v1212_v51, %v1150_v50  ;;  %1017 = vst [vmem:[%s2061_s2 + $0xc8] sm:$0xff] %v641_v54  ;;  %v1080_v57 = vadd.f32 %v1079_v49, %v641_v54  ;;  %v1151_v58 = vmul.f32 %v641_v54, %v641_v54  ;;  %1049 = vst [vmem:[%s2061_s2 + $0x1c8] sm:$0xff] %v1915_v60 }
 0x11e   :  { %v1160_v54 = vmul.f32 %v1675_v41, %v1675_v41 }
 0x11f   :  { %v1081_v2 = vadd.f32 %v1414_v40, %v1080_v57  ;;  %v1214_v5 = vadd.f32 %v1213_v56, %v1151_v58  ;;  %v1161_v58 = vmul.f32 %v1693_v47, %v1693_v47 }
 0x121   :  { %v1215_v9 = vadd.f32 %v1214_v5, %v1152_v0  ;;  %v1418_v10 = vpop.f32.mrb[28].mxu0  ;;  %v1082_v11 = vadd.f32 %v1415_v52, %v1081_v2  ;;  %v1927_v18 = vpop.f32.mrb[28].mxu1  ;;  %v1159_v52 = vmul.f32 %v1699_v48, %v1699_v48 }
 0x122   :  { %1022 = vst [vmem:[%s2061_s2 + $0xf0] sm:$0xff] %v1418_v10  ;;  %v654_v12 = vpop.f32.mrb[29].mxu0  ;;  %1054 = vst [vmem:[%s2061_s2 + $0x1f0] sm:$0xff] %v1927_v18  ;;  %v1936_v21 = vpop.f32.mrb[29].mxu1  ;;  %v1156_v33 = vmul.f32 %v1418_v10, %v1418_v10 }
 0x123   :  { %1020 = vst [vmem:[%s2061_s2 + $0xe0] sm:$0xff] %v654_v12  ;;  %v1083_v13 = vadd.f32 %v1082_v11, %v654_v12  ;;  %v1154_v14 = vmul.f32 %v654_v12, %v654_v12  ;;  %v1216_v15 = vadd.f32 %v1215_v9, %v1153_v6  ;;  %v1419_v16 = vpop.f32.mrb[30].mxu0  ;;  %1052 = vst [vmem:[%s2061_s2 + $0x1e0] sm:$0xff] %v1936_v21  ;;  %v1945_v29 = vpop.f32.mrb[30].mxu1 }
 0x124   :  { %1023 = vst [vmem:[%s2061_s2 + $0xf8] sm:$0xff] %v1419_v16  ;;  %v657_v20 = vpop.f32.mrb[31].mxu0  ;;  %1055 = vst [vmem:[%s2061_s2 + $0x1f8] sm:$0xff] %v1945_v29  ;;  %v1951_v30 = vpop.f32.mrb[31].mxu1  ;;  %v1157_v36 = vmul.f32 %v1419_v16, %v1419_v16 }
 0x125   :  { %v1217_v22 = vadd.f32 %v1216_v15, %v1154_v14  ;;  %1021 = vst [vmem:[%s2061_s2 + $0xe8] sm:$0xff] %v657_v20  ;;  %v1084_v26 = vadd.f32 %v1083_v13, %v657_v20  ;;  %v1155_v28 = vmul.f32 %v657_v20, %v657_v20  ;;  %1053 = vst [vmem:[%s2061_s2 + $0x1e8] sm:$0xff] %v1951_v30 }
 0x127   :  { %v1085_v34 = vadd.f32 %v1418_v10, %v1084_v26  ;;  %v1218_v35 = vadd.f32 %v1217_v22, %v1155_v28  ;;  %v1163_v10 = vmul.f32 %v1735_v4, %v1735_v4  ;;  %v1167_v22 = vmul.f32 %v1771_v24, %v1771_v24 }
 0x129   :  { %v1219_v38 = vadd.f32 %v1218_v35, %v1156_v33  ;;  %v1086_v40 = vadd.f32 %v1419_v16, %v1085_v34 }
 0x12b   :  { %v1087_v44 = vadd.f32 %v1086_v40, %v1684_v43  ;;  %v1220_v49 = vadd.f32 %v1219_v38, %v1157_v36  ;;  %v1162_v43 = vmul.f32 %v1720_v63, %v1720_v63  ;;  %v1171_v40 = vmul.f32 %v1807_v46, %v1807_v46 }
 0x12d   :  { %v1221_v50 = vadd.f32 %v1220_v49, %v1158_v42  ;;  %v1088_v51 = vadd.f32 %v1087_v44, %v1699_v48 }
 0x12f   :  { %v1089_v56 = vadd.f32 %v1675_v41, %v1088_v51  ;;  %v1222_v57 = vadd.f32 %v1221_v50, %v1159_v52  ;;  %v1164_v41 = vmul.f32 %v1711_v61, %v1711_v61 }
 0x131   :  { %v1223_v0 = vadd.f32 %v1222_v57, %v1160_v54  ;;  %v1090_v2 = vadd.f32 %v1693_v47, %v1089_v56  ;;  %v1165_v47 = vmul.f32 %v1729_v3, %v1729_v3  ;;  %v1175_v56 = vmul.f32 %v1843_v8, %v1843_v8 }
 0x133   :  { %v1091_v5 = vadd.f32 %v1090_v2, %v1720_v63  ;;  %v1224_v6 = vadd.f32 %v1223_v0, %v1161_v58  ;;  %v1166_v63 = vmul.f32 %v1756_v19, %v1756_v19 }
 0x135   :  { %v1225_v9 = vadd.f32 %v1224_v6, %v1162_v43  ;;  %v1092_v48 = vadd.f32 %v1091_v5, %v1735_v4 }
 0x137   :  { %v1093_v11 = vadd.f32 %v1711_v61, %v1092_v48  ;;  %v1226_v12 = vadd.f32 %v1225_v9, %v1163_v10  ;;  %v1168_v61 = vmul.f32 %v1747_v17, %v1747_v17  ;;  %v1179_v9 = vmul.f32 %v1879_v32, %v1879_v32 }
 0x139   :  { %v1227_v13 = vadd.f32 %v1226_v12, %v1164_v41  ;;  %v1094_v14 = vadd.f32 %v1729_v3, %v1093_v11  ;;  %v1169_v3 = vmul.f32 %v1765_v23, %v1765_v23 }
 0x13b   :  { %v1095_v15 = vadd.f32 %v1094_v14, %v1756_v19  ;;  %v1228_v16 = vadd.f32 %v1227_v13, %v1165_v47  ;;  %v1170_v19 = vmul.f32 %v1792_v39, %v1792_v39  ;;  %v1183_v14 = vmul.f32 %v1915_v60, %v1915_v60 }
 0x13d   :  { %v1229_v20 = vadd.f32 %v1228_v16, %v1166_v63  ;;  %v1096_v4 = vadd.f32 %v1095_v15, %v1771_v24 }
 0x13f   :  { %v1097_v26 = vadd.f32 %v1747_v17, %v1096_v4  ;;  %v1230_v28 = vadd.f32 %v1229_v20, %v1167_v22  ;;  %v1172_v17 = vmul.f32 %v1783_v37, %v1783_v37 }
 0x141   :  { %v1231_v33 = vadd.f32 %v1230_v28, %v1168_v61  ;;  %v1098_v34 = vadd.f32 %v1765_v23, %v1097_v26  ;;  %v1173_v23 = vmul.f32 %v1801_v45, %v1801_v45  ;;  %v1187_v26 = vmul.f32 %v1951_v30, %v1951_v30 }
 0x143   :  { %v1099_v35 = vadd.f32 %v1098_v34, %v1792_v39  ;;  %v1232_v36 = vadd.f32 %v1231_v33, %v1169_v3  ;;  %v1174_v39 = vmul.f32 %v1828_v1, %v1828_v1 }
 0x145   :  { %v1233_v38 = vadd.f32 %v1232_v36, %v1170_v19  ;;  %v1100_v24 = vadd.f32 %v1099_v35, %v1807_v46 }
 0x147   :  { %v1101_v42 = vadd.f32 %v1783_v37, %v1100_v24  ;;  %v1234_v44 = vadd.f32 %v1233_v38, %v1171_v40  ;;  %v1176_v37 = vmul.f32 %v1819_v62, %v1819_v62 }
 0x149   :  { %v1235_v49 = vadd.f32 %v1234_v44, %v1172_v17  ;;  %v1102_v50 = vadd.f32 %v1801_v45, %v1101_v42  ;;  %v1177_v45 = vmul.f32 %v1837_v7, %v1837_v7 }
 0x14b   :  { %v1103_v51 = vadd.f32 %v1102_v50, %v1828_v1  ;;  %v1236_v52 = vadd.f32 %v1235_v49, %v1173_v23  ;;  %v1178_v1 = vmul.f32 %v1864_v27, %v1864_v27 }
 0x14d   :  { %v1237_v54 = vadd.f32 %v1236_v52, %v1174_v39  ;;  %v1104_v46 = vadd.f32 %v1103_v51, %v1843_v8 }
 0x14f   :  { %v1105_v57 = vadd.f32 %v1819_v62, %v1104_v46  ;;  %v1238_v58 = vadd.f32 %v1237_v54, %v1175_v56  ;;  %v1180_v62 = vmul.f32 %v1855_v25, %v1855_v25 }
 0x151   :  { %v1239_v0 = vadd.f32 %v1238_v58, %v1176_v37  ;;  %v1106_v2 = vadd.f32 %v1837_v7, %v1105_v57  ;;  %v1181_v7 = vmul.f32 %v1873_v31, %v1873_v31 }
 0x153   :  { %v1107_v43 = vadd.f32 %v1106_v2, %v1864_v27  ;;  %v1240_v5 = vadd.f32 %v1239_v0, %v1177_v45  ;;  %v1182_v27 = vmul.f32 %v1900_v55, %v1900_v55 }
 0x155   :  { %v1241_v6 = vadd.f32 %v1240_v5, %v1178_v1  ;;  %v1108_v8 = vadd.f32 %v1107_v43, %v1879_v32 }
 0x157   :  { %v1109_v48 = vadd.f32 %v1855_v25, %v1108_v8  ;;  %v1242_v10 = vadd.f32 %v1241_v6, %v1179_v9  ;;  %v1184_v25 = vmul.f32 %v1891_v53, %v1891_v53 }
 0x159   :  { %v1243_v41 = vadd.f32 %v1242_v10, %v1180_v62  ;;  %v1110_v11 = vadd.f32 %v1873_v31, %v1109_v48  ;;  %v1185_v31 = vmul.f32 %v1909_v59, %v1909_v59 }
 0x15b   :  { %v1111_v12 = vadd.f32 %v1110_v11, %v1900_v55  ;;  %v1244_v47 = vadd.f32 %v1243_v41, %v1181_v7  ;;  %v1186_v55 = vmul.f32 %v1936_v21, %v1936_v21 }
 0x15d   :  { %v1245_v13 = vadd.f32 %v1244_v47, %v1182_v27  ;;  %v1112_v32 = vadd.f32 %v1111_v12, %v1915_v60 }
 0x15f   :  { %v1113_v63 = vadd.f32 %v1891_v53, %v1112_v32  ;;  %v1246_v15 = vadd.f32 %v1245_v13, %v1183_v14  ;;  %v1188_v53 = vmul.f32 %v1927_v18, %v1927_v18 }
 0x161   :  { %v1247_v16 = vadd.f32 %v1246_v15, %v1184_v25  ;;  %v1114_v20 = vadd.f32 %v1909_v59, %v1113_v63  ;;  %v1189_v59 = vmul.f32 %v1945_v29, %v1945_v29 }
 0x163   :  { %v1115_v4 = vadd.f32 %v1114_v20, %v1936_v21  ;;  %v1248_v22 = vadd.f32 %v1247_v16, %v1185_v31 }
 0x165   :  { %v1249_v61 = vadd.f32 %v1248_v22, %v1186_v55  ;;  %v1116_v60 = vadd.f32 %v1115_v4, %v1951_v30 }
 0x167   :  { %v1117_v28 = vadd.f32 %v1927_v18, %v1116_v60  ;;  %v1250_v3 = vadd.f32 %v1249_v61, %v1187_v26 }
 0x169   :  { %v1118_v33 = vadd.f32 %v1945_v29, %v1117_v28  ;;  %v1251_v34 = vadd.f32 %v1250_v3, %v1188_v53 }
 0x16b   :  { %v1119_v21 = vrot.slane %v1118_v33, 4  ;;  %v1252_v19 = vadd.f32 %v1251_v34, %v1189_v59 }
 0x16d   :  { %v1120_v35 = vadd.f32 %v1119_v21, %v1118_v33  ;;  %v1253_v36 = vrot.slane %v1252_v19, 4 }
 0x16f   :  { %v1121_v38 = vrot.slane %v1120_v35, 2  ;;  %v1254_v24 = vadd.f32 %v1253_v36, %v1252_v19 }
 0x171   :  { %v1122_v40 = vadd.f32 %v1121_v38, %v1120_v35  ;;  %v1255_v30 = vrot.slane %v1254_v24, 2 }
 0x173   :  { %v1123_v17 = vrot.slane %v1122_v40, 1  ;;  %v1256_v42 = vadd.f32 %v1255_v30, %v1254_v24 }
 0x175   :  { %v1124_v44 = vadd.f32 %v1123_v17, %v1122_v40  ;;  %v1257_v23 = vrot.slane %v1256_v42, 1 }
 0x177   :  { %1125 = vst [vmem:[%s2062_s3] sm:$0x1] %v1124_v44  ;;  %v1258_v18 = vadd.f32 %v1257_v23, %v1256_v42 }
 0x179   :  { %1259 = vst [vmem:[%s2063_s4] sm:$0x1] %v1258_v18 }

// kernel: encoder_forward.16
= control target key start
LH: loop header
LB: loop body
LE: loop exit
PB: predicated region body
PF: predicated region fallthrough
CT: control target
= control target key end

     0   :  { %vm95_vm0 = vcmask 64512   ;;  %s2360_s2 = inlined_call_operand.vmem [shape: f32[8,128], index: 2, kind: input, shape index: {}]   ;;  %s2361_s1 = inlined_call_operand.vmem [shape: f32[512,8], index: 1, kind: input, shape index: {}]   ;;  %s2362_s0 = inlined_call_operand.vmem [shape: f32[512,128], index: 0, kind: input, shape index: {}]   ;;  %s2363_s4 = inlined_call_operand.vmem [shape: f32[1,128], index: 4, kind: input, shape index: {}]   ;;  %s2364_s5 = inlined_call_operand.vmem [shape: f32[1,128], index: 5, kind: input, shape index: {}]   ;;  %s2365_s3 = inlined_call_operand.vmem [shape: f32[1,128], index: 3, kind: input, shape index: {}]   ;;  %s2366_s6 = inlined_call_operand.vmem [shape: f32[512,128], index: 6, kind: output, shape index: {}]  }
   0x1   :  { %v87_v0 = vld [vmem:[%s2360_s2] sm:$0xff]  ;;  %v24_v3 = vld [vmem:[%s2361_s1 + $0x8] sm:$0xff]  ;;  %v25_v5 = vld [vmem:[%s2361_s1 + $0x10] sm:$0xff] }
   0x2   :  { %v23_v1 = vld [vmem:[%s2361_s1] sm:$0xff]  ;;  %1207 = vmatprep.subr.mxu0 %v87_v0  ;;  %1305 = vmatprep.subr.mxu1 %v87_v0  ;;  %v56_v4 = vld [vmem:[%s2361_s1 + $0x108] sm:$0xff]  ;;  %v57_v6 = vld [vmem:[%s2361_s1 + $0x110] sm:$0xff] }
   0x3   :  { %v55_v2 = vld [vmem:[%s2361_s1 + $0x100] sm:$0xff]  ;;  %1208 = vmatpush3.msra.mxu0 %v87_v0  ;;  %1306 = vmatpush3.msra.mxu1 %v87_v0  ;;  %v26_v7 = vld [vmem:[%s2361_s1 + $0x18] sm:$0xff]  ;;  %v28_v11 = vld [vmem:[%s2361_s1 + $0x28] sm:$0xff] }
   0x4   :  { %1209 = vmatprep.mubr.msk.f32.mxu0 %vm95_vm0, %v23_v1  ;;  %1257 = vmatprep.mubr.msk.f32.mxu1 %vm95_vm0, %v55_v2  ;;  %v58_v8 = vld [vmem:[%s2361_s1 + $0x118] sm:$0xff]  ;;  %v27_v9 = vld [vmem:[%s2361_s1 + $0x20] sm:$0xff]  ;;  %v60_v12 = vld [vmem:[%s2361_s1 + $0x128] sm:$0xff] }
   0x5   :  { %1210 = vmatmul.mubr.msk.f32.vlgmr.msra.gmra.mrb[0].mxu0 %vm95_vm0, %v24_v3  ;;  %1258 = vmatmul.mubr.msk.f32.vlgmr.msra.gmra.mrb[0].mxu1 %vm95_vm0, %v56_v4  ;;  %v59_v10 = vld [vmem:[%s2361_s1 + $0x120] sm:$0xff]  ;;  %v29_v13 = vld [vmem:[%s2361_s1 + $0x30] sm:$0xff]  ;;  %v30_v15 = vld [vmem:[%s2361_s1 + $0x38] sm:$0xff] }
   0x6   :  { %1212 = vmatprep.mubr.msk.f32.mxu0 %vm95_vm0, %v25_v5  ;;  %1260 = vmatprep.mubr.msk.f32.mxu1 %vm95_vm0, %v57_v6  ;;  %v61_v14 = vld [vmem:[%s2361_s1 + $0x130] sm:$0xff]  ;;  %v62_v16 = vld [vmem:[%s2361_s1 + $0x138] sm:$0xff]  ;;  %v31_v17 = vld [vmem:[%s2361_s1 + $0x40] sm:$0xff] }
   0x7   :  { %v63_v18 = vld [vmem:[%s2361_s1 + $0x140] sm:$0xff]  ;;  %v32_v19 = vld [vmem:[%s2361_s1 + $0x48] sm:$0xff]  ;;  %v33_v21 = vld [vmem:[%s2361_s1 + $0x50] sm:$0xff] }
   0x8   :  { %v64_v20 = vld [vmem:[%s2361_s1 + $0x148] sm:$0xff]  ;;  %v65_v22 = vld [vmem:[%s2361_s1 + $0x150] sm:$0xff]  ;;  %v34_v23 = vld [vmem:[%s2361_s1 + $0x58] sm:$0xff] }
   0x9   :  { %1213 = vmatmul.mubr.msk.f32.gmra.mrb[2].mxu0 %vm95_vm0, %v26_v7  ;;  %1261 = vmatmul.mubr.msk.f32.gmra.mrb[2].mxu1 %vm95_vm0, %v58_v8  ;;  %v66_v24 = vld [vmem:[%s2361_s1 + $0x158] sm:$0xff]  ;;  %v35_v25 = vld [vmem:[%s2361_s1 + $0x60] sm:$0xff]  ;;  %v36_v27 = vld [vmem:[%s2361_s1 + $0x68] sm:$0xff] }
   0xa   :  { %1215 = vmatprep.mubr.msk.f32.mxu0 %vm95_vm0, %v27_v9  ;;  %1263 = vmatprep.mubr.msk.f32.mxu1 %vm95_vm0, %v59_v10  ;;  %v67_v26 = vld [vmem:[%s2361_s1 + $0x160] sm:$0xff]  ;;  %v68_v28 = vld [vmem:[%s2361_s1 + $0x168] sm:$0xff]  ;;  %v37_v29 = vld [vmem:[%s2361_s1 + $0x70] sm:$0xff] }
   0xb   :  { %v69_v30 = vld [vmem:[%s2361_s1 + $0x170] sm:$0xff]  ;;  %v38_v31 = vld [vmem:[%s2361_s1 + $0x78] sm:$0xff]  ;;  %v39_v33 = vld [vmem:[%s2361_s1 + $0x80] sm:$0xff] }
   0xc   :  { %v70_v32 = vld [vmem:[%s2361_s1 + $0x178] sm:$0xff]  ;;  %v71_v34 = vld [vmem:[%s2361_s1 + $0x180] sm:$0xff]  ;;  %v40_v35 = vld [vmem:[%s2361_s1 + $0x88] sm:$0xff] }
   0xd   :  { %1216 = vmatmul.mubr.msk.f32.gmra.mrb[4].mxu0 %vm95_vm0, %v28_v11  ;;  %1264 = vmatmul.mubr.msk.f32.gmra.mrb[4].mxu1 %vm95_vm0, %v60_v12  ;;  %v72_v36 = vld [vmem:[%s2361_s1 + $0x188] sm:$0xff]  ;;  %v41_v37 = vld [vmem:[%s2361_s1 + $0x90] sm:$0xff]  ;;  %v42_v39 = vld [vmem:[%s2361_s1 + $0x98] sm:$0xff] }
   0xe   :  { %1218 = vmatprep.mubr.msk.f32.mxu0 %vm95_vm0, %v29_v13  ;;  %1266 = vmatprep.mubr.msk.f32.mxu1 %vm95_vm0, %v61_v14  ;;  %v73_v38 = vld [vmem:[%s2361_s1 + $0x190] sm:$0xff]  ;;  %v74_v40 = vld [vmem:[%s2361_s1 + $0x198] sm:$0xff]  ;;  %v43_v41 = vld [vmem:[%s2361_s1 + $0xa0] sm:$0xff] }
   0xf   :  { %v75_v42 = vld [vmem:[%s2361_s1 + $0x1a0] sm:$0xff]  ;;  %v44_v43 = vld [vmem:[%s2361_s1 + $0xa8] sm:$0xff]  ;;  %v45_v45 = vld [vmem:[%s2361_s1 + $0xb0] sm:$0xff] }
  0x10   :  { %v76_v44 = vld [vmem:[%s2361_s1 + $0x1a8] sm:$0xff]  ;;  %v77_v46 = vld [vmem:[%s2361_s1 + $0x1b0] sm:$0xff]  ;;  %v46_v47 = vld [vmem:[%s2361_s1 + $0xb8] sm:$0xff] }
  0x11   :  { %1219 = vmatmul.mubr.msk.f32.gmra.mrb[6].mxu0 %vm95_vm0, %v30_v15  ;;  %1267 = vmatmul.mubr.msk.f32.gmra.mrb[6].mxu1 %vm95_vm0, %v62_v16  ;;  %v78_v48 = vld [vmem:[%s2361_s1 + $0x1b8] sm:$0xff]  ;;  %v47_v49 = vld [vmem:[%s2361_s1 + $0xc0] sm:$0xff]  ;;  %v48_v51 = vld [vmem:[%s2361_s1 + $0xc8] sm:$0xff] }
  0x12   :  { %1221 = vmatprep.mubr.msk.f32.mxu0 %vm95_vm0, %v31_v17  ;;  %1269 = vmatprep.mubr.msk.f32.mxu1 %vm95_vm0, %v63_v18  ;;  %v79_v50 = vld [vmem:[%s2361_s1 + $0x1c0] sm:$0xff]  ;;  %v80_v52 = vld [vmem:[%s2361_s1 + $0x1c8] sm:$0xff]  ;;  %v49_v53 = vld [vmem:[%s2361_s1 + $0xd0] sm:$0xff] }
  0x13   :  { %v81_v54 = vld [vmem:[%s2361_s1 + $0x1d0] sm:$0xff]  ;;  %v50_v55 = vld [vmem:[%s2361_s1 + $0xd8] sm:$0xff]  ;;  %v51_v57 = vld [vmem:[%s2361_s1 + $0xe0] sm:$0xff] }
  0x14   :  { %v82_v56 = vld [vmem:[%s2361_s1 + $0x1d8] sm:$0xff]  ;;  %v83_v58 = vld [vmem:[%s2361_s1 + $0x1e0] sm:$0xff]  ;;  %v52_v59 = vld [vmem:[%s2361_s1 + $0xe8] sm:$0xff] }
  0x15   :  { %1222 = vmatmul.mubr.msk.f32.gmra.mrb[8].mxu0 %vm95_vm0, %v32_v19  ;;  %1270 = vmatmul.mubr.msk.f32.gmra.mrb[8].mxu1 %vm95_vm0, %v64_v20  ;;  %v84_v60 = vld [vmem:[%s2361_s1 + $0x1e8] sm:$0xff]  ;;  %v53_v61 = vld [vmem:[%s2361_s1 + $0xf0] sm:$0xff]  ;;  %v54_v63 = vld [vmem:[%s2361_s1 + $0xf8] sm:$0xff] }
  0x16   :  { %1224 = vmatprep.mubr.msk.f32.mxu0 %vm95_vm0, %v33_v21  ;;  %1272 = vmatprep.mubr.msk.f32.mxu1 %vm95_vm0, %v65_v22  ;;  %v85_v62 = vld [vmem:[%s2361_s1 + $0x1f0] sm:$0xff]  ;;  %v86_v0 = vld [vmem:[%s2361_s1 + $0x1f8] sm:$0xff]  ;;  %v674_v1 = vld [vmem:[%s2362_s0 + $0x8] sm:$0xff] }
  0x17   :  { %v1607_v2 = vld [vmem:[%s2363_s4] ss:$0 sm:$0xff]  ;;  %v706_v3 = vld [vmem:[%s2362_s0 + $0x108] sm:$0xff]  ;;  %v676_v6 = vld [vmem:[%s2362_s0 + $0x18] sm:$0xff] }
  0x18   :  { %v673_v4 = vld [vmem:[%s2362_s0] sm:$0xff]  ;;  %v708_v7 = vld [vmem:[%s2362_s0 + $0x118] sm:$0xff]  ;;  %v745_v8 = vmul.f32 %v1607_v2, %v674_v1  ;;  %v777_v9 = vmul.f32 %v1607_v2, %v706_v3  ;;  %v675_v10 = vld [vmem:[%s2362_s0 + $0x10] sm:$0xff]  ;;  %v747_v17 = vmul.f32 %v1607_v2, %v676_v6 }
  0x19   :  { %1225 = vmatmul.mubr.msk.f32.gmra.mrb[10].mxu0 %vm95_vm0, %v34_v23  ;;  %1273 = vmatmul.mubr.msk.f32.gmra.mrb[10].mxu1 %vm95_vm0, %v66_v24  ;;  %v705_v5 = vld [vmem:[%s2362_s0 + $0x100] sm:$0xff]  ;;  %v707_v11 = vld [vmem:[%s2362_s0 + $0x110] sm:$0xff]  ;;  %v744_v13 = vmul.f32 %v1607_v2, %v673_v4  ;;  %v678_v15 = vld [vmem:[%s2362_s0 + $0x28] sm:$0xff]  ;;  %v779_v18 = vmul.f32 %v1607_v2, %v708_v7  ;;  %v746_v21 = vmul.f32 %v1607_v2, %v675_v10 }
  0x1a   :  { %1227 = vmatprep.mubr.msk.f32.mxu0 %vm95_vm0, %v35_v25  ;;  %1275 = vmatprep.mubr.msk.f32.mxu1 %vm95_vm0, %v67_v26  ;;  %v1635_v12 = vld [vmem:[%s2364_s5] ss:$0 sm:$0xff]  ;;  %v776_v14 = vmul.f32 %v1607_v2, %v705_v5  ;;  %v710_v16 = vld [vmem:[%s2362_s0 + $0x128] sm:$0xff]  ;;  %v778_v22 = vmul.f32 %v1607_v2, %v707_v11  ;;  %v680_v23 = vld [vmem:[%s2362_s0 + $0x38] sm:$0xff] }
  0x1b   :  { %v677_v19 = vld [vmem:[%s2362_s0 + $0x20] sm:$0xff]  ;;  %v712_v24 = vld [vmem:[%s2362_s0 + $0x138] sm:$0xff]  ;;  %v1662_v25 = vadd.f32 %v1635_v12, %v745_v8  ;;  %v1665_v26 = vadd.f32 %v1635_v12, %v777_v9 }
  0x1c   :  { %v709_v20 = vld [vmem:[%s2362_s0 + $0x120] sm:$0xff]  ;;  %v688_v8 = vld [vmem:[%s2362_s0 + $0x78] sm:$0xff] }
  0x1d   :  { %1228 = vmatmul.mubr.msk.f32.gmra.mrb[12].mxu0 %vm95_vm0, %v36_v27  ;;  %1276 = vmatmul.mubr.msk.f32.gmra.mrb[12].mxu1 %vm95_vm0, %v68_v28  ;;  %v749_v27 = vmul.f32 %v1607_v2, %v678_v15  ;;  %v781_v28 = vmul.f32 %v1607_v2, %v710_v16  ;;  %v685_v1 = vld [vmem:[%s2362_s0 + $0x60] sm:$0xff]  ;;  %v720_v9 = vld [vmem:[%s2362_s0 + $0x178] sm:$0xff]  ;;  %v687_v15 = vld [vmem:[%s2362_s0 + $0x70] sm:$0xff] }
  0x1e   :  { %1230 = vmatprep.mubr.msk.f32.mxu0 %vm95_vm0, %v37_v29  ;;  %1278 = vmatprep.mubr.msk.f32.mxu1 %vm95_vm0, %v69_v30  ;;  %v679_v29 = vld [vmem:[%s2362_s0 + $0x30] sm:$0xff]  ;;  %v717_v3 = vld [vmem:[%s2362_s0 + $0x160] sm:$0xff] }
  0x1f   :  { %v711_v30 = vld [vmem:[%s2362_s0 + $0x130] sm:$0xff] }
  0x20   :  { %v719_v16 = vld [vmem:[%s2362_s0 + $0x170] sm:$0xff] }
  0x21   :  { %1231 = vmatmul.mubr.msk.f32.gmra.mrb[14].mxu0 %vm95_vm0, %v38_v31  ;;  %1279 = vmatmul.mubr.msk.f32.gmra.mrb[14].mxu1 %vm95_vm0, %v70_v32  ;;  %v1676_v31 = vadd.f32 %v1635_v12, %v744_v13  ;;  %v1679_v32 = vadd.f32 %v1635_v12, %v776_v14 }
  0x22   :  { %1233 = vmatprep.mubr.msk.f32.mxu0 %vm95_vm0, %v39_v33  ;;  %1281 = vmatprep.mubr.msk.f32.mxu1 %vm95_vm0, %v71_v34  ;;  %v748_v33 = vmul.f32 %v1607_v2, %v677_v19  ;;  %v780_v34 = vmul.f32 %v1607_v2, %v709_v20  ;;  %v756_v19 = vmul.f32 %v1607_v2, %v685_v1 }
  0x23   :  { %v788_v20 = vmul.f32 %v1607_v2, %v717_v3 }
  0x25   :  { %1234 = vmatmul.mubr.msk.f32.gmra.mrb[16].mxu0 %vm95_vm0, %v40_v35  ;;  %1282 = vmatmul.mubr.msk.f32.gmra.mrb[16].mxu1 %vm95_vm0, %v72_v36  ;;  %v682_v35 = vld [vmem:[%s2362_s0 + $0x48] sm:$0xff] }
  0x26   :  { %1236 = vmatprep.mubr.msk.f32.mxu0 %vm95_vm0, %v41_v37  ;;  %1284 = vmatprep.mubr.msk.f32.mxu1 %vm95_vm0, %v73_v38  ;;  %v714_v36 = vld [vmem:[%s2362_s0 + $0x148] sm:$0xff]  ;;  %v1690_v37 = vadd.f32 %v1635_v12, %v747_v17  ;;  %v1693_v38 = vadd.f32 %v1635_v12, %v779_v18 }
  0x29   :  { %1237 = vmatmul.mubr.msk.f32.gmra.mrb[18].mxu0 %vm95_vm0, %v42_v39  ;;  %1285 = vmatmul.mubr.msk.f32.gmra.mrb[18].mxu1 %vm95_vm0, %v74_v40  ;;  %v751_v39 = vmul.f32 %v1607_v2, %v680_v23  ;;  %v783_v40 = vmul.f32 %v1607_v2, %v712_v24 }
  0x2a   :  { %1239 = vmatprep.mubr.msk.f32.mxu0 %vm95_vm0, %v43_v41  ;;  %1287 = vmatprep.mubr.msk.f32.mxu1 %vm95_vm0, %v75_v42  ;;  %v681_v41 = vld [vmem:[%s2362_s0 + $0x40] sm:$0xff] }
  0x2b   :  { %v713_v42 = vld [vmem:[%s2362_s0 + $0x140] sm:$0xff] }
  0x2d   :  { %1240 = vmatmul.mubr.msk.f32.gmra.mrb[20].mxu0 %vm95_vm0, %v44_v43  ;;  %1288 = vmatmul.mubr.msk.f32.gmra.mrb[20].mxu1 %vm95_vm0, %v76_v44  ;;  %v1704_v43 = vadd.f32 %v1635_v12, %v746_v21  ;;  %v1707_v44 = vadd.f32 %v1635_v12, %v778_v22  ;;  %v690_v21 = vld [vmem:[%s2362_s0 + $0x88] sm:$0xff] }
  0x2e   :  { %1242 = vmatprep.mubr.msk.f32.mxu0 %vm95_vm0, %v45_v45  ;;  %1290 = vmatprep.mubr.msk.f32.mxu1 %vm95_vm0, %v77_v46  ;;  %v750_v45 = vmul.f32 %v1607_v2, %v679_v29  ;;  %v782_v46 = vmul.f32 %v1607_v2, %v711_v30  ;;  %v722_v22 = vld [vmem:[%s2362_s0 + $0x188] sm:$0xff]  ;;  %v689_v29 = vld [vmem:[%s2362_s0 + $0x80] sm:$0xff] }
  0x2f   :  { %v721_v30 = vld [vmem:[%s2362_s0 + $0x180] sm:$0xff] }
  0x30   :  { %v1760_v4 = vadd.f32 %v1635_v12, %v750_v45  ;;  %v1763_v5 = vadd.f32 %v1635_v12, %v782_v46  ;;  %v793_v45 = vmul.f32 %v1607_v2, %v722_v22 }
  0x31   :  { %1243 = vmatmul.mubr.msk.f32.gmra.mrb[22].mxu0 %vm95_vm0, %v46_v47  ;;  %1291 = vmatmul.mubr.msk.f32.gmra.mrb[22].mxu1 %vm95_vm0, %v78_v48  ;;  %v684_v47 = vld [vmem:[%s2362_s0 + $0x58] sm:$0xff] }
  0x32   :  { %1245 = vmatprep.mubr.msk.f32.mxu0 %vm95_vm0, %v47_v49  ;;  %1293 = vmatprep.mubr.msk.f32.mxu1 %vm95_vm0, %v79_v50  ;;  %v716_v48 = vld [vmem:[%s2362_s0 + $0x158] sm:$0xff]  ;;  %v1718_v49 = vadd.f32 %v1635_v12, %v749_v27  ;;  %v1721_v50 = vadd.f32 %v1635_v12, %v781_v28  ;;  %v759_v27 = vmul.f32 %v1607_v2, %v688_v8 }
  0x33   :  { %v791_v28 = vmul.f32 %v1607_v2, %v720_v9 }
  0x35   :  { %1246 = vmatmul.mubr.msk.f32.gmra.mrb[24].mxu0 %vm95_vm0, %v48_v51  ;;  %1294 = vmatmul.mubr.msk.f32.gmra.mrb[24].mxu1 %vm95_vm0, %v80_v52  ;;  %v753_v51 = vmul.f32 %v1607_v2, %v682_v35  ;;  %v785_v52 = vmul.f32 %v1607_v2, %v714_v36  ;;  %v758_v36 = vmul.f32 %v1607_v2, %v687_v15 }
  0x36   :  { %1248 = vmatprep.mubr.msk.f32.mxu0 %vm95_vm0, %v49_v53  ;;  %1296 = vmatprep.mubr.msk.f32.mxu1 %vm95_vm0, %v81_v54  ;;  %v683_v53 = vld [vmem:[%s2362_s0 + $0x50] sm:$0xff] }
  0x37   :  { %v715_v54 = vld [vmem:[%s2362_s0 + $0x150] sm:$0xff]  ;;  %v754_v6 = vmul.f32 %v1607_v2, %v683_v53  ;;  %v1774_v10 = vadd.f32 %v1635_v12, %v753_v51  ;;  %v1777_v11 = vadd.f32 %v1635_v12, %v785_v52  ;;  %v1840_v51 = vadd.f32 %v1635_v12, %v788_v20 }
  0x38   :  { %v786_v7 = vmul.f32 %v1607_v2, %v715_v54  ;;  %v760_v52 = vmul.f32 %v1607_v2, %v689_v29  ;;  %v792_v53 = vmul.f32 %v1607_v2, %v721_v30  ;;  %v1855_v3 = vadd.f32 %v1635_v12, %v758_v36  ;;  %v691_v30 = vld [vmem:[%s2362_s0 + $0x90] sm:$0xff] }
  0x39   :  { %1249 = vmatmul.mubr.msk.f32.gmra.mrb[26].mxu0 %vm95_vm0, %v50_v55  ;;  %1297 = vmatmul.mubr.msk.f32.gmra.mrb[26].mxu1 %vm95_vm0, %v82_v56  ;;  %v1732_v55 = vadd.f32 %v1635_v12, %v748_v33  ;;  %v1735_v56 = vadd.f32 %v1635_v12, %v780_v34  ;;  %v1818_v33 = vld [vmem:[%s2365_s3] ss:$0 sm:$0xff]  ;;  %v1821_v34 = vadd.f32 %v1635_v12, %v754_v6  ;;  %v723_v36 = vld [vmem:[%s2362_s0 + $0x190] sm:$0xff] }
  0x3a   :  { %1251 = vmatprep.mubr.msk.f32.mxu0 %vm95_vm0, %v51_v57  ;;  %1299 = vmatprep.mubr.msk.f32.mxu1 %vm95_vm0, %v83_v58  ;;  %v752_v57 = vmul.f32 %v1607_v2, %v681_v41  ;;  %v784_v58 = vmul.f32 %v1607_v2, %v713_v42  ;;  %v1824_v35 = vadd.f32 %v1635_v12, %v786_v7 }
  0x3b   :  { %v761_v42 = vmul.f32 %v1607_v2, %v690_v21  ;;  %v1871_v20 = vadd.f32 %v1635_v12, %v760_v52  ;;  %v1874_v21 = vadd.f32 %v1635_v12, %v792_v53 }
  0x3c   :  { %v1788_v17 = vadd.f32 %v1635_v12, %v752_v57  ;;  %v1791_v18 = vadd.f32 %v1635_v12, %v784_v58 }
  0x3d   :  { %1252 = vmatmul.mubr.msk.f32.gmra.mrb[28].mxu0 %vm95_vm0, %v52_v59  ;;  %1300 = vmatmul.mubr.msk.f32.gmra.mrb[28].mxu1 %vm95_vm0, %v84_v60  ;;  %v686_v59 = vld [vmem:[%s2362_s0 + $0x68] sm:$0xff]  ;;  %v1863_v9 = vadd.f32 %v1635_v12, %v761_v42 }
  0x3e   :  { %1254 = vmatprep.mubr.msk.f32.mxu0 %vm95_vm0, %v53_v61  ;;  %1302 = vmatprep.mubr.msk.f32.mxu1 %vm95_vm0, %v85_v62  ;;  %v718_v60 = vld [vmem:[%s2362_s0 + $0x168] sm:$0xff]  ;;  %v1746_v61 = vadd.f32 %v1635_v12, %v751_v39  ;;  %v1749_v62 = vadd.f32 %v1635_v12, %v783_v40  ;;  %v757_v13 = vmul.f32 %v1607_v2, %v686_v59 }
  0x3f   :  { %v789_v14 = vmul.f32 %v1607_v2, %v718_v60  ;;  %v790_v39 = vmul.f32 %v1607_v2, %v719_v16  ;;  %v1847_v60 = vadd.f32 %v1635_v12, %v759_v27 }
  0x40   :  { %v1829_v40 = vadd.f32 %v1635_v12, %v757_v13  ;;  %v1866_v13 = vadd.f32 %v1635_v12, %v793_v45 }
  0x41   :  { %1255 = vmatmul.mubr.msk.f32.gmra.mrb[30].mxu0 %vm95_vm0, %v54_v63  ;;  %1303 = vmatmul.mubr.msk.f32.gmra.mrb[30].mxu1 %vm95_vm0, %v86_v0  ;;  %v755_v63 = vmul.f32 %v1607_v2, %v684_v47  ;;  %v787_v0 = vmul.f32 %v1607_v2, %v716_v48  ;;  %v1832_v41 = vadd.f32 %v1635_v12, %v789_v14 }
  0x42   :  { %v1837_v48 = vadd.f32 %v1635_v12, %v756_v19  ;;  %v1858_v6 = vadd.f32 %v1635_v12, %v790_v39 }
  0x43   :  { %v1802_v23 = vadd.f32 %v1635_v12, %v755_v63  ;;  %v1805_v24 = vadd.f32 %v1635_v12, %v787_v0  ;;  %v1850_v63 = vadd.f32 %v1635_v12, %v791_v28 }
  0xd8   :  { %v1211_v46 = vpop.f32.mrb[0].mxu0  ;;  %v1259_v47 = vpop.f32.mrb[0].mxu1 }
  0xd9   :  { %v360_v54 = vadd.f32 %v1211_v46, %v1818_v33  ;;  %v520_v57 = vadd.f32 %v1259_v47, %v1818_v33  ;;  %v354_v58 = vpop.f32.mrb[1].mxu0  ;;  %v514_v59 = vpop.f32.mrb[1].mxu1 }
  0xda   :  { %v355_v0 = vadd.f32 %v1818_v33, %v354_v58  ;;  %v515_v1 = vadd.f32 %v1818_v33, %v514_v59 }
  0xdb   :  { %v880_v7 = vadd.f32 %v1662_v25, %v360_v54  ;;  %v912_v8 = vadd.f32 %v1665_v26, %v520_v57  ;;  %v692_v25 = vld [vmem:[%s2362_s0 + $0x98] sm:$0xff] }
  0xdc   :  { %v879_v14 = vadd.f32 %v1676_v31, %v355_v0  ;;  %v911_v15 = vadd.f32 %v1679_v32, %v515_v1  ;;  %v1214_v16 = vpop.f32.mrb[2].mxu0  ;;  %v1262_v19 = vpop.f32.mrb[2].mxu1  ;;  %v724_v26 = vld [vmem:[%s2362_s0 + $0x198] sm:$0xff]  ;;  %v763_v53 = vmul.f32 %v1607_v2, %v692_v25  ;;  %v794_v0 = vmul.f32 %v1607_v2, %v723_v36  ;;  %v694_v36 = vld [vmem:[%s2362_s0 + $0xa8] sm:$0xff] }
  0xdd   :  { %v944_v22 = vmax.f32 %v880_v7, 0.0  ;;  %v976_v31 = vmax.f32 %v912_v8, 0.0  ;;  %v370_v32 = vadd.f32 %v1214_v16, %v1818_v33  ;;  %v530_v27 = vadd.f32 %v1262_v19, %v1818_v33  ;;  %v364_v28 = vpop.f32.mrb[3].mxu0  ;;  %v524_v29 = vpop.f32.mrb[3].mxu1 }
  0xde   :  { %v943_v39 = vmax.f32 %v879_v14, 0.0  ;;  %v975_v42 = vmax.f32 %v911_v15, 0.0  ;;  %v365_v45 = vadd.f32 %v1818_v33, %v364_v28  ;;  %v525_v46 = vadd.f32 %v1818_v33, %v524_v29 }
  0xdf   :  { %1008 = vst [vmem:[%s2366_s6 + $0x8] sm:$0xff] %v944_v22  ;;  %1040 = vst [vmem:[%s2366_s6 + $0x108] sm:$0xff] %v976_v31  ;;  %v882_v47 = vadd.f32 %v1690_v37, %v370_v32  ;;  %v914_v52 = vadd.f32 %v1693_v38, %v530_v27  ;;  %v795_v54 = vmul.f32 %v1607_v2, %v724_v26 }
  0xe0   :  { %1007 = vst [vmem:[%s2366_s6] sm:$0xff] %v943_v39  ;;  %1039 = vst [vmem:[%s2366_s6 + $0x100] sm:$0xff] %v975_v42  ;;  %v881_v57 = vadd.f32 %v1704_v43, %v365_v45  ;;  %v913_v58 = vadd.f32 %v1707_v44, %v525_v46  ;;  %v1217_v59 = vpop.f32.mrb[4].mxu0  ;;  %v1265_v37 = vpop.f32.mrb[4].mxu1  ;;  %v762_v38 = vmul.f32 %v1607_v2, %v691_v30  ;;  %v726_v39 = vld [vmem:[%s2362_s0 + $0x1a8] sm:$0xff] }
  0xe1   :  { %v946_v1 = vmax.f32 %v882_v47, 0.0  ;;  %v978_v7 = vmax.f32 %v914_v52, 0.0  ;;  %v380_v8 = vadd.f32 %v1217_v59, %v1818_v33  ;;  %v540_v14 = vadd.f32 %v1265_v37, %v1818_v33  ;;  %v374_v15 = vpop.f32.mrb[5].mxu0  ;;  %v534_v16 = vpop.f32.mrb[5].mxu1  ;;  %v693_v52 = vld [vmem:[%s2362_s0 + $0xa0] sm:$0xff] }
  0xe2   :  { %v945_v19 = vmax.f32 %v881_v57, 0.0  ;;  %v977_v25 = vmax.f32 %v913_v58, 0.0  ;;  %v375_v43 = vadd.f32 %v1818_v33, %v374_v15  ;;  %v535_v44 = vadd.f32 %v1818_v33, %v534_v16 }
  0xe3   :  { %1010 = vst [vmem:[%s2366_s6 + $0x18] sm:$0xff] %v946_v1  ;;  %1042 = vst [vmem:[%s2366_s6 + $0x118] sm:$0xff] %v978_v7  ;;  %v884_v26 = vadd.f32 %v1718_v49, %v380_v8  ;;  %v916_v22 = vadd.f32 %v1721_v50, %v540_v14  ;;  %v1925_v31 = vadd.f32 %v1635_v12, %v763_v53  ;;  %v725_v53 = vld [vmem:[%s2362_s0 + $0x1a0] sm:$0xff] }
  0xe4   :  { %v1928_v32 = vadd.f32 %v1635_v12, %v795_v54  ;;  %1009 = vst [vmem:[%s2366_s6 + $0x10] sm:$0xff] %v945_v19  ;;  %1041 = vst [vmem:[%s2366_s6 + $0x110] sm:$0xff] %v977_v25  ;;  %v883_v27 = vadd.f32 %v1732_v55, %v375_v43  ;;  %v915_v49 = vadd.f32 %v1735_v56, %v535_v44  ;;  %v1220_v28 = vpop.f32.mrb[6].mxu0  ;;  %v1268_v50 = vpop.f32.mrb[6].mxu1 }
  0xe5   :  { %v1939_v29 = vadd.f32 %v1635_v12, %v762_v38  ;;  %v1942_v30 = vadd.f32 %v1635_v12, %v794_v0  ;;  %v948_v42 = vmax.f32 %v884_v26, 0.0  ;;  %v980_v55 = vmax.f32 %v916_v22, 0.0  ;;  %v384_v46 = vpop.f32.mrb[7].mxu0  ;;  %v544_v47 = vpop.f32.mrb[7].mxu1 }
  0xe6   :  { %v390_v56 = vadd.f32 %v1220_v28, %v1818_v33  ;;  %v550_v45 = vadd.f32 %v1268_v50, %v1818_v33  ;;  %v947_v54 = vmax.f32 %v883_v27, 0.0  ;;  %v979_v57 = vmax.f32 %v915_v49, 0.0 }
  0xe7   :  { %v385_v58 = vadd.f32 %v1818_v33, %v384_v46  ;;  %v545_v59 = vadd.f32 %v1818_v33, %v544_v47  ;;  %1012 = vst [vmem:[%s2366_s6 + $0x28] sm:$0xff] %v948_v42  ;;  %1044 = vst [vmem:[%s2366_s6 + $0x128] sm:$0xff] %v980_v55  ;;  %v765_v0 = vmul.f32 %v1607_v2, %v694_v36  ;;  %v728_v46 = vld [vmem:[%s2362_s0 + $0x1b8] sm:$0xff] }
  0xe8   :  { %v886_v37 = vadd.f32 %v1746_v61, %v390_v56  ;;  %v918_v38 = vadd.f32 %v1749_v62, %v550_v45  ;;  %v797_v1 = vmul.f32 %v1607_v2, %v726_v39  ;;  %1011 = vst [vmem:[%s2366_s6 + $0x20] sm:$0xff] %v947_v54  ;;  %1043 = vst [vmem:[%s2366_s6 + $0x120] sm:$0xff] %v979_v57  ;;  %v1223_v14 = vpop.f32.mrb[8].mxu0  ;;  %v1271_v61 = vpop.f32.mrb[8].mxu1  ;;  %v696_v45 = vld [vmem:[%s2362_s0 + $0xb8] sm:$0xff]  ;;  %v695_v57 = vld [vmem:[%s2362_s0 + $0xb0] sm:$0xff] }
  0xe9   :  { %v885_v7 = vadd.f32 %v1760_v4, %v385_v58  ;;  %v917_v8 = vadd.f32 %v1763_v5, %v545_v59  ;;  %v764_v62 = vmul.f32 %v1607_v2, %v693_v52  ;;  %v796_v15 = vmul.f32 %v1607_v2, %v725_v53  ;;  %v394_v44 = vpop.f32.mrb[9].mxu0  ;;  %v554_v26 = vpop.f32.mrb[9].mxu1  ;;  %v727_v58 = vld [vmem:[%s2362_s0 + $0x1b0] sm:$0xff] }
  0xea   :  { %v950_v16 = vmax.f32 %v886_v37, 0.0  ;;  %v982_v19 = vmax.f32 %v918_v38, 0.0  ;;  %v400_v25 = vadd.f32 %v1223_v14, %v1818_v33  ;;  %v560_v43 = vadd.f32 %v1271_v61, %v1818_v33 }
  0xeb   :  { %v949_v22 = vmax.f32 %v885_v7, 0.0  ;;  %v981_v27 = vmax.f32 %v917_v8, 0.0  ;;  %v395_v4 = vadd.f32 %v1818_v33, %v394_v44  ;;  %v555_v5 = vadd.f32 %v1818_v33, %v554_v26 }
  0xec   :  { %1014 = vst [vmem:[%s2366_s6 + $0x38] sm:$0xff] %v950_v16  ;;  %1046 = vst [vmem:[%s2366_s6 + $0x138] sm:$0xff] %v982_v19  ;;  %v888_v49 = vadd.f32 %v1774_v10, %v400_v25  ;;  %v920_v28 = vadd.f32 %v1777_v11, %v560_v43  ;;  %v1993_v50 = vadd.f32 %v1635_v12, %v765_v0  ;;  %v1226_v42 = vpop.f32.mrb[10].mxu0  ;;  %v1274_v11 = vpop.f32.mrb[10].mxu1 }
  0xed   :  { %v1996_v36 = vadd.f32 %v1635_v12, %v797_v1  ;;  %1013 = vst [vmem:[%s2366_s6 + $0x30] sm:$0xff] %v949_v22  ;;  %1045 = vst [vmem:[%s2366_s6 + $0x130] sm:$0xff] %v981_v27  ;;  %v887_v39 = vadd.f32 %v1788_v17, %v395_v4  ;;  %v919_v10 = vadd.f32 %v1791_v18, %v555_v5  ;;  %v404_v53 = vpop.f32.mrb[11].mxu0  ;;  %v564_v54 = vpop.f32.mrb[11].mxu1 }
  0xee   :  { %v2007_v55 = vadd.f32 %v1635_v12, %v764_v62  ;;  %v2010_v56 = vadd.f32 %v1635_v12, %v796_v15  ;;  %v952_v47 = vmax.f32 %v888_v49, 0.0  ;;  %v984_v17 = vmax.f32 %v920_v28, 0.0 }
  0xef   :  { %v410_v18 = vadd.f32 %v1226_v42, %v1818_v33  ;;  %v570_v52 = vadd.f32 %v1274_v11, %v1818_v33  ;;  %v951_v59 = vmax.f32 %v887_v39, 0.0  ;;  %v983_v37 = vmax.f32 %v919_v10, 0.0 }
  0xf0   :  { %v405_v38 = vadd.f32 %v1818_v33, %v404_v53  ;;  %v565_v0 = vadd.f32 %v1818_v33, %v564_v54  ;;  %1016 = vst [vmem:[%s2366_s6 + $0x48] sm:$0xff] %v952_v47  ;;  %1048 = vst [vmem:[%s2366_s6 + $0x148] sm:$0xff] %v984_v17  ;;  %v767_v8 = vmul.f32 %v1607_v2, %v696_v45  ;;  %v1229_v15 = vpop.f32.mrb[12].mxu0  ;;  %v730_v47 = vld [vmem:[%s2362_s0 + $0x1c8] sm:$0xff]  ;;  %v697_v54 = vld [vmem:[%s2362_s0 + $0xc0] sm:$0xff] }
  0xf1   :  { %v890_v1 = vadd.f32 %v1802_v23, %v410_v18  ;;  %v922_v7 = vadd.f32 %v1805_v24, %v570_v52  ;;  %v799_v14 = vmul.f32 %v1607_v2, %v728_v46  ;;  %1015 = vst [vmem:[%s2366_s6 + $0x40] sm:$0xff] %v951_v59  ;;  %1047 = vst [vmem:[%s2366_s6 + $0x140] sm:$0xff] %v983_v37  ;;  %v1277_v23 = vpop.f32.mrb[12].mxu1  ;;  %v414_v26 = vpop.f32.mrb[13].mxu0  ;;  %v698_v46 = vld [vmem:[%s2362_s0 + $0xc8] sm:$0xff] }
  0xf2   :  { %v889_v61 = vadd.f32 %v1821_v34, %v405_v38  ;;  %v921_v62 = vadd.f32 %v1824_v35, %v565_v0  ;;  %v766_v24 = vmul.f32 %v1607_v2, %v695_v57  ;;  %v798_v16 = vmul.f32 %v1607_v2, %v727_v58  ;;  %v574_v22 = vpop.f32.mrb[13].mxu1  ;;  %v729_v57 = vld [vmem:[%s2362_s0 + $0x1c0] sm:$0xff] }
  0xf3   :  { %v954_v19 = vmax.f32 %v890_v1, 0.0  ;;  %v986_v25 = vmax.f32 %v922_v7, 0.0  ;;  %v420_v43 = vadd.f32 %v1229_v15, %v1818_v33  ;;  %v580_v44 = vadd.f32 %v1277_v23, %v1818_v33 }
  0xf4   :  { %v953_v27 = vmax.f32 %v889_v61, 0.0  ;;  %v985_v4 = vmax.f32 %v921_v62, 0.0  ;;  %v415_v34 = vadd.f32 %v1818_v33, %v414_v26  ;;  %v575_v35 = vadd.f32 %v1818_v33, %v574_v22  ;;  %v1232_v42 = vpop.f32.mrb[14].mxu0 }
  0xf5   :  { %1018 = vst [vmem:[%s2366_s6 + $0x58] sm:$0xff] %v954_v19  ;;  %1050 = vst [vmem:[%s2366_s6 + $0x158] sm:$0xff] %v986_v25  ;;  %v892_v5 = vadd.f32 %v1829_v40, %v420_v43  ;;  %v924_v49 = vadd.f32 %v1832_v41, %v580_v44  ;;  %v2061_v28 = vadd.f32 %v1635_v12, %v767_v8  ;;  %v1280_v41 = vpop.f32.mrb[14].mxu1  ;;  %v424_v52 = vpop.f32.mrb[15].mxu0 }
  0xf6   :  { %v2064_v39 = vadd.f32 %v1635_v12, %v799_v14  ;;  %1017 = vst [vmem:[%s2366_s6 + $0x50] sm:$0xff] %v953_v27  ;;  %1049 = vst [vmem:[%s2366_s6 + $0x150] sm:$0xff] %v985_v4  ;;  %v891_v10 = vadd.f32 %v1837_v48, %v415_v34  ;;  %v923_v40 = vadd.f32 %v1840_v51, %v575_v35  ;;  %v584_v53 = vpop.f32.mrb[15].mxu1 }
  0xf7   :  { %v2075_v11 = vadd.f32 %v1635_v12, %v766_v24  ;;  %v2078_v45 = vadd.f32 %v1635_v12, %v798_v16  ;;  %v956_v17 = vmax.f32 %v892_v5, 0.0  ;;  %v988_v48 = vmax.f32 %v924_v49, 0.0 }
  0xf8   :  { %v430_v51 = vadd.f32 %v1232_v42, %v1818_v33  ;;  %v590_v18 = vadd.f32 %v1280_v41, %v1818_v33  ;;  %v955_v58 = vmax.f32 %v891_v10, 0.0  ;;  %v987_v59 = vmax.f32 %v923_v40, 0.0  ;;  %v1235_v62 = vpop.f32.mrb[16].mxu0  ;;  %v700_v40 = vld [vmem:[%s2362_s0 + $0xd8] sm:$0xff] }
  0xf9   :  { %v425_v37 = vadd.f32 %v1818_v33, %v424_v52  ;;  %v585_v38 = vadd.f32 %v1818_v33, %v584_v53  ;;  %1020 = vst [vmem:[%s2366_s6 + $0x68] sm:$0xff] %v956_v17  ;;  %1052 = vst [vmem:[%s2366_s6 + $0x168] sm:$0xff] %v988_v48  ;;  %v769_v7 = vmul.f32 %v1607_v2, %v698_v46  ;;  %v434_v25 = vpop.f32.mrb[17].mxu0  ;;  %v732_v42 = vld [vmem:[%s2362_s0 + $0x1d8] sm:$0xff]  ;;  %v699_v48 = vld [vmem:[%s2362_s0 + $0xd0] sm:$0xff] }
  0xfa   :  { %v894_v0 = vadd.f32 %v1847_v60, %v430_v51  ;;  %v926_v1 = vadd.f32 %v1850_v63, %v590_v18  ;;  %v801_v8 = vmul.f32 %v1607_v2, %v730_v47  ;;  %1019 = vst [vmem:[%s2366_s6 + $0x60] sm:$0xff] %v955_v58  ;;  %1051 = vst [vmem:[%s2366_s6 + $0x160] sm:$0xff] %v987_v59  ;;  %v1283_v60 = vpop.f32.mrb[16].mxu1  ;;  %v731_v51 = vld [vmem:[%s2362_s0 + $0x1d0] sm:$0xff] }
  0xfb   :  { %v893_v14 = vadd.f32 %v1855_v3, %v425_v37  ;;  %v925_v61 = vadd.f32 %v1858_v6, %v585_v38  ;;  %v768_v63 = vmul.f32 %v1607_v2, %v697_v54  ;;  %v800_v15 = vmul.f32 %v1607_v2, %v729_v57  ;;  %v594_v43 = vpop.f32.mrb[17].mxu1 }
  0xfc   :  { %v958_v23 = vmax.f32 %v894_v0, 0.0  ;;  %v990_v24 = vmax.f32 %v926_v1, 0.0  ;;  %v440_v16 = vadd.f32 %v1235_v62, %v1818_v33  ;;  %v600_v19 = vadd.f32 %v1283_v60, %v1818_v33  ;;  %v1238_v5 = vpop.f32.mrb[18].mxu0 }
  0xfd   :  { %v957_v44 = vmax.f32 %v893_v14, 0.0  ;;  %v989_v26 = vmax.f32 %v925_v61, 0.0  ;;  %v435_v3 = vadd.f32 %v1818_v33, %v434_v25  ;;  %v595_v6 = vadd.f32 %v1818_v33, %v594_v43  ;;  %v444_v47 = vpop.f32.mrb[19].mxu0 }
  0xfe   :  { %1022 = vst [vmem:[%s2366_s6 + $0x78] sm:$0xff] %v958_v23  ;;  %1054 = vst [vmem:[%s2366_s6 + $0x178] sm:$0xff] %v990_v24  ;;  %v896_v22 = vadd.f32 %v1863_v9, %v440_v16  ;;  %v928_v27 = vadd.f32 %v1866_v13, %v600_v19  ;;  %v2129_v4 = vadd.f32 %v1635_v12, %v769_v7  ;;  %v1286_v13 = vpop.f32.mrb[18].mxu1 }
  0xff   :  { %v2132_v34 = vadd.f32 %v1635_v12, %v801_v8  ;;  %1021 = vst [vmem:[%s2366_s6 + $0x70] sm:$0xff] %v957_v44  ;;  %1053 = vst [vmem:[%s2366_s6 + $0x170] sm:$0xff] %v989_v26  ;;  %v895_v35 = vadd.f32 %v1871_v20, %v435_v3  ;;  %v927_v9 = vadd.f32 %v1874_v21, %v595_v6  ;;  %v604_v17 = vpop.f32.mrb[19].mxu1  ;;  %v702_v6 = vld [vmem:[%s2362_s0 + $0xe8] sm:$0xff] }
 0x100   :  { %v2143_v49 = vadd.f32 %v1635_v12, %v768_v63  ;;  %v2146_v10 = vadd.f32 %v1635_v12, %v800_v15  ;;  %v960_v41 = vmax.f32 %v896_v22, 0.0  ;;  %v992_v20 = vmax.f32 %v928_v27, 0.0  ;;  %v1241_v1 = vpop.f32.mrb[20].mxu0  ;;  %v734_v22 = vld [vmem:[%s2362_s0 + $0x1e8] sm:$0xff] }
 0x101   :  { %v450_v21 = vadd.f32 %v1238_v5, %v1818_v33  ;;  %v610_v46 = vadd.f32 %v1286_v13, %v1818_v33  ;;  %v959_v18 = vmax.f32 %v895_v35, 0.0  ;;  %v991_v52 = vmax.f32 %v927_v9, 0.0  ;;  %v454_v60 = vpop.f32.mrb[21].mxu0  ;;  %v701_v13 = vld [vmem:[%s2362_s0 + $0xe0] sm:$0xff] }
 0x102   :  { %v445_v53 = vadd.f32 %v1818_v33, %v444_v47  ;;  %v605_v54 = vadd.f32 %v1818_v33, %v604_v17  ;;  %1024 = vst [vmem:[%s2366_s6 + $0x88] sm:$0xff] %v960_v41  ;;  %1056 = vst [vmem:[%s2366_s6 + $0x188] sm:$0xff] %v992_v20  ;;  %v771_v59 = vmul.f32 %v1607_v2, %v700_v40  ;;  %v733_v40 = vld [vmem:[%s2362_s0 + $0x1e0] sm:$0xff] }
 0x103   :  { %v898_v57 = vadd.f32 %v1925_v31, %v450_v21  ;;  %v930_v58 = vadd.f32 %v1928_v32, %v610_v46  ;;  %v803_v37 = vmul.f32 %v1607_v2, %v732_v42  ;;  %1023 = vst [vmem:[%s2366_s6 + $0x80] sm:$0xff] %v959_v18  ;;  %1055 = vst [vmem:[%s2366_s6 + $0x180] sm:$0xff] %v991_v52  ;;  %v1289_v31 = vpop.f32.mrb[20].mxu1 }
 0x104   :  { %v897_v38 = vadd.f32 %v1939_v29, %v445_v53  ;;  %v929_v0 = vadd.f32 %v1942_v30, %v605_v54  ;;  %v770_v32 = vmul.f32 %v1607_v2, %v699_v48  ;;  %v802_v7 = vmul.f32 %v1607_v2, %v731_v51  ;;  %v614_v63 = vpop.f32.mrb[21].mxu1  ;;  %v1244_v44 = vpop.f32.mrb[22].mxu0 }
 0x105   :  { %v962_v8 = vmax.f32 %v898_v57, 0.0  ;;  %v994_v14 = vmax.f32 %v930_v58, 0.0  ;;  %v460_v61 = vadd.f32 %v1241_v1, %v1818_v33  ;;  %v620_v62 = vadd.f32 %v1289_v31, %v1818_v33  ;;  %v464_v9 = vpop.f32.mrb[23].mxu0 }
 0x106   :  { %v961_v15 = vmax.f32 %v897_v38, 0.0  ;;  %v993_v23 = vmax.f32 %v929_v0, 0.0  ;;  %v455_v29 = vadd.f32 %v1818_v33, %v454_v60  ;;  %v615_v30 = vadd.f32 %v1818_v33, %v614_v63  ;;  %v704_v63 = vld [vmem:[%s2362_s0 + $0xf8] sm:$0xff] }
 0x107   :  { %1026 = vst [vmem:[%s2366_s6 + $0x98] sm:$0xff] %v962_v8  ;;  %1058 = vst [vmem:[%s2366_s6 + $0x198] sm:$0xff] %v994_v14  ;;  %v900_v24 = vadd.f32 %v1993_v50, %v460_v61  ;;  %v932_v16 = vadd.f32 %v1996_v36, %v620_v62  ;;  %v2197_v19 = vadd.f32 %v1635_v12, %v771_v59  ;;  %v1292_v36 = vpop.f32.mrb[22].mxu1 }
 0x108   :  { %v2200_v25 = vadd.f32 %v1635_v12, %v803_v37  ;;  %1025 = vst [vmem:[%s2366_s6 + $0x90] sm:$0xff] %v961_v15  ;;  %1057 = vst [vmem:[%s2366_s6 + $0x190] sm:$0xff] %v993_v23  ;;  %v899_v43 = vadd.f32 %v2007_v55, %v455_v29  ;;  %v931_v50 = vadd.f32 %v2010_v56, %v615_v30  ;;  %v624_v5 = vpop.f32.mrb[23].mxu1  ;;  %v1247_v52 = vpop.f32.mrb[24].mxu0  ;;  %v736_v15 = vld [vmem:[%s2362_s0 + $0x1f8] sm:$0xff] }
 0x109   :  { %v2211_v26 = vadd.f32 %v1635_v12, %v770_v32  ;;  %v2214_v3 = vadd.f32 %v1635_v12, %v802_v7  ;;  %v964_v27 = vmax.f32 %v900_v24, 0.0  ;;  %v996_v55 = vmax.f32 %v932_v16, 0.0  ;;  %v474_v37 = vpop.f32.mrb[25].mxu0  ;;  %v703_v16 = vld [vmem:[%s2362_s0 + $0xf0] sm:$0xff] }
 0x10a   :  { %v470_v56 = vadd.f32 %v1244_v44, %v1818_v33  ;;  %v630_v35 = vadd.f32 %v1292_v36, %v1818_v33  ;;  %v963_v42 = vmax.f32 %v899_v43, 0.0  ;;  %v995_v41 = vmax.f32 %v931_v50, 0.0  ;;  %v735_v43 = vld [vmem:[%s2362_s0 + $0x1f0] sm:$0xff] }
 0x10b   :  { %v465_v20 = vadd.f32 %v1818_v33, %v464_v9  ;;  %v625_v21 = vadd.f32 %v1818_v33, %v624_v5  ;;  %1028 = vst [vmem:[%s2366_s6 + $0xa8] sm:$0xff] %v964_v27  ;;  %1060 = vst [vmem:[%s2366_s6 + $0x1a8] sm:$0xff] %v996_v55  ;;  %v773_v17 = vmul.f32 %v1607_v2, %v702_v6 }
 0x10c   :  { %v902_v46 = vadd.f32 %v2061_v28, %v470_v56  ;;  %v934_v47 = vadd.f32 %v2064_v39, %v630_v35  ;;  %v805_v48 = vmul.f32 %v1607_v2, %v734_v22  ;;  %1027 = vst [vmem:[%s2366_s6 + $0xa0] sm:$0xff] %v963_v42  ;;  %1059 = vst [vmem:[%s2366_s6 + $0x1a0] sm:$0xff] %v995_v41  ;;  %v1295_v28 = vpop.f32.mrb[24].mxu1  ;;  %v1250_v62 = vpop.f32.mrb[26].mxu0 }
 0x10d   :  { %v901_v51 = vadd.f32 %v2075_v11, %v465_v20  ;;  %v933_v18 = vadd.f32 %v2078_v45, %v625_v21  ;;  %v772_v39 = vmul.f32 %v1607_v2, %v701_v13  ;;  %v804_v53 = vmul.f32 %v1607_v2, %v733_v40  ;;  %v634_v38 = vpop.f32.mrb[25].mxu1  ;;  %v484_v30 = vpop.f32.mrb[27].mxu0 }
 0x10e   :  { %v966_v54 = vmax.f32 %v902_v46, 0.0  ;;  %v998_v57 = vmax.f32 %v934_v47, 0.0  ;;  %v480_v58 = vadd.f32 %v1247_v52, %v1818_v33  ;;  %v640_v59 = vadd.f32 %v1295_v28, %v1818_v33 }
 0x10f   :  { %v965_v0 = vmax.f32 %v901_v51, 0.0  ;;  %v997_v1 = vmax.f32 %v933_v18, 0.0  ;;  %v475_v11 = vadd.f32 %v1818_v33, %v474_v37  ;;  %v635_v45 = vadd.f32 %v1818_v33, %v634_v38 }
 0x110   :  { %1030 = vst [vmem:[%s2366_s6 + $0xb8] sm:$0xff] %v966_v54  ;;  %1062 = vst [vmem:[%s2366_s6 + $0x1b8] sm:$0xff] %v998_v57  ;;  %v904_v31 = vadd.f32 %v2129_v4, %v480_v58  ;;  %v936_v32 = vadd.f32 %v2132_v34, %v640_v59  ;;  %v844_v7 = vadd.f32 %v1635_v12, %v773_v17  ;;  %v1298_v4 = vpop.f32.mrb[26].mxu1  ;;  %v1253_v5 = vpop.f32.mrb[28].mxu0 }
 0x111   :  { %v876_v8 = vadd.f32 %v1635_v12, %v805_v48  ;;  %1029 = vst [vmem:[%s2366_s6 + $0xb0] sm:$0xff] %v965_v0  ;;  %1061 = vst [vmem:[%s2366_s6 + $0x1b0] sm:$0xff] %v997_v1  ;;  %v903_v14 = vadd.f32 %v2143_v49, %v475_v11  ;;  %v935_v61 = vadd.f32 %v2146_v10, %v635_v45  ;;  %v644_v24 = vpop.f32.mrb[27].mxu1  ;;  %v494_v21 = vpop.f32.mrb[29].mxu0 }
 0x112   :  { %v843_v34 = vadd.f32 %v1635_v12, %v772_v39  ;;  %v875_v60 = vadd.f32 %v1635_v12, %v804_v53  ;;  %v968_v23 = vmax.f32 %v904_v31, 0.0  ;;  %v1000_v29 = vmax.f32 %v936_v32, 0.0 }
 0x113   :  { %v490_v49 = vadd.f32 %v1250_v62, %v1818_v33  ;;  %v650_v10 = vadd.f32 %v1298_v4, %v1818_v33  ;;  %v967_v50 = vmax.f32 %v903_v14, 0.0  ;;  %v999_v44 = vmax.f32 %v935_v61, 0.0 }
 0x114   :  { %v485_v36 = vadd.f32 %v1818_v33, %v484_v30  ;;  %v645_v6 = vadd.f32 %v1818_v33, %v644_v24  ;;  %1032 = vst [vmem:[%s2366_s6 + $0xc8] sm:$0xff] %v968_v23  ;;  %1064 = vst [vmem:[%s2366_s6 + $0x1c8] sm:$0xff] %v1000_v29  ;;  %v775_v55 = vmul.f32 %v1607_v2, %v704_v63  ;;  %v1256_v39 = vpop.f32.mrb[30].mxu0 }
 0x115   :  { %v906_v22 = vadd.f32 %v2197_v19, %v490_v49  ;;  %v938_v27 = vadd.f32 %v2200_v25, %v650_v10  ;;  %v807_v56 = vmul.f32 %v1607_v2, %v736_v15  ;;  %1031 = vst [vmem:[%s2366_s6 + $0xc0] sm:$0xff] %v967_v50  ;;  %1063 = vst [vmem:[%s2366_s6 + $0x1c0] sm:$0xff] %v999_v44  ;;  %v1301_v19 = vpop.f32.mrb[28].mxu1  ;;  %v504_v0 = vpop.f32.mrb[31].mxu0 }
 0x116   :  { %v905_v35 = vadd.f32 %v2211_v26, %v485_v36  ;;  %v937_v9 = vadd.f32 %v2214_v3, %v645_v6  ;;  %v774_v25 = vmul.f32 %v1607_v2, %v703_v16  ;;  %v806_v13 = vmul.f32 %v1607_v2, %v735_v43  ;;  %v654_v46 = vpop.f32.mrb[29].mxu1 }
 0x117   :  { %v970_v40 = vmax.f32 %v906_v22, 0.0  ;;  %v1002_v42 = vmax.f32 %v938_v27, 0.0  ;;  %v500_v41 = vadd.f32 %v1253_v5, %v1818_v33  ;;  %v660_v20 = vadd.f32 %v1301_v19, %v1818_v33  ;;  %v1304_v53 = vpop.f32.mrb[30].mxu1 }
 0x118   :  { %v969_v47 = vmax.f32 %v905_v35, 0.0  ;;  %v1001_v17 = vmax.f32 %v937_v9, 0.0  ;;  %v495_v26 = vadd.f32 %v1818_v33, %v494_v21  ;;  %v655_v3 = vadd.f32 %v1818_v33, %v654_v46  ;;  %v664_v1 = vpop.f32.mrb[31].mxu1 }
 0x119   :  { %1034 = vst [vmem:[%s2366_s6 + $0xd8] sm:$0xff] %v970_v40  ;;  %1066 = vst [vmem:[%s2366_s6 + $0x1d8] sm:$0xff] %v1002_v42  ;;  %v908_v2 = vadd.f32 %v844_v7, %v500_v41  ;;  %v940_v48 = vadd.f32 %v876_v8, %v660_v20  ;;  %v846_v51 = vadd.f32 %v1635_v12, %v775_v55 }
 0x11a   :  { %v878_v18 = vadd.f32 %v1635_v12, %v807_v56  ;;  %1033 = vst [vmem:[%s2366_s6 + $0xd0] sm:$0xff] %v969_v47  ;;  %1065 = vst [vmem:[%s2366_s6 + $0x1d0] sm:$0xff] %v1001_v17  ;;  %v907_v52 = vadd.f32 %v843_v34, %v495_v26  ;;  %v939_v28 = vadd.f32 %v875_v60, %v655_v3 }
 0x11b   :  { %v845_v54 = vadd.f32 %v1635_v12, %v774_v25  ;;  %v877_v57 = vadd.f32 %v1635_v12, %v806_v13  ;;  %v972_v58 = vmax.f32 %v908_v2, 0.0  ;;  %v1004_v59 = vmax.f32 %v940_v48, 0.0 }
 0x11c   :  { %v510_v37 = vadd.f32 %v1256_v39, %v1818_v33  ;;  %v670_v38 = vadd.f32 %v1304_v53, %v1818_v33  ;;  %v971_v11 = vmax.f32 %v907_v52, 0.0  ;;  %v1003_v45 = vmax.f32 %v939_v28, 0.0 }
 0x11d   :  { %v505_v31 = vadd.f32 %v1818_v33, %v504_v0  ;;  %v665_v32 = vadd.f32 %v1818_v33, %v664_v1  ;;  %1036 = vst [vmem:[%s2366_s6 + $0xe8] sm:$0xff] %v972_v58  ;;  %1068 = vst [vmem:[%s2366_s6 + $0x1e8] sm:$0xff] %v1004_v59 }
 0x11e   :  { %v910_v12 = vadd.f32 %v846_v51, %v510_v37  ;;  %v942_v7 = vadd.f32 %v878_v18, %v670_v38  ;;  %1035 = vst [vmem:[%s2366_s6 + $0xe0] sm:$0xff] %v971_v11  ;;  %1067 = vst [vmem:[%s2366_s6 + $0x1e0] sm:$0xff] %v1003_v45 }
 0x11f   :  { %v909_v8 = vadd.f32 %v845_v54, %v505_v31  ;;  %v941_v33 = vadd.f32 %v877_v57, %v665_v32 }
 0x120   :  { %v974_v14 = vmax.f32 %v910_v12, 0.0  ;;  %v1006_v61 = vmax.f32 %v942_v7, 0.0 }
 0x121   :  { %v973_v62 = vmax.f32 %v909_v8, 0.0  ;;  %v1005_v4 = vmax.f32 %v941_v33, 0.0 }
 0x122   :  { %1038 = vst [vmem:[%s2366_s6 + $0xf8] sm:$0xff] %v974_v14  ;;  %1070 = vst [vmem:[%s2366_s6 + $0x1f8] sm:$0xff] %v1006_v61 }
 0x123   :  { %1037 = vst [vmem:[%s2366_s6 + $0xf0] sm:$0xff] %v973_v62  ;;  %1069 = vst [vmem:[%s2366_s6 + $0x1f0] sm:$0xff] %v1005_v4 }

// kernel: encoder_forward.17
= control target key start
LH: loop header
LB: loop body
LE: loop exit
PB: predicated region body
PF: predicated region fallthrough
CT: control target
= control target key end

     0   :  { %s1375_s1 = inlined_call_operand.vmem [shape: bf16[512,128], index: 1, kind: input, shape index: {}]   ;;  %s1376_s0 = inlined_call_operand.vmem [shape: bf16[128,512], index: 0, kind: input, shape index: {}]   ;;  %s1377_s2 = inlined_call_operand.vmem [shape: f32[128,128], index: 2, kind: output, shape index: {0}]   ;;  %s1378_s3 = inlined_call_operand.vmem [shape: f32[1,128], index: 3, kind: output, shape index: {1}]   ;;  %s1379_s4 = inlined_call_operand.vmem [shape: f32[1,128], index: 4, kind: output, shape index: {2}]  }
   0x1   :  { %v1024_v0 = vld [vmem:[%s1375_s1 + $0x40] sm:$0xff]   ;;  %v1028_v4 = vld [vmem:[%s1375_s1 + $0x48] sm:$0xff]   ;;  %v1032_v8 = vld [vmem:[%s1375_s1 + $0x50] sm:$0xff]  }
   0x2   :  { %v1025_v1 = vld [vmem:[%s1375_s1 + $0xc0] sm:$0xff]   ;;  %896 = vmatprep.subr.bf16.mxu0 %v1024_v0  ;;  %v1029_v5 = vld [vmem:[%s1375_s1 + $0xc8] sm:$0xff]   ;;  %v1033_v9 = vld [vmem:[%s1375_s1 + $0xd0] sm:$0xff]  }
   0x3   :  { %v1026_v2 = vld [vmem:[%s1375_s1] sm:$0xff]   ;;  %960 = vmatprep.subr.bf16.mxu1 %v1025_v1  ;;  %v1030_v6 = vld [vmem:[%s1375_s1 + $0x8] sm:$0xff]   ;;  %v1034_v10 = vld [vmem:[%s1375_s1 + $0x10] sm:$0xff]  }
   0x4   :  { %v1027_v3 = vld [vmem:[%s1375_s1 + $0x80] sm:$0xff]   ;;  %897 = vmatpush3.bf16.msra.mxu0 %v1026_v2  ;;  %v1031_v7 = vld [vmem:[%s1375_s1 + $0x88] sm:$0xff]   ;;  %v1035_v11 = vld [vmem:[%s1375_s1 + $0x90] sm:$0xff]  }
   0x5   :  { %961 = vmatpush3.bf16.msra.mxu1 %v1027_v3  ;;  %898 = vmatprep.subr.bf16.mxu0 %v1028_v4  ;;  %v1036_v12 = vld [vmem:[%s1375_s1 + $0x58] sm:$0xff]   ;;  %v1040_v16 = vld [vmem:[%s1375_s1 + $0x60] sm:$0xff]   ;;  %v1044_v20 = vld [vmem:[%s1375_s1 + $0x68] sm:$0xff]  }
   0x6   :  { %962 = vmatprep.subr.bf16.mxu1 %v1029_v5  ;;  %v1037_v13 = vld [vmem:[%s1375_s1 + $0xd8] sm:$0xff]   ;;  %v1041_v17 = vld [vmem:[%s1375_s1 + $0xe0] sm:$0xff]   ;;  %v1045_v21 = vld [vmem:[%s1375_s1 + $0xe8] sm:$0xff]  }
   0x7   :  { %v1038_v14 = vld [vmem:[%s1375_s1 + $0x18] sm:$0xff]   ;;  %v1042_v18 = vld [vmem:[%s1375_s1 + $0x20] sm:$0xff]   ;;  %v1046_v22 = vld [vmem:[%s1375_s1 + $0x28] sm:$0xff]  }
   0x8   :  { %899 = vmatpush3.bf16.msra.mxu0 %v1030_v6  ;;  %v1039_v15 = vld [vmem:[%s1375_s1 + $0x98] sm:$0xff]   ;;  %v1043_v19 = vld [vmem:[%s1375_s1 + $0xa0] sm:$0xff]   ;;  %v1047_v23 = vld [vmem:[%s1375_s1 + $0xa8] sm:$0xff]  }
   0x9   :  { %963 = vmatpush3.bf16.msra.mxu1 %v1031_v7  ;;  %900 = vmatprep.subr.bf16.mxu0 %v1032_v8  ;;  %v1048_v24 = vld [vmem:[%s1375_s1 + $0x70] sm:$0xff]   ;;  %v1052_v28 = vld [vmem:[%s1375_s1 + $0x78] sm:$0xff]  }
   0xa   :  { %964 = vmatprep.subr.bf16.mxu1 %v1033_v9  ;;  %v1049_v25 = vld [vmem:[%s1375_s1 + $0xf0] sm:$0xff]   ;;  %v1053_v29 = vld [vmem:[%s1375_s1 + $0xf8] sm:$0xff]  }
   0xb   :  { %v1050_v26 = vld [vmem:[%s1375_s1 + $0x30] sm:$0xff]   ;;  %v1054_v30 = vld [vmem:[%s1375_s1 + $0x38] sm:$0xff]  }
   0xc   :  { %901 = vmatpush3.bf16.msra.mxu0 %v1034_v10  ;;  %v1051_v27 = vld [vmem:[%s1375_s1 + $0xb0] sm:$0xff]   ;;  %v1055_v31 = vld [vmem:[%s1375_s1 + $0xb8] sm:$0xff]  }
   0xd   :  { %965 = vmatpush3.bf16.msra.mxu1 %v1035_v11  ;;  %902 = vmatprep.subr.bf16.mxu0 %v1036_v12  ;;  %v1056_v32 = vld [vmem:[%s1376_s0] ss:$16 sps:$4 sm:$0xff]   ;;  %v1058_v33 = vld [vmem:[%s1376_s0 + $0x4] ss:$16 sps:$4 sm:$0xff]   ;;  %v1059_v34 = vld [vmem:[%s1376_s0 + $0x8] ss:$16 sps:$4 sm:$0xff]  }
   0xe   :  { %966 = vmatprep.subr.bf16.mxu1 %v1037_v13  ;;  %v1061_v35 = vld [vmem:[%s1376_s0 + $0xc] ss:$16 sps:$4 sm:$0xff]   ;;  %531 = vmatprep.mubr.bf16.mxu0 %v1058_v33  ;;  %v1062_v36 = vld [vmem:[%s1376_s0 + $0x24] ss:$16 sps:$4 sm:$0xff]   ;;  %v1066_v38 = vld [vmem:[%s1376_s0 + $0x20] ss:$16 sps:$4 sm:$0xff]  }
   0xf   :  { %628 = vmatprep.mubr.bf16.mxu1 %v1061_v35  ;;  %v1064_v37 = vld [vmem:[%s1376_s0 + $0x2c] ss:$16 sps:$4 sm:$0xff]   ;;  %v1067_v39 = vld [vmem:[%s1376_s0 + $0x28] ss:$16 sps:$4 sm:$0xff]   ;;  %v1068_v40 = vld [vmem:[%s1376_s0 + $0x44] ss:$16 sps:$4 sm:$0xff]  }
  0x10   :  { %903 = vmatpush3.bf16.msra.mxu0 %v1038_v14  ;;  %v1070_v41 = vld [vmem:[%s1376_s0 + $0x4c] ss:$16 sps:$4 sm:$0xff]   ;;  %v1072_v42 = vld [vmem:[%s1376_s0 + $0x40] ss:$16 sps:$4 sm:$0xff]   ;;  %v1073_v43 = vld [vmem:[%s1376_s0 + $0x48] ss:$16 sps:$4 sm:$0xff]  }
  0x11   :  { %967 = vmatpush3.bf16.msra.mxu1 %v1039_v15  ;;  %904 = vmatprep.subr.bf16.mxu0 %v1040_v16  ;;  %v1074_v44 = vld [vmem:[%s1376_s0 + $0x64] ss:$16 sps:$4 sm:$0xff]   ;;  %v1076_v45 = vld [vmem:[%s1376_s0 + $0x6c] ss:$16 sps:$4 sm:$0xff]   ;;  %v1078_v46 = vld [vmem:[%s1376_s0 + $0x60] ss:$16 sps:$4 sm:$0xff]  }
  0x12   :  { %968 = vmatprep.subr.bf16.mxu1 %v1041_v17  ;;  %v1079_v47 = vld [vmem:[%s1376_s0 + $0x68] ss:$16 sps:$4 sm:$0xff]   ;;  %v1080_v48 = vld [vmem:[%s1376_s0 + $0x84] ss:$16 sps:$4 sm:$0xff]   ;;  %v1082_v49 = vld [vmem:[%s1376_s0 + $0x8c] ss:$16 sps:$4 sm:$0xff]  }
  0x13   :  { %v1084_v50 = vld [vmem:[%s1376_s0 + $0x80] ss:$16 sps:$4 sm:$0xff]   ;;  %v1085_v51 = vld [vmem:[%s1376_s0 + $0x88] ss:$16 sps:$4 sm:$0xff]   ;;  %v1086_v52 = vld [vmem:[%s1376_s0 + $0xa4] ss:$16 sps:$4 sm:$0xff]  }
  0x14   :  { %905 = vmatpush3.bf16.msra.mxu0 %v1042_v18  ;;  %v1088_v53 = vld [vmem:[%s1376_s0 + $0xac] ss:$16 sps:$4 sm:$0xff]   ;;  %v1090_v54 = vld [vmem:[%s1376_s0 + $0xa0] ss:$16 sps:$4 sm:$0xff]   ;;  %v1091_v55 = vld [vmem:[%s1376_s0 + $0xa8] ss:$16 sps:$4 sm:$0xff]  }
  0x15   :  { %969 = vmatpush3.bf16.msra.mxu1 %v1043_v19  ;;  %906 = vmatprep.subr.bf16.mxu0 %v1044_v20  ;;  %v1092_v56 = vld [vmem:[%s1376_s0 + $0xc4] ss:$16 sps:$4 sm:$0xff]   ;;  %v1094_v57 = vld [vmem:[%s1376_s0 + $0xcc] ss:$16 sps:$4 sm:$0xff]   ;;  %v1096_v58 = vld [vmem:[%s1376_s0 + $0xc0] ss:$16 sps:$4 sm:$0xff]  }
  0x16   :  { %970 = vmatprep.subr.bf16.mxu1 %v1045_v21  ;;  %v1097_v59 = vld [vmem:[%s1376_s0 + $0xc8] ss:$16 sps:$4 sm:$0xff]   ;;  %v1098_v60 = vld [vmem:[%s1376_s0 + $0xe4] ss:$16 sps:$4 sm:$0xff]   ;;  %v1100_v61 = vld [vmem:[%s1376_s0 + $0xec] ss:$16 sps:$4 sm:$0xff]  }
  0x17   :  { %v1102_v62 = vld [vmem:[%s1376_s0 + $0xe0] ss:$16 sps:$4 sm:$0xff]   ;;  %v1103_v63 = vld [vmem:[%s1376_s0 + $0xe8] ss:$16 sps:$4 sm:$0xff]  }
  0x18   :  { %907 = vmatpush3.bf16.msra.mxu0 %v1046_v22 }
  0x19   :  { %971 = vmatpush3.bf16.msra.mxu1 %v1047_v23  ;;  %908 = vmatprep.subr.bf16.mxu0 %v1048_v24 }
  0x1a   :  { %972 = vmatprep.subr.bf16.mxu1 %v1049_v25 }
  0x1c   :  { %909 = vmatpush3.bf16.msra.mxu0 %v1050_v26 }
  0x1d   :  { %973 = vmatpush3.bf16.msra.mxu1 %v1051_v27  ;;  %910 = vmatprep.subr.bf16.mxu0 %v1052_v28 }
  0x1e   :  { %974 = vmatprep.subr.bf16.mxu1 %v1053_v29 }
  0x20   :  { %911 = vmatpush3.bf16.msra.mxu0 %v1054_v30 }
  0x21   :  { %975 = vmatpush3.bf16.msra.mxu1 %v1055_v31 }
  0x23   :  { %532 = vmatmul.mubr.bf16.vlgmr.msra.gmra.mrb[0].mxu0 %v1056_v32 }
  0x24   :  { %629 = vmatmul.mubr.bf16.vlgmr.msra.gmra.mrb[0].mxu1 %v1059_v34  ;;  %539 = vmatprep.mubr.bf16.mxu0 %v1062_v36 }
  0x25   :  { %636 = vmatprep.mubr.bf16.mxu1 %v1064_v37 }
  0x2b   :  { %540 = vmatmul.mubr.bf16.gmra.mrb[4].mxu0 %v1066_v38 }
  0x2c   :  { %637 = vmatmul.mubr.bf16.gmra.mrb[4].mxu1 %v1067_v39  ;;  %547 = vmatprep.mubr.bf16.mxu0 %v1068_v40 }
  0x2d   :  { %644 = vmatprep.mubr.bf16.mxu1 %v1070_v41 }
  0x33   :  { %548 = vmatmul.mubr.bf16.gmra.mrb[8].mxu0 %v1072_v42 }
  0x34   :  { %645 = vmatmul.mubr.bf16.gmra.mrb[8].mxu1 %v1073_v43  ;;  %555 = vmatprep.mubr.bf16.mxu0 %v1074_v44 }
  0x35   :  { %652 = vmatprep.mubr.bf16.mxu1 %v1076_v45 }
  0x3b   :  { %556 = vmatmul.mubr.bf16.gmra.mrb[12].mxu0 %v1078_v46 }
  0x3c   :  { %653 = vmatmul.mubr.bf16.gmra.mrb[12].mxu1 %v1079_v47  ;;  %563 = vmatprep.mubr.bf16.mxu0 %v1080_v48 }
  0x3d   :  { %660 = vmatprep.mubr.bf16.mxu1 %v1082_v49 }
  0x43   :  { %564 = vmatmul.mubr.bf16.gmra.mrb[16].mxu0 %v1084_v50 }
  0x44   :  { %661 = vmatmul.mubr.bf16.gmra.mrb[16].mxu1 %v1085_v51  ;;  %571 = vmatprep.mubr.bf16.mxu0 %v1086_v52 }
  0x45   :  { %668 = vmatprep.mubr.bf16.mxu1 %v1088_v53 }
  0x4b   :  { %572 = vmatmul.mubr.bf16.gmra.mrb[20].mxu0 %v1090_v54 }
  0x4c   :  { %669 = vmatmul.mubr.bf16.gmra.mrb[20].mxu1 %v1091_v55  ;;  %579 = vmatprep.mubr.bf16.mxu0 %v1092_v56 }
  0x4d   :  { %676 = vmatprep.mubr.bf16.mxu1 %v1094_v57 }
  0x53   :  { %580 = vmatmul.mubr.bf16.gmra.mrb[24].mxu0 %v1096_v58 }
  0x54   :  { %677 = vmatmul.mubr.bf16.gmra.mrb[24].mxu1 %v1097_v59  ;;  %587 = vmatprep.mubr.bf16.mxu0 %v1098_v60 }
  0x55   :  { %684 = vmatprep.mubr.bf16.mxu1 %v1100_v61 }
  0x5b   :  { %588 = vmatmul.mubr.bf16.gmra.mrb[28].mxu0 %v1102_v62 }
  0x5c   :  { %685 = vmatmul.mubr.bf16.gmra.mrb[28].mxu1 %v1103_v63 }
  0xf6   :  { %v912_v0 = vpop.f32.mrb[0].mxu0 }
  0xf7   :  { %v976_v1 = vpop.f32.mrb[0].mxu1  ;;  %v913_v2 = vpop.f32.mrb[1].mxu0 }
  0xf8   :  { %v914_v3 = vadd.f32 %v913_v2, %v912_v0  ;;  %v977_v4 = vpop.f32.mrb[1].mxu1  ;;  %v915_v5 = vpop.f32.mrb[2].mxu0 }
  0xf9   :  { %v978_v6 = vadd.f32 %v977_v4, %v976_v1  ;;  %v979_v7 = vpop.f32.mrb[2].mxu1  ;;  %v916_v8 = vpop.f32.mrb[3].mxu0 }
  0xfa   :  { %v917_v9 = vadd.f32 %v916_v8, %v915_v5  ;;  %v980_v10 = vpop.f32.mrb[3].mxu1 }
  0xfb   :  { %v631_v11 = vadd.f32 %v978_v6, %v914_v3  ;;  %v981_v12 = vadd.f32 %v980_v10, %v979_v7 }
  0xfd   :  { %744 = vst [vmem:[%s1377_s2] sm:$0xff] %v631_v11  ;;  %v634_v13 = vadd.f32 %v981_v12, %v917_v9  ;;  %v782_v15 = vmul.f32 %v631_v11, %v631_v11 }
  0xfe   :  { %v918_v14 = vpop.f32.mrb[4].mxu0 }
  0xff   :  { %745 = vst [vmem:[%s1377_s2 + $0x8] sm:$0xff] %v634_v13  ;;  %v760_v16 = vadd.f32 %v634_v13, %v631_v11  ;;  %v783_v17 = vmul.f32 %v634_v13, %v634_v13  ;;  %v982_v18 = vpop.f32.mrb[4].mxu1  ;;  %v919_v19 = vpop.f32.mrb[5].mxu0 }
 0x100   :  { %v920_v20 = vadd.f32 %v919_v19, %v918_v14  ;;  %v983_v21 = vpop.f32.mrb[5].mxu1  ;;  %v921_v22 = vpop.f32.mrb[6].mxu0 }
 0x101   :  { %v798_v23 = vadd.f32 %v783_v17, %v782_v15  ;;  %v984_v24 = vadd.f32 %v983_v21, %v982_v18  ;;  %v985_v25 = vpop.f32.mrb[6].mxu1  ;;  %v922_v26 = vpop.f32.mrb[7].mxu0 }
 0x102   :  { %v923_v27 = vadd.f32 %v922_v26, %v921_v22  ;;  %v986_v28 = vpop.f32.mrb[7].mxu1 }
 0x103   :  { %v639_v29 = vadd.f32 %v984_v24, %v920_v20  ;;  %v987_v30 = vadd.f32 %v986_v28, %v985_v25 }
 0x105   :  { %746 = vst [vmem:[%s1377_s2 + $0x10] sm:$0xff] %v639_v29  ;;  %v761_v31 = vadd.f32 %v760_v16, %v639_v29  ;;  %v784_v32 = vmul.f32 %v639_v29, %v639_v29  ;;  %v642_v33 = vadd.f32 %v987_v30, %v923_v27 }
 0x106   :  { %v924_v34 = vpop.f32.mrb[8].mxu0 }
 0x107   :  { %v799_v35 = vadd.f32 %v798_v23, %v784_v32  ;;  %747 = vst [vmem:[%s1377_s2 + $0x18] sm:$0xff] %v642_v33  ;;  %v762_v36 = vadd.f32 %v761_v31, %v642_v33  ;;  %v785_v37 = vmul.f32 %v642_v33, %v642_v33  ;;  %v988_v38 = vpop.f32.mrb[8].mxu1  ;;  %v925_v39 = vpop.f32.mrb[9].mxu0 }
 0x108   :  { %v926_v40 = vadd.f32 %v925_v39, %v924_v34  ;;  %v989_v41 = vpop.f32.mrb[9].mxu1  ;;  %v927_v42 = vpop.f32.mrb[10].mxu0 }
 0x109   :  { %v800_v43 = vadd.f32 %v799_v35, %v785_v37  ;;  %v990_v44 = vadd.f32 %v989_v41, %v988_v38  ;;  %v991_v45 = vpop.f32.mrb[10].mxu1  ;;  %v928_v46 = vpop.f32.mrb[11].mxu0 }
 0x10a   :  { %v929_v47 = vadd.f32 %v928_v46, %v927_v42  ;;  %v992_v48 = vpop.f32.mrb[11].mxu1 }
 0x10b   :  { %v647_v49 = vadd.f32 %v990_v44, %v926_v40  ;;  %v993_v50 = vadd.f32 %v992_v48, %v991_v45 }
 0x10d   :  { %748 = vst [vmem:[%s1377_s2 + $0x20] sm:$0xff] %v647_v49  ;;  %v763_v51 = vadd.f32 %v762_v36, %v647_v49  ;;  %v786_v52 = vmul.f32 %v647_v49, %v647_v49  ;;  %v650_v53 = vadd.f32 %v993_v50, %v929_v47 }
 0x10e   :  { %v930_v54 = vpop.f32.mrb[12].mxu0 }
 0x10f   :  { %v801_v55 = vadd.f32 %v800_v43, %v786_v52  ;;  %749 = vst [vmem:[%s1377_s2 + $0x28] sm:$0xff] %v650_v53  ;;  %v764_v56 = vadd.f32 %v763_v51, %v650_v53  ;;  %v787_v57 = vmul.f32 %v650_v53, %v650_v53  ;;  %v994_v58 = vpop.f32.mrb[12].mxu1  ;;  %v931_v59 = vpop.f32.mrb[13].mxu0 }
 0x110   :  { %v932_v60 = vadd.f32 %v931_v59, %v930_v54  ;;  %v995_v61 = vpop.f32.mrb[13].mxu1  ;;  %v933_v62 = vpop.f32.mrb[14].mxu0 }
 0x111   :  { %v802_v63 = vadd.f32 %v801_v55, %v787_v57  ;;  %v996_v0 = vadd.f32 %v995_v61, %v994_v58  ;;  %v997_v1 = vpop.f32.mrb[14].mxu1  ;;  %v934_v2 = vpop.f32.mrb[15].mxu0 }
 0x112   :  { %v935_v3 = vadd.f32 %v934_v2, %v933_v62  ;;  %v998_v4 = vpop.f32.mrb[15].mxu1 }
 0x113   :  { %v655_v5 = vadd.f32 %v996_v0, %v932_v60  ;;  %v999_v6 = vadd.f32 %v998_v4, %v997_v1 }
 0x115   :  { %750 = vst [vmem:[%s1377_s2 + $0x30] sm:$0xff] %v655_v5  ;;  %v765_v7 = vadd.f32 %v764_v56, %v655_v5  ;;  %v788_v8 = vmul.f32 %v655_v5, %v655_v5  ;;  %v658_v9 = vadd.f32 %v999_v6, %v935_v3 }
 0x116   :  { %v936_v10 = vpop.f32.mrb[16].mxu0 }
 0x117   :  { %v803_v11 = vadd.f32 %v802_v63, %v788_v8  ;;  %751 = vst [vmem:[%s1377_s2 + $0x38] sm:$0xff] %v658_v9  ;;  %v766_v12 = vadd.f32 %v765_v7, %v658_v9  ;;  %v789_v13 = vmul.f32 %v658_v9, %v658_v9  ;;  %v1000_v14 = vpop.f32.mrb[16].mxu1  ;;  %v937_v15 = vpop.f32.mrb[17].mxu0 }
 0x118   :  { %v938_v16 = vadd.f32 %v937_v15, %v936_v10  ;;  %v1001_v17 = vpop.f32.mrb[17].mxu1  ;;  %v939_v18 = vpop.f32.mrb[18].mxu0 }
 0x119   :  { %v804_v19 = vadd.f32 %v803_v11, %v789_v13  ;;  %v1002_v20 = vadd.f32 %v1001_v17, %v1000_v14  ;;  %v1003_v21 = vpop.f32.mrb[18].mxu1  ;;  %v940_v22 = vpop.f32.mrb[19].mxu0 }
 0x11a   :  { %v941_v23 = vadd.f32 %v940_v22, %v939_v18  ;;  %v1004_v24 = vpop.f32.mrb[19].mxu1 }
 0x11b   :  { %v663_v25 = vadd.f32 %v1002_v20, %v938_v16  ;;  %v1005_v26 = vadd.f32 %v1004_v24, %v1003_v21 }
 0x11d   :  { %752 = vst [vmem:[%s1377_s2 + $0x40] sm:$0xff] %v663_v25  ;;  %v767_v27 = vadd.f32 %v766_v12, %v663_v25  ;;  %v790_v28 = vmul.f32 %v663_v25, %v663_v25  ;;  %v666_v29 = vadd.f32 %v1005_v26, %v941_v23 }
 0x11e   :  { %v942_v30 = vpop.f32.mrb[20].mxu0 }
 0x11f   :  { %v805_v31 = vadd.f32 %v804_v19, %v790_v28  ;;  %753 = vst [vmem:[%s1377_s2 + $0x48] sm:$0xff] %v666_v29  ;;  %v768_v32 = vadd.f32 %v767_v27, %v666_v29  ;;  %v791_v33 = vmul.f32 %v666_v29, %v666_v29  ;;  %v1006_v34 = vpop.f32.mrb[20].mxu1  ;;  %v943_v35 = vpop.f32.mrb[21].mxu0 }
 0x120   :  { %v944_v36 = vadd.f32 %v943_v35, %v942_v30  ;;  %v1007_v37 = vpop.f32.mrb[21].mxu1  ;;  %v945_v38 = vpop.f32.mrb[22].mxu0 }
 0x121   :  { %v806_v39 = vadd.f32 %v805_v31, %v791_v33  ;;  %v1008_v40 = vadd.f32 %v1007_v37, %v1006_v34  ;;  %v1009_v41 = vpop.f32.mrb[22].mxu1  ;;  %v946_v42 = vpop.f32.mrb[23].mxu0 }
 0x122   :  { %v947_v43 = vadd.f32 %v946_v42, %v945_v38  ;;  %v1010_v44 = vpop.f32.mrb[23].mxu1 }
 0x123   :  { %v671_v45 = vadd.f32 %v1008_v40, %v944_v36  ;;  %v1011_v46 = vadd.f32 %v1010_v44, %v1009_v41 }
 0x125   :  { %754 = vst [vmem:[%s1377_s2 + $0x50] sm:$0xff] %v671_v45  ;;  %v769_v47 = vadd.f32 %v768_v32, %v671_v45  ;;  %v792_v48 = vmul.f32 %v671_v45, %v671_v45  ;;  %v674_v49 = vadd.f32 %v1011_v46, %v947_v43 }
 0x126   :  { %v948_v50 = vpop.f32.mrb[24].mxu0 }
 0x127   :  { %v807_v51 = vadd.f32 %v806_v39, %v792_v48  ;;  %755 = vst [vmem:[%s1377_s2 + $0x58] sm:$0xff] %v674_v49  ;;  %v770_v52 = vadd.f32 %v769_v47, %v674_v49  ;;  %v793_v53 = vmul.f32 %v674_v49, %v674_v49  ;;  %v1012_v54 = vpop.f32.mrb[24].mxu1  ;;  %v949_v55 = vpop.f32.mrb[25].mxu0 }
 0x128   :  { %v950_v56 = vadd.f32 %v949_v55, %v948_v50  ;;  %v1013_v57 = vpop.f32.mrb[25].mxu1  ;;  %v951_v58 = vpop.f32.mrb[26].mxu0 }
 0x129   :  { %v808_v59 = vadd.f32 %v807_v51, %v793_v53  ;;  %v1014_v60 = vadd.f32 %v1013_v57, %v1012_v54  ;;  %v1015_v61 = vpop.f32.mrb[26].mxu1  ;;  %v952_v62 = vpop.f32.mrb[27].mxu0 }
 0x12a   :  { %v953_v63 = vadd.f32 %v952_v62, %v951_v58  ;;  %v1016_v0 = vpop.f32.mrb[27].mxu1 }
 0x12b   :  { %v679_v1 = vadd.f32 %v1014_v60, %v950_v56  ;;  %v1017_v2 = vadd.f32 %v1016_v0, %v1015_v61 }
 0x12d   :  { %756 = vst [vmem:[%s1377_s2 + $0x60] sm:$0xff] %v679_v1  ;;  %v771_v3 = vadd.f32 %v770_v52, %v679_v1  ;;  %v794_v4 = vmul.f32 %v679_v1, %v679_v1  ;;  %v682_v5 = vadd.f32 %v1017_v2, %v953_v63 }
 0x12e   :  { %v954_v6 = vpop.f32.mrb[28].mxu0 }
 0x12f   :  { %v809_v7 = vadd.f32 %v808_v59, %v794_v4  ;;  %757 = vst [vmem:[%s1377_s2 + $0x68] sm:$0xff] %v682_v5  ;;  %v772_v8 = vadd.f32 %v771_v3, %v682_v5  ;;  %v795_v9 = vmul.f32 %v682_v5, %v682_v5  ;;  %v1018_v10 = vpop.f32.mrb[28].mxu1  ;;  %v955_v11 = vpop.f32.mrb[29].mxu0 }
 0x130   :  { %v956_v12 = vadd.f32 %v955_v11, %v954_v6  ;;  %v1019_v13 = vpop.f32.mrb[29].mxu1  ;;  %v957_v14 = vpop.f32.mrb[30].mxu0 }
 0x131   :  { %v810_v15 = vadd.f32 %v809_v7, %v795_v9  ;;  %v1020_v16 = vadd.f32 %v1019_v13, %v1018_v10  ;;  %v1021_v17 = vpop.f32.mrb[30].mxu1  ;;  %v958_v18 = vpop.f32.mrb[31].mxu0 }
 0x132   :  { %v959_v19 = vadd.f32 %v958_v18, %v957_v14  ;;  %v1022_v20 = vpop.f32.mrb[31].mxu1 }
 0x133   :  { %v687_v21 = vadd.f32 %v1020_v16, %v956_v12  ;;  %v1023_v22 = vadd.f32 %v1022_v20, %v1021_v17 }
 0x135   :  { %758 = vst [vmem:[%s1377_s2 + $0x70] sm:$0xff] %v687_v21  ;;  %v773_v23 = vadd.f32 %v772_v8, %v687_v21  ;;  %v796_v24 = vmul.f32 %v687_v21, %v687_v21  ;;  %v690_v25 = vadd.f32 %v1023_v22, %v959_v19 }
 0x137   :  { %v811_v26 = vadd.f32 %v810_v15, %v796_v24  ;;  %759 = vst [vmem:[%s1377_s2 + $0x78] sm:$0xff] %v690_v25  ;;  %v774_v27 = vadd.f32 %v773_v23, %v690_v25  ;;  %v797_v28 = vmul.f32 %v690_v25, %v690_v25 }
 0x139   :  { %v775_v29 = vrot.slane %v774_v27, 4  ;;  %v812_v30 = vadd.f32 %v811_v26, %v797_v28 }
 0x13b   :  { %v776_v31 = vadd.f32 %v775_v29, %v774_v27  ;;  %v813_v32 = vrot.slane %v812_v30, 4 }
 0x13d   :  { %v777_v33 = vrot.slane %v776_v31, 2  ;;  %v814_v34 = vadd.f32 %v813_v32, %v812_v30 }
 0x13f   :  { %v778_v35 = vadd.f32 %v777_v33, %v776_v31  ;;  %v815_v36 = vrot.slane %v814_v34, 2 }
 0x141   :  { %v779_v37 = vrot.slane %v778_v35, 1  ;;  %v816_v38 = vadd.f32 %v815_v36, %v814_v34 }
 0x143   :  { %v780_v39 = vadd.f32 %v779_v37, %v778_v35  ;;  %v817_v40 = vrot.slane %v816_v38, 1 }
 0x145   :  { %781 = vst [vmem:[%s1378_s3] sm:$0x1] %v780_v39  ;;  %v818_v41 = vadd.f32 %v817_v40, %v816_v38 }
 0x147   :  { %819 = vst [vmem:[%s1379_s4] sm:$0x1] %v818_v41 }

// kernel: encoder_forward.18
= control target key start
LH: loop header
LB: loop body
LE: loop exit
PB: predicated region body
PF: predicated region fallthrough
CT: control target
= control target key end

     0   :  { %s254_s0 = inlined_call_operand.vmem [shape: f32[128,128], index: 0, kind: input, shape index: {}]   ;;  %s255_s1 = inlined_call_operand.vmem [shape: f32[1,128], index: 1, kind: input, shape index: {}]   ;;  %s256_s2 = inlined_call_operand.vmem [shape: f32[1,128], index: 2, kind: input, shape index: {}]   ;;  %s257_s3 = inlined_call_operand.vmem [shape: f32[128,128], index: 3, kind: output, shape index: {}]  }
   0x1   :  { %v14_v0 = vld [vmem:[%s254_s0] sm:$0xff]  ;;  %v15_v4 = vld [vmem:[%s254_s0 + $0x8] sm:$0xff]  ;;  %v16_v5 = vld [vmem:[%s254_s0 + $0x10] sm:$0xff] }
   0x2   :  { %v112_v1 = vld [vmem:[%s255_s1] ss:$0 sm:$0xff]  ;;  %v17_v6 = vld [vmem:[%s254_s0 + $0x18] sm:$0xff]  ;;  %v19_v11 = vld [vmem:[%s254_s0 + $0x28] sm:$0xff] }
   0x3   :  { %v143_v2 = vld [vmem:[%s256_s2] ss:$0 sm:$0xff]  ;;  %v37_v3 = vmul.f32 %v112_v1, %v14_v0  ;;  %v38_v7 = vmul.f32 %v112_v1, %v15_v4  ;;  %v39_v8 = vmul.f32 %v112_v1, %v16_v5  ;;  %v40_v9 = vmul.f32 %v112_v1, %v17_v6  ;;  %v20_v12 = vld [vmem:[%s254_s0 + $0x30] sm:$0xff]  ;;  %v21_v17 = vld [vmem:[%s254_s0 + $0x38] sm:$0xff] }
   0x4   :  { %v18_v10 = vld [vmem:[%s254_s0 + $0x20] sm:$0xff]  ;;  %v42_v15 = vmul.f32 %v112_v1, %v19_v11  ;;  %v43_v16 = vmul.f32 %v112_v1, %v20_v12  ;;  %v44_v21 = vmul.f32 %v112_v1, %v21_v17  ;;  %v23_v27 = vld [vmem:[%s254_s0 + $0x48] sm:$0xff]  ;;  %v24_v28 = vld [vmem:[%s254_s0 + $0x50] sm:$0xff] }
   0x5   :  { %v60_v13 = vadd.f32 %v143_v2, %v37_v3  ;;  %v41_v14 = vmul.f32 %v112_v1, %v18_v10  ;;  %v61_v18 = vadd.f32 %v143_v2, %v38_v7  ;;  %v62_v19 = vadd.f32 %v143_v2, %v39_v8  ;;  %v22_v22 = vld [vmem:[%s254_s0 + $0x40] sm:$0xff]  ;;  %v25_v29 = vld [vmem:[%s254_s0 + $0x58] sm:$0xff]  ;;  %v27_v35 = vld [vmem:[%s254_s0 + $0x68] sm:$0xff] }
   0x6   :  { %v63_v20 = vadd.f32 %v143_v2, %v40_v9  ;;  %v65_v25 = vadd.f32 %v143_v2, %v42_v15  ;;  %v66_v26 = vadd.f32 %v143_v2, %v43_v16  ;;  %v67_v33 = vadd.f32 %v143_v2, %v44_v21  ;;  %v26_v34 = vld [vmem:[%s254_s0 + $0x60] sm:$0xff]  ;;  %v28_v36 = vld [vmem:[%s254_s0 + $0x70] sm:$0xff]  ;;  %v29_v41 = vld [vmem:[%s254_s0 + $0x78] sm:$0xff] }
   0x7   :  { %v76_v23 = vmax.f32 %v60_v13, 0.0  ;;  %v64_v24 = vadd.f32 %v143_v2, %v41_v14  ;;  %v77_v30 = vmax.f32 %v61_v18, 0.0  ;;  %v78_v31 = vmax.f32 %v62_v19, 0.0 }
   0x8   :  { %v79_v32 = vmax.f32 %v63_v20, 0.0  ;;  %v81_v38 = vmax.f32 %v65_v25, 0.0  ;;  %v82_v39 = vmax.f32 %v66_v26, 0.0  ;;  %v45_v40 = vmul.f32 %v112_v1, %v22_v22 }
   0x9   :  { %92 = vst [vmem:[%s257_s3] sm:$0xff] %v76_v23  ;;  %v80_v37 = vmax.f32 %v64_v24, 0.0  ;;  %93 = vst [vmem:[%s257_s3 + $0x8] sm:$0xff] %v77_v30  ;;  %v83_v42 = vmax.f32 %v67_v33, 0.0  ;;  %v46_v43 = vmul.f32 %v112_v1, %v23_v27  ;;  %v47_v44 = vmul.f32 %v112_v1, %v24_v28 }
   0xa   :  { %94 = vst [vmem:[%s257_s3 + $0x10] sm:$0xff] %v78_v31  ;;  %95 = vst [vmem:[%s257_s3 + $0x18] sm:$0xff] %v79_v32  ;;  %v48_v45 = vmul.f32 %v112_v1, %v25_v29  ;;  %v68_v46 = vadd.f32 %v143_v2, %v45_v40  ;;  %v49_v47 = vmul.f32 %v112_v1, %v26_v34 }
   0xb   :  { %96 = vst [vmem:[%s257_s3 + $0x20] sm:$0xff] %v80_v37  ;;  %97 = vst [vmem:[%s257_s3 + $0x28] sm:$0xff] %v81_v38  ;;  %v50_v48 = vmul.f32 %v112_v1, %v27_v35  ;;  %v51_v49 = vmul.f32 %v112_v1, %v28_v36  ;;  %v69_v50 = vadd.f32 %v143_v2, %v46_v43 }
   0xc   :  { %98 = vst [vmem:[%s257_s3 + $0x30] sm:$0xff] %v82_v39  ;;  %99 = vst [vmem:[%s257_s3 + $0x38] sm:$0xff] %v83_v42  ;;  %v70_v51 = vadd.f32 %v143_v2, %v47_v44  ;;  %v71_v52 = vadd.f32 %v143_v2, %v48_v45  ;;  %v52_v53 = vmul.f32 %v112_v1, %v29_v41  ;;  %v84_v54 = vmax.f32 %v68_v46, 0.0 }
   0xd   :  { %v72_v55 = vadd.f32 %v143_v2, %v49_v47  ;;  %v73_v56 = vadd.f32 %v143_v2, %v50_v48  ;;  %v74_v57 = vadd.f32 %v143_v2, %v51_v49  ;;  %v85_v58 = vmax.f32 %v69_v50, 0.0 }
   0xe   :  { %v86_v59 = vmax.f32 %v70_v51, 0.0  ;;  %v87_v60 = vmax.f32 %v71_v52, 0.0  ;;  %v75_v61 = vadd.f32 %v143_v2, %v52_v53  ;;  %100 = vst [vmem:[%s257_s3 + $0x40] sm:$0xff] %v84_v54 }
   0xf   :  { %v88_v62 = vmax.f32 %v72_v55, 0.0  ;;  %v89_v63 = vmax.f32 %v73_v56, 0.0  ;;  %v90_v0 = vmax.f32 %v74_v57, 0.0  ;;  %101 = vst [vmem:[%s257_s3 + $0x48] sm:$0xff] %v85_v58 }
  0x10   :  { %102 = vst [vmem:[%s257_s3 + $0x50] sm:$0xff] %v86_v59  ;;  %103 = vst [vmem:[%s257_s3 + $0x58] sm:$0xff] %v87_v60  ;;  %v91_v1 = vmax.f32 %v75_v61, 0.0 }
  0x11   :  { %104 = vst [vmem:[%s257_s3 + $0x60] sm:$0xff] %v88_v62  ;;  %105 = vst [vmem:[%s257_s3 + $0x68] sm:$0xff] %v89_v63 }
  0x12   :  { %106 = vst [vmem:[%s257_s3 + $0x70] sm:$0xff] %v90_v0  ;;  %107 = vst [vmem:[%s257_s3 + $0x78] sm:$0xff] %v91_v1 }

// kernel: encoder_forward.19
= control target key start
LH: loop header
LB: loop body
LE: loop exit
PB: predicated region body
PF: predicated region fallthrough
CT: control target
= control target key end

     0   :  { %vm143_vm0 = vcmask 588800   ;;  %vm168_vm1 = vcmask 1043456   ;;  %s619_s1 = inlined_call_operand.vmem [shape: bf16[72,128], index: 1, kind: input, shape index: {}]   ;;  %s620_s0 = inlined_call_operand.vmem [shape: bf16[128,72], index: 0, kind: input, shape index: {}]   ;;  %s621_s2 = inlined_call_operand.vmem [shape: f32[128,128], index: 2, kind: output, shape index: {0}]   ;;  %s622_s3 = inlined_call_operand.vmem [shape: f32[1,128], index: 3, kind: output, shape index: {1}]   ;;  %s623_s4 = inlined_call_operand.vmem [shape: f32[1,128], index: 4, kind: output, shape index: {2}]  }
   0x1   :  { %v480_v0 = vld [vmem:[%s619_s1] sm:$0xff]   ;;  %v481_v1 = vld [vmem:[%s619_s1 + $0x8] sm:$0xff]   ;;  %v482_v2 = vld [vmem:[%s619_s1 + $0x10] sm:$0xff]  }
   0x2   :  { %442 = vmatprep.subr.bf16.mxu0 %v480_v0  ;;  %468 = vmatprep.subr.bf16.mxu1 %v480_v0  ;;  %v485_v3 = vld [vmem:[%s620_s0] sm:$0xff]   ;;  %v483_v4 = vld [vmem:[%s619_s1 + $0x18] sm:$0xff]   ;;  %v486_v8 = vld [vmem:[%s620_s0 + $0x8] sm:$0xff]  }
   0x3   :  { %443 = vmatpush3.bf16.msra.mxu0 %v480_v0  ;;  %473 = vmatpush3.bf16.msra.mxu1 %v480_v0  ;;  %v489_v5 = vld [vmem:[%s620_s0 + $0x20] sm:$0xff]   ;;  %v490_v9 = vld [vmem:[%s620_s0 + $0x28] sm:$0xff]   ;;  %v487_v10 = vld [vmem:[%s620_s0 + $0x10] sm:$0xff]  }
   0x4   :  { %444 = vmatprep.subr.bf16.mxu0 %v481_v1  ;;  %469 = vmatprep.subr.bf16.mxu1 %v481_v1  ;;  %v484_v6 = vld [vmem:[%s619_s1 + $0x20] ss:$0 sps:$4 sm:$0xff]   ;;  %v491_v11 = vld [vmem:[%s620_s0 + $0x30] sm:$0xff]   ;;  %v488_v12 = vld [vmem:[%s620_s0 + $0x18] sm:$0xff]  }
   0x5   :  { %452 = vmatprep.mubr.msk.bf16.mxu0 %vm143_vm0, %v485_v3  ;;  %460 = vmatprep.mubr.msk.bf16.mxu1 %vm143_vm0, %v489_v5  ;;  %v170_v7 = vsel %vm168_vm1, %v484_v6, 0  ;;  %v492_v13 = vld [vmem:[%s620_s0 + $0x38] sm:$0xff]  }
   0x7   :  { %445 = vmatpush3.bf16.msra.mxu0 %v481_v1  ;;  %474 = vmatpush3.bf16.msra.mxu1 %v481_v1 }
   0x8   :  { %446 = vmatprep.subr.bf16.mxu0 %v482_v2  ;;  %470 = vmatprep.subr.bf16.mxu1 %v482_v2 }
   0xb   :  { %447 = vmatpush3.bf16.msra.mxu0 %v482_v2  ;;  %475 = vmatpush3.bf16.msra.mxu1 %v482_v2 }
   0xc   :  { %448 = vmatprep.subr.bf16.mxu0 %v483_v4  ;;  %471 = vmatprep.subr.bf16.mxu1 %v483_v4 }
   0xf   :  { %449 = vmatpush3.bf16.msra.mxu0 %v483_v4  ;;  %476 = vmatpush3.bf16.msra.mxu1 %v483_v4 }
  0x10   :  { %478 = vmatprep.subr.msk.bf16.mxu0 %vm168_vm1, %v484_v6  ;;  %479 = vmatprep.subr.msk.bf16.mxu1 %vm168_vm1, %v484_v6 }
  0x13   :  { %451 = vmatpush3.bf16.msra.mxu0 %v170_v7  ;;  %477 = vmatpush3.bf16.msra.mxu1 %v170_v7 }
  0x16   :  { %453 = vmatmul.mubr.msk.bf16.vlgmr.msra.gmra.mrb[0].mxu0 %vm143_vm0, %v486_v8  ;;  %461 = vmatmul.mubr.msk.bf16.vlgmr.msra.gmra.mrb[0].mxu1 %vm143_vm0, %v490_v9 }
  0x17   :  { %456 = vmatprep.mubr.msk.bf16.mxu0 %vm143_vm0, %v487_v10  ;;  %464 = vmatprep.mubr.msk.bf16.mxu1 %vm143_vm0, %v491_v11 }
  0x1e   :  { %457 = vmatmul.mubr.msk.bf16.gmra.mrb[4].mxu0 %vm143_vm0, %v488_v12  ;;  %465 = vmatmul.mubr.msk.bf16.gmra.mrb[4].mxu1 %vm143_vm0, %v492_v13 }
  0xe9   :  { %v454_v14 = vpop.f32.mrb[0].mxu0  ;;  %v462_v15 = vpop.f32.mrb[0].mxu1 }
  0xea   :  { %322 = vst [vmem:[%s621_s2 + $0x10] sm:$0xff] %v454_v14  ;;  %v206_v16 = vpop.f32.mrb[1].mxu0  ;;  %330 = vst [vmem:[%s621_s2 + $0x50] sm:$0xff] %v462_v15  ;;  %v238_v17 = vpop.f32.mrb[1].mxu1  ;;  %v360_v25 = vmul.f32 %v454_v14, %v454_v14  ;;  %v368_v57 = vmul.f32 %v462_v15, %v462_v15 }
  0xeb   :  { %320 = vst [vmem:[%s621_s2] sm:$0xff] %v206_v16  ;;  %v455_v18 = vpop.f32.mrb[2].mxu0  ;;  %328 = vst [vmem:[%s621_s2 + $0x40] sm:$0xff] %v238_v17  ;;  %v463_v19 = vpop.f32.mrb[2].mxu1  ;;  %v358_v22 = vmul.f32 %v206_v16, %v206_v16  ;;  %v366_v51 = vmul.f32 %v238_v17, %v238_v17 }
  0xec   :  { %323 = vst [vmem:[%s621_s2 + $0x18] sm:$0xff] %v455_v18  ;;  %v209_v20 = vpop.f32.mrb[3].mxu0  ;;  %331 = vst [vmem:[%s621_s2 + $0x58] sm:$0xff] %v463_v19  ;;  %v241_v21 = vpop.f32.mrb[3].mxu1  ;;  %v361_v28 = vmul.f32 %v455_v18, %v455_v18  ;;  %v369_v60 = vmul.f32 %v463_v19, %v463_v19 }
  0xed   :  { %321 = vst [vmem:[%s621_s2 + $0x8] sm:$0xff] %v209_v20  ;;  %v336_v23 = vadd.f32 %v209_v20, %v206_v16  ;;  %v359_v24 = vmul.f32 %v209_v20, %v209_v20  ;;  %329 = vst [vmem:[%s621_s2 + $0x48] sm:$0xff] %v241_v21  ;;  %v367_v56 = vmul.f32 %v241_v21, %v241_v21 }
  0xef   :  { %v337_v26 = vadd.f32 %v454_v14, %v336_v23  ;;  %v374_v27 = vadd.f32 %v359_v24, %v358_v22 }
  0xf1   :  { %v375_v29 = vadd.f32 %v374_v27, %v360_v25  ;;  %v458_v30 = vpop.f32.mrb[4].mxu0  ;;  %v338_v31 = vadd.f32 %v455_v18, %v337_v26  ;;  %v466_v32 = vpop.f32.mrb[4].mxu1 }
  0xf2   :  { %326 = vst [vmem:[%s621_s2 + $0x30] sm:$0xff] %v458_v30  ;;  %v222_v33 = vpop.f32.mrb[5].mxu0  ;;  %334 = vst [vmem:[%s621_s2 + $0x70] sm:$0xff] %v466_v32  ;;  %v254_v34 = vpop.f32.mrb[5].mxu1  ;;  %v364_v45 = vmul.f32 %v458_v30, %v458_v30  ;;  %v372_v5 = vmul.f32 %v466_v32, %v466_v32 }
  0xf3   :  { %324 = vst [vmem:[%s621_s2 + $0x20] sm:$0xff] %v222_v33  ;;  %v339_v35 = vadd.f32 %v338_v31, %v222_v33  ;;  %v362_v36 = vmul.f32 %v222_v33, %v222_v33  ;;  %v376_v37 = vadd.f32 %v375_v29, %v361_v28  ;;  %v459_v38 = vpop.f32.mrb[6].mxu0  ;;  %332 = vst [vmem:[%s621_s2 + $0x60] sm:$0xff] %v254_v34  ;;  %v467_v39 = vpop.f32.mrb[6].mxu1 }
  0xf4   :  { %327 = vst [vmem:[%s621_s2 + $0x38] sm:$0xff] %v459_v38  ;;  %v225_v40 = vpop.f32.mrb[7].mxu0  ;;  %335 = vst [vmem:[%s621_s2 + $0x78] sm:$0xff] %v467_v39  ;;  %v257_v41 = vpop.f32.mrb[7].mxu1  ;;  %v365_v48 = vmul.f32 %v459_v38, %v459_v38  ;;  %v370_v63 = vmul.f32 %v254_v34, %v254_v34  ;;  %v373_v8 = vmul.f32 %v467_v39, %v467_v39 }
  0xf5   :  { %v377_v42 = vadd.f32 %v376_v37, %v362_v36  ;;  %325 = vst [vmem:[%s621_s2 + $0x28] sm:$0xff] %v225_v40  ;;  %v340_v43 = vadd.f32 %v339_v35, %v225_v40  ;;  %v363_v44 = vmul.f32 %v225_v40, %v225_v40  ;;  %333 = vst [vmem:[%s621_s2 + $0x68] sm:$0xff] %v257_v41 }
  0xf6   :  { %v371_v4 = vmul.f32 %v257_v41, %v257_v41 }
  0xf7   :  { %v341_v46 = vadd.f32 %v458_v30, %v340_v43  ;;  %v378_v47 = vadd.f32 %v377_v42, %v363_v44 }
  0xf9   :  { %v379_v49 = vadd.f32 %v378_v47, %v364_v45  ;;  %v342_v50 = vadd.f32 %v459_v38, %v341_v46 }
  0xfb   :  { %v343_v52 = vadd.f32 %v342_v50, %v238_v17  ;;  %v380_v53 = vadd.f32 %v379_v49, %v365_v48 }
  0xfd   :  { %v381_v54 = vadd.f32 %v380_v53, %v366_v51  ;;  %v344_v55 = vadd.f32 %v343_v52, %v241_v21 }
  0xff   :  { %v345_v58 = vadd.f32 %v462_v15, %v344_v55  ;;  %v382_v59 = vadd.f32 %v381_v54, %v367_v56 }
 0x101   :  { %v383_v61 = vadd.f32 %v382_v59, %v368_v57  ;;  %v346_v62 = vadd.f32 %v463_v19, %v345_v58 }
 0x103   :  { %v347_v0 = vadd.f32 %v346_v62, %v254_v34  ;;  %v384_v1 = vadd.f32 %v383_v61, %v369_v60 }
 0x105   :  { %v385_v2 = vadd.f32 %v384_v1, %v370_v63  ;;  %v348_v3 = vadd.f32 %v347_v0, %v257_v41 }
 0x107   :  { %v349_v6 = vadd.f32 %v466_v32, %v348_v3  ;;  %v386_v7 = vadd.f32 %v385_v2, %v371_v4 }
 0x109   :  { %v350_v9 = vadd.f32 %v467_v39, %v349_v6  ;;  %v387_v10 = vadd.f32 %v386_v7, %v372_v5 }
 0x10b   :  { %v351_v11 = vrot.slane %v350_v9, 4  ;;  %v388_v12 = vadd.f32 %v387_v10, %v373_v8 }
 0x10d   :  { %v352_v13 = vadd.f32 %v351_v11, %v350_v9  ;;  %v389_v14 = vrot.slane %v388_v12, 4 }
 0x10f   :  { %v353_v15 = vrot.slane %v352_v13, 2  ;;  %v390_v16 = vadd.f32 %v389_v14, %v388_v12 }
 0x111   :  { %v354_v17 = vadd.f32 %v353_v15, %v352_v13  ;;  %v391_v18 = vrot.slane %v390_v16, 2 }
 0x113   :  { %v355_v19 = vrot.slane %v354_v17, 1  ;;  %v392_v20 = vadd.f32 %v391_v18, %v390_v16 }
 0x115   :  { %v356_v21 = vadd.f32 %v355_v19, %v354_v17  ;;  %v393_v22 = vrot.slane %v392_v20, 1 }
 0x117   :  { %357 = vst [vmem:[%s622_s3] sm:$0x1] %v356_v21  ;;  %v394_v23 = vadd.f32 %v393_v22, %v392_v20 }
 0x119   :  { %395 = vst [vmem:[%s623_s4] sm:$0x1] %v394_v23 }

// kernel: encoder_forward.20
= control target key start
LH: loop header
LB: loop body
LE: loop exit
PB: predicated region body
PF: predicated region fallthrough
CT: control target
= control target key end

     0   :  { %vm50_vm0 = vcmask 261120   ;;  %s711_s2 = inlined_call_operand.vmem [shape: f32[32,128], index: 2, kind: input, shape index: {}]   ;;  %s712_s1 = inlined_call_operand.vmem [shape: f32[128,32], index: 1, kind: input, shape index: {}]   ;;  %s713_s0 = inlined_call_operand.vmem [shape: f32[128,128], index: 0, kind: input, shape index: {}]   ;;  %s714_s4 = inlined_call_operand.vmem [shape: f32[1,128], index: 4, kind: input, shape index: {}]   ;;  %s715_s5 = inlined_call_operand.vmem [shape: f32[1,128], index: 5, kind: input, shape index: {}]   ;;  %s716_s3 = inlined_call_operand.vmem [shape: f32[1,128], index: 3, kind: input, shape index: {}]   ;;  %s717_s6 = inlined_call_operand.vmem [shape: f32[128,128], index: 6, kind: output, shape index: {}]  }
   0x1   :  { %v39_v0 = vld [vmem:[%s711_s2] sm:$0xff]  ;;  %v40_v1 = vld [vmem:[%s711_s2 + $0x8] sm:$0xff]  ;;  %v41_v2 = vld [vmem:[%s711_s2 + $0x10] sm:$0xff] }
   0x2   :  { %v429_v3 = vpack.c.bf16 %v40_v1, %v39_v0  ;;  %v42_v4 = vld [vmem:[%s711_s2 + $0x18] sm:$0xff]  ;;  %v23_v5 = vld [vmem:[%s712_s1] sm:$0xff]  ;;  %v24_v8 = vld [vmem:[%s712_s1 + $0x8] sm:$0xff] }
   0x3   :  { %v31_v6 = vld [vmem:[%s712_s1 + $0x40] sm:$0xff]  ;;  %v433_v7 = vpack.c.bf16 %v42_v4, %v41_v2  ;;  %405 = vmatprep.mubr.msk.f32.mxu0 %vm50_vm0, %v23_v5  ;;  %v32_v9 = vld [vmem:[%s712_s1 + $0x48] sm:$0xff]  ;;  %v25_v10 = vld [vmem:[%s712_s1 + $0x10] sm:$0xff] }
   0x4   :  { %417 = vmatprep.mubr.msk.f32.mxu1 %vm50_vm0, %v31_v6  ;;  %430 = vmatprep.subr.bf16.mxu0 %v429_v3  ;;  %v33_v11 = vld [vmem:[%s712_s1 + $0x50] sm:$0xff]  ;;  %v26_v12 = vld [vmem:[%s712_s1 + $0x18] sm:$0xff]  ;;  %v27_v14 = vld [vmem:[%s712_s1 + $0x20] sm:$0xff] }
   0x5   :  { %437 = vmatprep.subr.bf16.mxu1 %v429_v3  ;;  %432 = vmatpush3.bf16.msra.mxu0 %v429_v3  ;;  %v34_v13 = vld [vmem:[%s712_s1 + $0x58] sm:$0xff]  ;;  %v35_v15 = vld [vmem:[%s712_s1 + $0x60] sm:$0xff]  ;;  %v28_v16 = vld [vmem:[%s712_s1 + $0x28] sm:$0xff] }
   0x6   :  { %439 = vmatpush3.bf16.msra.mxu1 %v429_v3  ;;  %434 = vmatprep.subr.bf16.mxu0 %v433_v7  ;;  %v36_v17 = vld [vmem:[%s712_s1 + $0x68] sm:$0xff]  ;;  %v29_v18 = vld [vmem:[%s712_s1 + $0x30] sm:$0xff]  ;;  %v30_v20 = vld [vmem:[%s712_s1 + $0x38] sm:$0xff] }
   0x7   :  { %438 = vmatprep.subr.bf16.mxu1 %v433_v7  ;;  %v37_v19 = vld [vmem:[%s712_s1 + $0x70] sm:$0xff]  ;;  %v38_v21 = vld [vmem:[%s712_s1 + $0x78] sm:$0xff]  ;;  %v245_v22 = vld [vmem:[%s713_s0 + $0x8] sm:$0xff] }
   0x8   :  { %v558_v23 = vld [vmem:[%s714_s4] ss:$0 sm:$0xff]  ;;  %v253_v24 = vld [vmem:[%s713_s0 + $0x48] sm:$0xff]  ;;  %v247_v27 = vld [vmem:[%s713_s0 + $0x18] sm:$0xff] }
   0x9   :  { %436 = vmatpush3.bf16.msra.mxu0 %v433_v7  ;;  %v244_v25 = vld [vmem:[%s713_s0] sm:$0xff]  ;;  %v255_v28 = vld [vmem:[%s713_s0 + $0x58] sm:$0xff]  ;;  %v268_v29 = vmul.f32 %v558_v23, %v245_v22  ;;  %v276_v30 = vmul.f32 %v558_v23, %v253_v24  ;;  %v246_v31 = vld [vmem:[%s713_s0 + $0x10] sm:$0xff]  ;;  %v270_v38 = vmul.f32 %v558_v23, %v247_v27 }
   0xa   :  { %440 = vmatpush3.bf16.msra.mxu1 %v433_v7  ;;  %v252_v26 = vld [vmem:[%s713_s0 + $0x40] sm:$0xff]  ;;  %v254_v32 = vld [vmem:[%s713_s0 + $0x50] sm:$0xff]  ;;  %v267_v34 = vmul.f32 %v558_v23, %v244_v25  ;;  %v249_v36 = vld [vmem:[%s713_s0 + $0x28] sm:$0xff]  ;;  %v278_v39 = vmul.f32 %v558_v23, %v255_v28  ;;  %v269_v43 = vmul.f32 %v558_v23, %v246_v31 }
   0xb   :  { %v586_v33 = vld [vmem:[%s715_s5] ss:$0 sm:$0xff]  ;;  %v275_v35 = vmul.f32 %v558_v23, %v252_v26  ;;  %v257_v37 = vld [vmem:[%s713_s0 + $0x68] sm:$0xff]  ;;  %v277_v44 = vmul.f32 %v558_v23, %v254_v32  ;;  %v272_v47 = vmul.f32 %v558_v23, %v249_v36 }
   0xc   :  { %406 = vmatmul.mubr.msk.f32.vlgmr.msra.gmra.mrb[0].mxu0 %vm50_vm0, %v24_v8  ;;  %v248_v40 = vld [vmem:[%s713_s0 + $0x20] sm:$0xff]  ;;  %v291_v45 = vadd.f32 %v586_v33, %v268_v29  ;;  %v299_v46 = vadd.f32 %v586_v33, %v276_v30  ;;  %v280_v48 = vmul.f32 %v558_v23, %v257_v37  ;;  %v290_v51 = vadd.f32 %v586_v33, %v267_v34 }
   0xd   :  { %418 = vmatmul.mubr.msk.f32.vlgmr.msra.gmra.mrb[0].mxu1 %vm50_vm0, %v32_v9  ;;  %408 = vmatprep.mubr.msk.f32.mxu0 %vm50_vm0, %v25_v10  ;;  %v256_v41 = vld [vmem:[%s713_s0 + $0x60] sm:$0xff]  ;;  %v298_v52 = vadd.f32 %v586_v33, %v275_v35  ;;  %v271_v53 = vmul.f32 %v558_v23, %v248_v40  ;;  %v293_v59 = vadd.f32 %v586_v33, %v270_v38 }
   0xe   :  { %420 = vmatprep.mubr.msk.f32.mxu1 %vm50_vm0, %v33_v11  ;;  %v607_v42 = vld [vmem:[%s716_s3] ss:$0 sm:$0xff]  ;;  %v279_v54 = vmul.f32 %v558_v23, %v256_v41  ;;  %v301_v60 = vadd.f32 %v586_v33, %v278_v39  ;;  %v292_v63 = vadd.f32 %v586_v33, %v269_v43  ;;  %v300_v0 = vadd.f32 %v586_v33, %v277_v44  ;;  %v251_v11 = vld [vmem:[%s713_s0 + $0x38] sm:$0xff] }
   0xf   :  { %v295_v3 = vadd.f32 %v586_v33, %v272_v47  ;;  %v303_v4 = vadd.f32 %v586_v33, %v280_v48  ;;  %v294_v9 = vadd.f32 %v586_v33, %v271_v53  ;;  %v274_v28 = vmul.f32 %v558_v23, %v251_v11 }
  0x10   :  { %409 = vmatmul.mubr.msk.f32.gmra.mrb[2].mxu0 %vm50_vm0, %v26_v12  ;;  %v302_v10 = vadd.f32 %v586_v33, %v279_v54  ;;  %v259_v12 = vld [vmem:[%s713_s0 + $0x78] sm:$0xff] }
  0x11   :  { %421 = vmatmul.mubr.msk.f32.gmra.mrb[2].mxu1 %vm50_vm0, %v34_v13  ;;  %411 = vmatprep.mubr.msk.f32.mxu0 %vm50_vm0, %v27_v14  ;;  %v282_v29 = vmul.f32 %v558_v23, %v259_v12 }
  0x12   :  { %423 = vmatprep.mubr.msk.f32.mxu1 %vm50_vm0, %v35_v15 }
  0x14   :  { %412 = vmatmul.mubr.msk.f32.gmra.mrb[4].mxu0 %vm50_vm0, %v28_v16 }
  0x15   :  { %424 = vmatmul.mubr.msk.f32.gmra.mrb[4].mxu1 %vm50_vm0, %v36_v17  ;;  %414 = vmatprep.mubr.msk.f32.mxu0 %vm50_vm0, %v29_v18 }
  0x16   :  { %426 = vmatprep.mubr.msk.f32.mxu1 %vm50_vm0, %v37_v19  ;;  %v250_v19 = vld [vmem:[%s713_s0 + $0x30] sm:$0xff] }
  0x17   :  { %v273_v35 = vmul.f32 %v558_v23, %v250_v19 }
  0x18   :  { %415 = vmatmul.mubr.msk.f32.gmra.mrb[6].mxu0 %vm50_vm0, %v30_v20  ;;  %v258_v20 = vld [vmem:[%s713_s0 + $0x70] sm:$0xff] }
  0x19   :  { %427 = vmatmul.mubr.msk.f32.gmra.mrb[6].mxu1 %vm50_vm0, %v38_v21  ;;  %v281_v36 = vmul.f32 %v558_v23, %v258_v20 }
  0xdf   :  { %v407_v49 = vpop.f32.mrb[0].mxu0 }
  0xe0   :  { %v419_v50 = vpop.f32.mrb[0].mxu1  ;;  %v171_v55 = vadd.f32 %v407_v49, %v607_v42  ;;  %v165_v57 = vpop.f32.mrb[1].mxu0  ;;  %v297_v49 = vadd.f32 %v586_v33, %v274_v28 }
  0xe1   :  { %v211_v56 = vadd.f32 %v419_v50, %v607_v42  ;;  %v205_v58 = vpop.f32.mrb[1].mxu1  ;;  %v166_v61 = vadd.f32 %v607_v42, %v165_v57  ;;  %v305_v50 = vadd.f32 %v586_v33, %v282_v29 }
  0xe2   :  { %v206_v62 = vadd.f32 %v607_v42, %v205_v58  ;;  %v307_v1 = vadd.f32 %v291_v45, %v171_v55  ;;  %v296_v55 = vadd.f32 %v586_v33, %v273_v35 }
  0xe3   :  { %v315_v2 = vadd.f32 %v299_v46, %v211_v56  ;;  %v306_v5 = vadd.f32 %v290_v51, %v166_v61  ;;  %v410_v7 = vpop.f32.mrb[2].mxu0  ;;  %v304_v56 = vadd.f32 %v586_v33, %v281_v36 }
  0xe4   :  { %v314_v6 = vadd.f32 %v298_v52, %v206_v62  ;;  %v422_v8 = vpop.f32.mrb[2].mxu1  ;;  %v323_v13 = vmax.f32 %v307_v1, 0.0  ;;  %v181_v15 = vadd.f32 %v410_v7, %v607_v42  ;;  %v175_v17 = vpop.f32.mrb[3].mxu0 }
  0xe5   :  { %v331_v14 = vmax.f32 %v315_v2, 0.0  ;;  %v221_v16 = vadd.f32 %v422_v8, %v607_v42  ;;  %v215_v18 = vpop.f32.mrb[3].mxu1  ;;  %v322_v21 = vmax.f32 %v306_v5, 0.0  ;;  %v176_v24 = vadd.f32 %v607_v42, %v175_v17 }
  0xe6   :  { %v330_v22 = vmax.f32 %v314_v6, 0.0  ;;  %v216_v25 = vadd.f32 %v607_v42, %v215_v18  ;;  %339 = vst [vmem:[%s717_s6 + $0x8] sm:$0xff] %v323_v13  ;;  %v309_v26 = vadd.f32 %v293_v59, %v181_v15 }
  0xe7   :  { %347 = vst [vmem:[%s717_s6 + $0x48] sm:$0xff] %v331_v14  ;;  %v317_v27 = vadd.f32 %v301_v60, %v221_v16  ;;  %338 = vst [vmem:[%s717_s6] sm:$0xff] %v322_v21  ;;  %v308_v30 = vadd.f32 %v292_v63, %v176_v24  ;;  %v413_v32 = vpop.f32.mrb[4].mxu0 }
  0xe8   :  { %346 = vst [vmem:[%s717_s6 + $0x40] sm:$0xff] %v330_v22  ;;  %v316_v31 = vadd.f32 %v300_v0, %v216_v25  ;;  %v425_v34 = vpop.f32.mrb[4].mxu1  ;;  %v325_v37 = vmax.f32 %v309_v26, 0.0  ;;  %v191_v39 = vadd.f32 %v413_v32, %v607_v42  ;;  %v185_v41 = vpop.f32.mrb[5].mxu0 }
  0xe9   :  { %v333_v38 = vmax.f32 %v317_v27, 0.0  ;;  %v231_v40 = vadd.f32 %v425_v34, %v607_v42  ;;  %v225_v43 = vpop.f32.mrb[5].mxu1  ;;  %v324_v44 = vmax.f32 %v308_v30, 0.0  ;;  %v186_v46 = vadd.f32 %v607_v42, %v185_v41 }
  0xea   :  { %v332_v45 = vmax.f32 %v316_v31, 0.0  ;;  %v226_v47 = vadd.f32 %v607_v42, %v225_v43  ;;  %341 = vst [vmem:[%s717_s6 + $0x18] sm:$0xff] %v325_v37  ;;  %v311_v23 = vadd.f32 %v295_v3, %v191_v39 }
  0xeb   :  { %349 = vst [vmem:[%s717_s6 + $0x58] sm:$0xff] %v333_v38  ;;  %v319_v48 = vadd.f32 %v303_v4, %v231_v40  ;;  %340 = vst [vmem:[%s717_s6 + $0x10] sm:$0xff] %v324_v44  ;;  %v310_v51 = vadd.f32 %v294_v9, %v186_v46  ;;  %v416_v53 = vpop.f32.mrb[6].mxu0 }
  0xec   :  { %348 = vst [vmem:[%s717_s6 + $0x50] sm:$0xff] %v332_v45  ;;  %v318_v52 = vadd.f32 %v302_v10, %v226_v47  ;;  %v428_v54 = vpop.f32.mrb[6].mxu1  ;;  %v327_v57 = vmax.f32 %v311_v23, 0.0  ;;  %v201_v59 = vadd.f32 %v416_v53, %v607_v42  ;;  %v195_v61 = vpop.f32.mrb[7].mxu0 }
  0xed   :  { %v335_v58 = vmax.f32 %v319_v48, 0.0  ;;  %v241_v60 = vadd.f32 %v428_v54, %v607_v42  ;;  %v235_v62 = vpop.f32.mrb[7].mxu1  ;;  %v326_v63 = vmax.f32 %v310_v51, 0.0  ;;  %v196_v1 = vadd.f32 %v607_v42, %v195_v61 }
  0xee   :  { %v334_v0 = vmax.f32 %v318_v52, 0.0  ;;  %v236_v2 = vadd.f32 %v607_v42, %v235_v62  ;;  %343 = vst [vmem:[%s717_s6 + $0x28] sm:$0xff] %v327_v57  ;;  %v313_v33 = vadd.f32 %v297_v49, %v201_v59 }
  0xef   :  { %351 = vst [vmem:[%s717_s6 + $0x68] sm:$0xff] %v335_v58  ;;  %v321_v3 = vadd.f32 %v305_v50, %v241_v60  ;;  %342 = vst [vmem:[%s717_s6 + $0x20] sm:$0xff] %v326_v63  ;;  %v312_v4 = vadd.f32 %v296_v55, %v196_v1 }
  0xf0   :  { %350 = vst [vmem:[%s717_s6 + $0x60] sm:$0xff] %v334_v0  ;;  %v320_v42 = vadd.f32 %v304_v56, %v236_v2  ;;  %v329_v5 = vmax.f32 %v313_v33, 0.0 }
  0xf1   :  { %v337_v6 = vmax.f32 %v321_v3, 0.0  ;;  %v328_v7 = vmax.f32 %v312_v4, 0.0 }
  0xf2   :  { %v336_v8 = vmax.f32 %v320_v42, 0.0  ;;  %345 = vst [vmem:[%s717_s6 + $0x38] sm:$0xff] %v329_v5 }
  0xf3   :  { %353 = vst [vmem:[%s717_s6 + $0x78] sm:$0xff] %v337_v6  ;;  %344 = vst [vmem:[%s717_s6 + $0x30] sm:$0xff] %v328_v7 }
  0xf4   :  { %352 = vst [vmem:[%s717_s6 + $0x70] sm:$0xff] %v336_v8 }

// kernel: encoder_forward.22
= control target key start
LH: loop header
LB: loop body
LE: loop exit
PB: predicated region body
PF: predicated region fallthrough
CT: control target
= control target key end

     0   :  { %s104_s0 = inlined_call_operand.vmem [shape: f32[32,128], index: 0, kind: input, shape index: {}]   ;;  %s105_s1 = inlined_call_operand.vmem [shape: f32[1,128], index: 1, kind: input, shape index: {}]   ;;  %s106_s2 = inlined_call_operand.vmem [shape: f32[1,128], index: 2, kind: input, shape index: {}]   ;;  %s107_s3 = inlined_call_operand.vmem [shape: f32[32,128], index: 3, kind: output, shape index: {}]  }
   0x1   :  { %v14_v0 = vld [vmem:[%s104_s0] sm:$0xff]  ;;  %v15_v4 = vld [vmem:[%s104_s0 + $0x8] sm:$0xff]  ;;  %v16_v5 = vld [vmem:[%s104_s0 + $0x10] sm:$0xff] }
   0x2   :  { %v52_v1 = vld [vmem:[%s105_s1] ss:$0 sm:$0xff]  ;;  %v17_v6 = vld [vmem:[%s104_s0 + $0x18] sm:$0xff] }
   0x3   :  { %v53_v2 = vld [vmem:[%s106_s2] ss:$0 sm:$0xff]  ;;  %v25_v3 = vmul.f32 %v52_v1, %v14_v0  ;;  %v26_v7 = vmul.f32 %v52_v1, %v15_v4  ;;  %v27_v8 = vmul.f32 %v52_v1, %v16_v5  ;;  %v28_v9 = vmul.f32 %v52_v1, %v17_v6 }
   0x5   :  { %v36_v10 = vadd.f32 %v53_v2, %v25_v3  ;;  %v37_v11 = vadd.f32 %v53_v2, %v26_v7  ;;  %v38_v12 = vadd.f32 %v53_v2, %v27_v8  ;;  %v39_v13 = vadd.f32 %v53_v2, %v28_v9 }
   0x7   :  { %v40_v14 = vmax.f32 %v36_v10, 0.0  ;;  %v41_v15 = vmax.f32 %v37_v11, 0.0  ;;  %v42_v16 = vmax.f32 %v38_v12, 0.0  ;;  %v43_v17 = vmax.f32 %v39_v13, 0.0 }
   0x9   :  { %44 = vst [vmem:[%s107_s3] sm:$0xff] %v40_v14  ;;  %45 = vst [vmem:[%s107_s3 + $0x8] sm:$0xff] %v41_v15 }
   0xa   :  { %46 = vst [vmem:[%s107_s3 + $0x10] sm:$0xff] %v42_v16  ;;  %47 = vst [vmem:[%s107_s3 + $0x18] sm:$0xff] %v43_v17 }

// kernel: encoder_forward.21
= control target key start
LH: loop header
LB: loop body
LE: loop exit
PB: predicated region body
PF: predicated region fallthrough
CT: control target
= control target key end

     0   :  { %s1425_s1 = inlined_call_operand.vmem [shape: bf16[1024,128], index: 1, kind: input, shape index: {}]   ;;  %s1426_s0 = inlined_call_operand.vmem [shape: bf16[32,1024], index: 0, kind: input, shape index: {}]   ;;  %s1427_s2 = inlined_call_operand.vmem [shape: f32[32,128], index: 2, kind: output, shape index: {0}]   ;;  %s1428_s3 = inlined_call_operand.vmem [shape: f32[1,128], index: 3, kind: output, shape index: {1}]   ;;  %s1429_s4 = inlined_call_operand.vmem [shape: f32[1,128], index: 4, kind: output, shape index: {2}]  }
   0x1   :  { %v1078_v0 = vld [vmem:[%s1425_s1 + $0x40] sm:$0xff]   ;;  %v1082_v4 = vld [vmem:[%s1425_s1 + $0x48] sm:$0xff]   ;;  %v1086_v8 = vld [vmem:[%s1425_s1 + $0x50] sm:$0xff]  }
   0x2   :  { %v1079_v1 = vld [vmem:[%s1425_s1 + $0xc0] sm:$0xff]   ;;  %966 = vmatprep.subr.bf16.mxu0 %v1078_v0  ;;  %v1083_v5 = vld [vmem:[%s1425_s1 + $0xc8] sm:$0xff]   ;;  %v1087_v9 = vld [vmem:[%s1425_s1 + $0xd0] sm:$0xff]  }
   0x3   :  { %v1080_v2 = vld [vmem:[%s1425_s1] sm:$0xff]   ;;  %994 = vmatprep.subr.bf16.mxu1 %v1079_v1  ;;  %v1084_v6 = vld [vmem:[%s1425_s1 + $0x8] sm:$0xff]   ;;  %v1088_v10 = vld [vmem:[%s1425_s1 + $0x10] sm:$0xff]  }
   0x4   :  { %v1081_v3 = vld [vmem:[%s1425_s1 + $0x80] sm:$0xff]   ;;  %967 = vmatpush3.bf16.msra.mxu0 %v1080_v2  ;;  %v1085_v7 = vld [vmem:[%s1425_s1 + $0x88] sm:$0xff]   ;;  %v1089_v11 = vld [vmem:[%s1425_s1 + $0x90] sm:$0xff]  }
   0x5   :  { %995 = vmatpush3.bf16.msra.mxu1 %v1081_v3  ;;  %968 = vmatprep.subr.bf16.mxu0 %v1082_v4  ;;  %v1090_v12 = vld [vmem:[%s1425_s1 + $0x58] sm:$0xff]   ;;  %v1094_v16 = vld [vmem:[%s1425_s1 + $0x60] sm:$0xff]   ;;  %v1098_v20 = vld [vmem:[%s1425_s1 + $0x68] sm:$0xff]  }
   0x6   :  { %996 = vmatprep.subr.bf16.mxu1 %v1083_v5  ;;  %v1091_v13 = vld [vmem:[%s1425_s1 + $0xd8] sm:$0xff]   ;;  %v1095_v17 = vld [vmem:[%s1425_s1 + $0xe0] sm:$0xff]   ;;  %v1099_v21 = vld [vmem:[%s1425_s1 + $0xe8] sm:$0xff]  }
   0x7   :  { %v1092_v14 = vld [vmem:[%s1425_s1 + $0x18] sm:$0xff]   ;;  %v1096_v18 = vld [vmem:[%s1425_s1 + $0x20] sm:$0xff]   ;;  %v1100_v22 = vld [vmem:[%s1425_s1 + $0x28] sm:$0xff]  }
   0x8   :  { %969 = vmatpush3.bf16.msra.mxu0 %v1084_v6  ;;  %v1093_v15 = vld [vmem:[%s1425_s1 + $0x98] sm:$0xff]   ;;  %v1097_v19 = vld [vmem:[%s1425_s1 + $0xa0] sm:$0xff]   ;;  %v1101_v23 = vld [vmem:[%s1425_s1 + $0xa8] sm:$0xff]  }
   0x9   :  { %997 = vmatpush3.bf16.msra.mxu1 %v1085_v7  ;;  %970 = vmatprep.subr.bf16.mxu0 %v1086_v8  ;;  %v1102_v24 = vld [vmem:[%s1425_s1 + $0x70] sm:$0xff]   ;;  %v1106_v28 = vld [vmem:[%s1425_s1 + $0x78] sm:$0xff]   ;;  %v27_v32 = vld [vmem:[%s1426_s0] sm:$0xff] }
   0xa   :  { %998 = vmatprep.subr.bf16.mxu1 %v1087_v9  ;;  %v1103_v25 = vld [vmem:[%s1425_s1 + $0xf0] sm:$0xff]   ;;  %v1107_v29 = vld [vmem:[%s1425_s1 + $0xf8] sm:$0xff]   ;;  %v31_v33 = vld [vmem:[%s1426_s0 + $0x20] sm:$0xff] }
   0xb   :  { %v1104_v26 = vld [vmem:[%s1425_s1 + $0x30] sm:$0xff]   ;;  %v1108_v30 = vld [vmem:[%s1425_s1 + $0x38] sm:$0xff]   ;;  %v28_v34 = vld [vmem:[%s1426_s0 + $0x8] sm:$0xff]  ;;  %v886_v35 = vcombine.low %v27_v32, %v31_v33  ;;  %v887_v36 = vcombine.high %v27_v32, %v31_v33 }
   0xc   :  { %971 = vmatpush3.bf16.msra.mxu0 %v1088_v10  ;;  %v1105_v27 = vld [vmem:[%s1425_s1 + $0xb0] sm:$0xff]   ;;  %v1109_v31 = vld [vmem:[%s1425_s1 + $0xb8] sm:$0xff]   ;;  %v32_v37 = vld [vmem:[%s1426_s0 + $0x28] sm:$0xff] }
   0xd   :  { %999 = vmatpush3.bf16.msra.mxu1 %v1089_v11  ;;  %972 = vmatprep.subr.bf16.mxu0 %v1090_v12  ;;  %v888_v38 = vcombine.low %v28_v34, %v32_v37  ;;  %v889_v39 = vcombine.high %v28_v34, %v32_v37  ;;  %v1110_v40 = vld [vmem:[%s1425_s1 + $0x140] sm:$0xff]   ;;  %v1114_v44 = vld [vmem:[%s1425_s1 + $0x148] sm:$0xff]   ;;  %v1118_v48 = vld [vmem:[%s1425_s1 + $0x150] sm:$0xff]  }
   0xe   :  { %1000 = vmatprep.subr.bf16.mxu1 %v1091_v13  ;;  %667 = vmatprep.mubr.bf16.mxu0 %v887_v36  ;;  %v1111_v41 = vld [vmem:[%s1425_s1 + $0x1c0] sm:$0xff]   ;;  %v1115_v45 = vld [vmem:[%s1425_s1 + $0x1c8] sm:$0xff]   ;;  %v1119_v49 = vld [vmem:[%s1425_s1 + $0x1d0] sm:$0xff]  }
   0xf   :  { %716 = vmatprep.mubr.bf16.mxu1 %v889_v39  ;;  %v1112_v42 = vld [vmem:[%s1425_s1 + $0x100] sm:$0xff]   ;;  %v1116_v46 = vld [vmem:[%s1425_s1 + $0x108] sm:$0xff]   ;;  %v1120_v50 = vld [vmem:[%s1425_s1 + $0x110] sm:$0xff]  }
  0x10   :  { %973 = vmatpush3.bf16.msra.mxu0 %v1092_v14  ;;  %v1113_v43 = vld [vmem:[%s1425_s1 + $0x180] sm:$0xff]   ;;  %v1117_v47 = vld [vmem:[%s1425_s1 + $0x188] sm:$0xff]   ;;  %v1121_v51 = vld [vmem:[%s1425_s1 + $0x190] sm:$0xff]  }
  0x11   :  { %1001 = vmatpush3.bf16.msra.mxu1 %v1093_v15  ;;  %974 = vmatprep.subr.bf16.mxu0 %v1094_v16  ;;  %v1122_v52 = vld [vmem:[%s1425_s1 + $0x158] sm:$0xff]   ;;  %v1126_v56 = vld [vmem:[%s1425_s1 + $0x160] sm:$0xff]   ;;  %v36_v63 = vld [vmem:[%s1426_s0 + $0x48] sm:$0xff] }
  0x12   :  { %1002 = vmatprep.subr.bf16.mxu1 %v1095_v17  ;;  %v1123_v53 = vld [vmem:[%s1425_s1 + $0x1d8] sm:$0xff]   ;;  %v1127_v57 = vld [vmem:[%s1425_s1 + $0x1e0] sm:$0xff]   ;;  %v40_v0 = vld [vmem:[%s1426_s0 + $0x68] sm:$0xff] }
  0x13   :  { %v1124_v54 = vld [vmem:[%s1425_s1 + $0x118] sm:$0xff]   ;;  %v1128_v58 = vld [vmem:[%s1425_s1 + $0x120] sm:$0xff]   ;;  %v897_v2 = vcombine.high %v36_v63, %v40_v0  ;;  %v1130_v3 = vld [vmem:[%s1425_s1 + $0x168] sm:$0xff]   ;;  %v896_v4 = vcombine.low %v36_v63, %v40_v0 }
  0x14   :  { %975 = vmatpush3.bf16.msra.mxu0 %v1096_v18  ;;  %v1125_v55 = vld [vmem:[%s1425_s1 + $0x198] sm:$0xff]   ;;  %v1129_v59 = vld [vmem:[%s1425_s1 + $0x1a0] sm:$0xff]   ;;  %v1131_v5 = vld [vmem:[%s1425_s1 + $0x1e8] sm:$0xff]  }
  0x15   :  { %1003 = vmatpush3.bf16.msra.mxu1 %v1097_v19  ;;  %976 = vmatprep.subr.bf16.mxu0 %v1098_v20  ;;  %v35_v60 = vld [vmem:[%s1426_s0 + $0x40] sm:$0xff]  ;;  %v1132_v6 = vld [vmem:[%s1425_s1 + $0x128] sm:$0xff]   ;;  %v1134_v8 = vld [vmem:[%s1425_s1 + $0x170] sm:$0xff]  }
  0x16   :  { %1004 = vmatprep.subr.bf16.mxu1 %v1099_v21  ;;  %v39_v61 = vld [vmem:[%s1426_s0 + $0x60] sm:$0xff]  ;;  %v1133_v7 = vld [vmem:[%s1425_s1 + $0x1a8] sm:$0xff]   ;;  %v1135_v9 = vld [vmem:[%s1425_s1 + $0x1f0] sm:$0xff]  }
  0x17   :  { %v895_v62 = vcombine.high %v35_v60, %v39_v61  ;;  %v894_v1 = vcombine.low %v35_v60, %v39_v61  ;;  %v1136_v10 = vld [vmem:[%s1425_s1 + $0x130] sm:$0xff]   ;;  %v1138_v12 = vld [vmem:[%s1425_s1 + $0x178] sm:$0xff]  }
  0x18   :  { %977 = vmatpush3.bf16.msra.mxu0 %v1100_v22  ;;  %v1137_v11 = vld [vmem:[%s1425_s1 + $0x1b0] sm:$0xff]   ;;  %v1139_v13 = vld [vmem:[%s1425_s1 + $0x1f8] sm:$0xff]  }
  0x19   :  { %1005 = vmatpush3.bf16.msra.mxu1 %v1101_v23  ;;  %978 = vmatprep.subr.bf16.mxu0 %v1102_v24  ;;  %v1140_v14 = vld [vmem:[%s1425_s1 + $0x138] sm:$0xff]   ;;  %v29_v16 = vld [vmem:[%s1426_s0 + $0x10] sm:$0xff] }
  0x1a   :  { %1006 = vmatprep.subr.bf16.mxu1 %v1103_v25  ;;  %v1141_v15 = vld [vmem:[%s1425_s1 + $0x1b8] sm:$0xff]   ;;  %v33_v17 = vld [vmem:[%s1426_s0 + $0x30] sm:$0xff] }
  0x1b   :  { %v30_v18 = vld [vmem:[%s1426_s0 + $0x18] sm:$0xff]  ;;  %v890_v20 = vcombine.low %v29_v16, %v33_v17  ;;  %v891_v21 = vcombine.high %v29_v16, %v33_v17  ;;  %v37_v24 = vld [vmem:[%s1426_s0 + $0x50] sm:$0xff] }
  0x1c   :  { %979 = vmatpush3.bf16.msra.mxu0 %v1104_v26  ;;  %v34_v19 = vld [vmem:[%s1426_s0 + $0x38] sm:$0xff]  ;;  %v41_v25 = vld [vmem:[%s1426_s0 + $0x70] sm:$0xff] }
  0x1d   :  { %1007 = vmatpush3.bf16.msra.mxu1 %v1105_v27  ;;  %980 = vmatprep.subr.bf16.mxu0 %v1106_v28  ;;  %v892_v22 = vcombine.low %v30_v18, %v34_v19  ;;  %v893_v23 = vcombine.high %v30_v18, %v34_v19  ;;  %v38_v26 = vld [vmem:[%s1426_s0 + $0x58] sm:$0xff]  ;;  %v899_v27 = vcombine.high %v37_v24, %v41_v25 }
  0x1e   :  { %1008 = vmatprep.subr.bf16.mxu1 %v1107_v29  ;;  %v42_v28 = vld [vmem:[%s1426_s0 + $0x78] sm:$0xff] }
  0x1f   :  { %v901_v29 = vcombine.high %v38_v26, %v42_v28 }
  0x20   :  { %981 = vmatpush3.bf16.msra.mxu0 %v1108_v30  ;;  %v898_v30 = vcombine.low %v37_v24, %v41_v25 }
  0x21   :  { %1009 = vmatpush3.bf16.msra.mxu1 %v1109_v31  ;;  %1022 = vmatprep.subr.bf16.mxu0 %v1110_v40  ;;  %v900_v31 = vcombine.low %v38_v26, %v42_v28 }
  0x22   :  { %1050 = vmatprep.subr.bf16.mxu1 %v1111_v41 }
  0x23   :  { %668 = vmatmul.mubr.bf16.vlgmr.msra.gmra.mrb[0].mxu0 %v886_v35 }
  0x24   :  { %717 = vmatmul.mubr.bf16.vlgmr.msra.gmra.mrb[0].mxu1 %v888_v38  ;;  %1023 = vmatpush3.bf16.msra.mxu0 %v1112_v42 }
  0x25   :  { %1051 = vmatpush3.bf16.msra.mxu1 %v1113_v43  ;;  %1024 = vmatprep.subr.bf16.mxu0 %v1114_v44 }
  0x26   :  { %1052 = vmatprep.subr.bf16.mxu1 %v1115_v45  ;;  %675 = vmatprep.mubr.bf16.mxu0 %v895_v62 }
  0x27   :  { %724 = vmatprep.mubr.bf16.mxu1 %v897_v2 }
  0x28   :  { %1025 = vmatpush3.bf16.msra.mxu0 %v1116_v46 }
  0x29   :  { %1053 = vmatpush3.bf16.msra.mxu1 %v1117_v47  ;;  %1026 = vmatprep.subr.bf16.mxu0 %v1118_v48 }
  0x2a   :  { %1054 = vmatprep.subr.bf16.mxu1 %v1119_v49 }
  0x2b   :  { %676 = vmatmul.mubr.bf16.gmra.mrb[4].mxu0 %v894_v1 }
  0x2c   :  { %1027 = vmatpush3.bf16.msra.mxu0 %v1120_v50  ;;  %725 = vmatmul.mubr.bf16.gmra.mrb[4].mxu1 %v896_v4 }
  0x2d   :  { %1055 = vmatpush3.bf16.msra.mxu1 %v1121_v51  ;;  %1028 = vmatprep.subr.bf16.mxu0 %v1122_v52 }
  0x2e   :  { %1056 = vmatprep.subr.bf16.mxu1 %v1123_v53  ;;  %765 = vmatprep.mubr.bf16.mxu0 %v891_v21 }
  0x2f   :  { %814 = vmatprep.mubr.bf16.mxu1 %v893_v23 }
  0x30   :  { %1029 = vmatpush3.bf16.msra.mxu0 %v1124_v54 }
  0x31   :  { %1057 = vmatpush3.bf16.msra.mxu1 %v1125_v55  ;;  %1030 = vmatprep.subr.bf16.mxu0 %v1126_v56 }
  0x32   :  { %1058 = vmatprep.subr.bf16.mxu1 %v1127_v57 }
  0x34   :  { %1031 = vmatpush3.bf16.msra.mxu0 %v1128_v58 }
  0x35   :  { %1059 = vmatpush3.bf16.msra.mxu1 %v1129_v59  ;;  %1032 = vmatprep.subr.bf16.mxu0 %v1130_v3 }
  0x36   :  { %1060 = vmatprep.subr.bf16.mxu1 %v1131_v5 }
  0x38   :  { %1033 = vmatpush3.bf16.msra.mxu0 %v1132_v6 }
  0x39   :  { %1061 = vmatpush3.bf16.msra.mxu1 %v1133_v7  ;;  %1034 = vmatprep.subr.bf16.mxu0 %v1134_v8 }
  0x3a   :  { %1062 = vmatprep.subr.bf16.mxu1 %v1135_v9 }
  0x3c   :  { %1035 = vmatpush3.bf16.msra.mxu0 %v1136_v10 }
  0x3d   :  { %1063 = vmatpush3.bf16.msra.mxu1 %v1137_v11  ;;  %1036 = vmatprep.subr.bf16.mxu0 %v1138_v12 }
  0x3e   :  { %1064 = vmatprep.subr.bf16.mxu1 %v1139_v13 }
  0x40   :  { %1037 = vmatpush3.bf16.msra.mxu0 %v1140_v14 }
  0x41   :  { %1065 = vmatpush3.bf16.msra.mxu1 %v1141_v15 }
  0x43   :  { %766 = vmatmul.mubr.bf16.vlgmr.msra.gmra.mrb[8].mxu0 %v890_v20 }
  0x44   :  { %815 = vmatmul.mubr.bf16.vlgmr.msra.gmra.mrb[8].mxu1 %v892_v22  ;;  %773 = vmatprep.mubr.bf16.mxu0 %v899_v27 }
  0x45   :  { %822 = vmatprep.mubr.bf16.mxu1 %v901_v29 }
  0x4b   :  { %774 = vmatmul.mubr.bf16.gmra.mrb[12].mxu0 %v898_v30 }
  0x4c   :  { %823 = vmatmul.mubr.bf16.gmra.mrb[12].mxu1 %v900_v31 }
  0xf6   :  { %v982_v32 = vpop.f32.mrb[0].mxu0 }
  0xf7   :  { %v1010_v33 = vpop.f32.mrb[0].mxu1  ;;  %v983_v34 = vpop.f32.mrb[1].mxu0 }
  0xf8   :  { %v984_v35 = vadd.f32 %v983_v34, %v982_v32  ;;  %v1011_v36 = vpop.f32.mrb[1].mxu1  ;;  %v985_v37 = vpop.f32.mrb[2].mxu0 }
  0xf9   :  { %v1012_v38 = vadd.f32 %v1011_v36, %v1010_v33  ;;  %v1013_v39 = vpop.f32.mrb[2].mxu1  ;;  %v986_v40 = vpop.f32.mrb[3].mxu0 }
  0xfa   :  { %v987_v41 = vadd.f32 %v986_v40, %v985_v37  ;;  %v1014_v42 = vpop.f32.mrb[3].mxu1 }
  0xfb   :  { %v719_v43 = vadd.f32 %v1012_v38, %v984_v35  ;;  %v1015_v44 = vadd.f32 %v1014_v42, %v1013_v39 }
  0xfd   :  { %v722_v45 = vadd.f32 %v1015_v44, %v987_v41 }
  0xfe   :  { %v988_v46 = vpop.f32.mrb[4].mxu0 }
  0xff   :  { %v1016_v47 = vpop.f32.mrb[4].mxu1  ;;  %v989_v48 = vpop.f32.mrb[5].mxu0 }
 0x100   :  { %v990_v49 = vadd.f32 %v989_v48, %v988_v46  ;;  %v1017_v50 = vpop.f32.mrb[5].mxu1  ;;  %v991_v51 = vpop.f32.mrb[6].mxu0 }
 0x101   :  { %v1018_v52 = vadd.f32 %v1017_v50, %v1016_v47  ;;  %v1019_v53 = vpop.f32.mrb[6].mxu1  ;;  %v992_v54 = vpop.f32.mrb[7].mxu0 }
 0x102   :  { %v993_v55 = vadd.f32 %v992_v54, %v991_v51  ;;  %v1020_v56 = vpop.f32.mrb[7].mxu1 }
 0x103   :  { %v727_v57 = vadd.f32 %v1018_v52, %v990_v49  ;;  %v1021_v58 = vadd.f32 %v1020_v56, %v1019_v53 }
 0x105   :  { %v730_v59 = vadd.f32 %v1021_v58, %v993_v55 }
 0x116   :  { %v1038_v60 = vpop.f32.mrb[8].mxu0 }
 0x117   :  { %v1066_v61 = vpop.f32.mrb[8].mxu1  ;;  %v1039_v62 = vpop.f32.mrb[9].mxu0 }
 0x118   :  { %v1067_v63 = vpop.f32.mrb[9].mxu1  ;;  %v1040_v0 = vadd.f32 %v1039_v62, %v1038_v60  ;;  %v1041_v2 = vpop.f32.mrb[10].mxu0 }
 0x119   :  { %v1068_v1 = vadd.f32 %v1067_v63, %v1066_v61  ;;  %v1069_v3 = vpop.f32.mrb[10].mxu1  ;;  %v1042_v4 = vpop.f32.mrb[11].mxu0 }
 0x11a   :  { %v1070_v5 = vpop.f32.mrb[11].mxu1  ;;  %v768_v6 = vadd.f32 %v1040_v0, %v719_v43  ;;  %v1043_v7 = vadd.f32 %v1042_v4, %v1041_v2 }
 0x11b   :  { %v1071_v8 = vadd.f32 %v1070_v5, %v1069_v3 }
 0x11c   :  { %v817_v9 = vadd.f32 %v1068_v1, %v768_v6  ;;  %v771_v10 = vadd.f32 %v1043_v7, %v722_v45 }
 0x11e   :  { %846 = vst [vmem:[%s1427_s2] sm:$0xff] %v817_v9  ;;  %v820_v11 = vadd.f32 %v1071_v8, %v771_v10  ;;  %v1044_v12 = vpop.f32.mrb[12].mxu0  ;;  %v860_v14 = vmul.f32 %v817_v9, %v817_v9 }
 0x11f   :  { %v1072_v13 = vpop.f32.mrb[12].mxu1  ;;  %v1045_v15 = vpop.f32.mrb[13].mxu0 }
 0x120   :  { %v1073_v16 = vpop.f32.mrb[13].mxu1  ;;  %847 = vst [vmem:[%s1427_s2 + $0x8] sm:$0xff] %v820_v11  ;;  %v850_v17 = vadd.f32 %v820_v11, %v817_v9  ;;  %v861_v18 = vmul.f32 %v820_v11, %v820_v11  ;;  %v1046_v19 = vadd.f32 %v1045_v15, %v1044_v12  ;;  %v1047_v21 = vpop.f32.mrb[14].mxu0 }
 0x121   :  { %v1074_v20 = vadd.f32 %v1073_v16, %v1072_v13  ;;  %v1075_v22 = vpop.f32.mrb[14].mxu1  ;;  %v1048_v23 = vpop.f32.mrb[15].mxu0 }
 0x122   :  { %v1076_v24 = vpop.f32.mrb[15].mxu1  ;;  %v864_v25 = vadd.f32 %v861_v18, %v860_v14  ;;  %v776_v26 = vadd.f32 %v1046_v19, %v727_v57  ;;  %v1049_v27 = vadd.f32 %v1048_v23, %v1047_v21 }
 0x123   :  { %v1077_v28 = vadd.f32 %v1076_v24, %v1075_v22 }
 0x124   :  { %v825_v29 = vadd.f32 %v1074_v20, %v776_v26  ;;  %v779_v30 = vadd.f32 %v1049_v27, %v730_v59 }
 0x126   :  { %848 = vst [vmem:[%s1427_s2 + $0x10] sm:$0xff] %v825_v29  ;;  %v851_v31 = vadd.f32 %v850_v17, %v825_v29  ;;  %v862_v32 = vmul.f32 %v825_v29, %v825_v29  ;;  %v828_v33 = vadd.f32 %v1077_v28, %v779_v30 }
 0x128   :  { %v865_v34 = vadd.f32 %v864_v25, %v862_v32  ;;  %849 = vst [vmem:[%s1427_s2 + $0x18] sm:$0xff] %v828_v33  ;;  %v852_v35 = vadd.f32 %v851_v31, %v828_v33  ;;  %v863_v36 = vmul.f32 %v828_v33, %v828_v33 }
 0x12a   :  { %v853_v37 = vrot.slane %v852_v35, 4  ;;  %v866_v38 = vadd.f32 %v865_v34, %v863_v36 }
 0x12c   :  { %v854_v39 = vadd.f32 %v853_v37, %v852_v35  ;;  %v867_v40 = vrot.slane %v866_v38, 4 }
 0x12e   :  { %v855_v41 = vrot.slane %v854_v39, 2  ;;  %v868_v42 = vadd.f32 %v867_v40, %v866_v38 }
 0x130   :  { %v856_v43 = vadd.f32 %v855_v41, %v854_v39  ;;  %v869_v44 = vrot.slane %v868_v42, 2 }
 0x132   :  { %v857_v45 = vrot.slane %v856_v43, 1  ;;  %v870_v46 = vadd.f32 %v869_v44, %v868_v42 }
 0x134   :  { %v858_v47 = vadd.f32 %v857_v45, %v856_v43  ;;  %v871_v48 = vrot.slane %v870_v46, 1 }
 0x136   :  { %859 = vst [vmem:[%s1428_s3] sm:$0x1] %v858_v47  ;;  %v872_v49 = vadd.f32 %v871_v48, %v870_v46 }
 0x138   :  { %873 = vst [vmem:[%s1429_s4] sm:$0x1] %v872_v49 }

// kernel: encoder_forward.24
= control target key start
LH: loop header
LB: loop body
LE: loop exit
PB: predicated region body
PF: predicated region fallthrough
CT: control target
= control target key end

     0   :  { %vm42_vm0 = vcmask 523264   ;;  %s355_s2 = inlined_call_operand.vmem [shape: f32[64,128], index: 2, kind: input, shape index: {}]   ;;  %s356_s1 = inlined_call_operand.vmem [shape: f32[32,64], index: 1, kind: input, shape index: {}]   ;;  %s357_s0 = inlined_call_operand.vmem [shape: f32[32,128], index: 0, kind: input, shape index: {}]   ;;  %s358_s4 = inlined_call_operand.vmem [shape: f32[1,128], index: 4, kind: input, shape index: {}]   ;;  %s359_s5 = inlined_call_operand.vmem [shape: f32[1,128], index: 5, kind: input, shape index: {}]   ;;  %s360_s3 = inlined_call_operand.vmem [shape: f32[1,128], index: 3, kind: input, shape index: {}]   ;;  %s361_s6 = inlined_call_operand.vmem [shape: f32[32,128], index: 6, kind: output, shape index: {}]  }
   0x1   :  { %v27_v0 = vld [vmem:[%s355_s2] sm:$0xff]  ;;  %v28_v1 = vld [vmem:[%s355_s2 + $0x8] sm:$0xff]  ;;  %v29_v2 = vld [vmem:[%s355_s2 + $0x10] sm:$0xff] }
   0x2   :  { %v223_v3 = vpack.c.bf16 %v28_v1, %v27_v0  ;;  %v30_v4 = vld [vmem:[%s355_s2 + $0x18] sm:$0xff]  ;;  %v31_v6 = vld [vmem:[%s355_s2 + $0x20] sm:$0xff]  ;;  %v32_v7 = vld [vmem:[%s355_s2 + $0x28] sm:$0xff] }
   0x3   :  { %v227_v5 = vpack.c.bf16 %v30_v4, %v29_v2  ;;  %v23_v8 = vld [vmem:[%s356_s1] sm:$0xff]  ;;  %v25_v9 = vld [vmem:[%s356_s1 + $0x10] sm:$0xff]  ;;  %v231_v10 = vpack.c.bf16 %v32_v7, %v31_v6  ;;  %v34_v12 = vld [vmem:[%s355_s2 + $0x38] sm:$0xff] }
   0x4   :  { %224 = vmatprep.subr.bf16.mxu0 %v223_v3  ;;  %239 = vmatprep.subr.bf16.mxu1 %v223_v3  ;;  %v33_v11 = vld [vmem:[%s355_s2 + $0x30] sm:$0xff]  ;;  %v24_v14 = vld [vmem:[%s356_s1 + $0x8] sm:$0xff]  ;;  %v26_v15 = vld [vmem:[%s356_s1 + $0x18] sm:$0xff] }
   0x5   :  { %226 = vmatpush3.bf16.msra.mxu0 %v223_v3  ;;  %243 = vmatpush3.bf16.msra.mxu1 %v223_v3  ;;  %v235_v13 = vpack.c.bf16 %v34_v12, %v33_v11  ;;  %v141_v16 = vld [vmem:[%s357_s0 + $0x8] sm:$0xff]  ;;  %v187_v17 = vld [vmem:[%s358_s4] ss:$0 sm:$0xff]  ;;  %v143_v18 = vld [vmem:[%s357_s0 + $0x18] sm:$0xff] }
   0x6   :  { %228 = vmatprep.subr.bf16.mxu0 %v227_v5  ;;  %240 = vmatprep.subr.bf16.mxu1 %v227_v5  ;;  %v140_v19 = vld [vmem:[%s357_s0] sm:$0xff]  ;;  %v142_v20 = vld [vmem:[%s357_s0 + $0x10] sm:$0xff]  ;;  %v152_v21 = vmul.f32 %v187_v17, %v141_v16  ;;  %v154_v22 = vmul.f32 %v187_v17, %v143_v18 }
   0x7   :  { %217 = vmatprep.mubr.msk.f32.mxu0 %vm42_vm0, %v23_v8  ;;  %220 = vmatprep.mubr.msk.f32.mxu1 %vm42_vm0, %v25_v9  ;;  %v188_v23 = vld [vmem:[%s359_s5] ss:$0 sm:$0xff]  ;;  %v151_v24 = vmul.f32 %v187_v17, %v140_v19  ;;  %v153_v25 = vmul.f32 %v187_v17, %v142_v20 }
   0x8   :  { %v182_v26 = vld [vmem:[%s360_s3] ss:$0 sm:$0xff]  ;;  %v163_v27 = vadd.f32 %v188_v23, %v152_v21  ;;  %v165_v28 = vadd.f32 %v188_v23, %v154_v22 }
   0x9   :  { %230 = vmatpush3.bf16.msra.mxu0 %v227_v5  ;;  %244 = vmatpush3.bf16.msra.mxu1 %v227_v5  ;;  %v162_v31 = vadd.f32 %v188_v23, %v151_v24  ;;  %v164_v32 = vadd.f32 %v188_v23, %v153_v25 }
   0xa   :  { %232 = vmatprep.subr.bf16.mxu0 %v231_v10  ;;  %241 = vmatprep.subr.bf16.mxu1 %v231_v10 }
   0xd   :  { %234 = vmatpush3.bf16.msra.mxu0 %v231_v10  ;;  %245 = vmatpush3.bf16.msra.mxu1 %v231_v10 }
   0xe   :  { %236 = vmatprep.subr.bf16.mxu0 %v235_v13  ;;  %242 = vmatprep.subr.bf16.mxu1 %v235_v13 }
  0x11   :  { %238 = vmatpush3.bf16.msra.mxu0 %v235_v13  ;;  %246 = vmatpush3.bf16.msra.mxu1 %v235_v13 }
  0x14   :  { %218 = vmatmul.mubr.msk.f32.vlgmr.msra.gmra.mrb[0].mxu0 %vm42_vm0, %v24_v14  ;;  %221 = vmatmul.mubr.msk.f32.vlgmr.msra.gmra.mrb[0].mxu1 %vm42_vm0, %v26_v15 }
  0xe7   :  { %v219_v29 = vpop.f32.mrb[0].mxu0  ;;  %v222_v30 = vpop.f32.mrb[0].mxu1 }
  0xe8   :  { %v127_v33 = vadd.f32 %v219_v29, %v182_v26  ;;  %v137_v34 = vadd.f32 %v222_v30, %v182_v26  ;;  %v121_v35 = vpop.f32.mrb[1].mxu0  ;;  %v131_v36 = vpop.f32.mrb[1].mxu1 }
  0xe9   :  { %v122_v37 = vadd.f32 %v182_v26, %v121_v35  ;;  %v132_v38 = vadd.f32 %v182_v26, %v131_v36 }
  0xea   :  { %v167_v39 = vadd.f32 %v163_v27, %v127_v33  ;;  %v169_v40 = vadd.f32 %v165_v28, %v137_v34 }
  0xeb   :  { %v166_v41 = vadd.f32 %v162_v31, %v122_v37  ;;  %v168_v42 = vadd.f32 %v164_v32, %v132_v38 }
  0xec   :  { %v171_v43 = vmax.f32 %v167_v39, 0.0  ;;  %v173_v44 = vmax.f32 %v169_v40, 0.0 }
  0xed   :  { %v170_v45 = vmax.f32 %v166_v41, 0.0  ;;  %v172_v46 = vmax.f32 %v168_v42, 0.0 }
  0xee   :  { %175 = vst [vmem:[%s361_s6 + $0x8] sm:$0xff] %v171_v43  ;;  %177 = vst [vmem:[%s361_s6 + $0x18] sm:$0xff] %v173_v44 }
  0xef   :  { %174 = vst [vmem:[%s361_s6] sm:$0xff] %v170_v45  ;;  %176 = vst [vmem:[%s361_s6 + $0x10] sm:$0xff] %v172_v46 }

// kernel: encoder_forward.23
= control target key start
LH: loop header
LB: loop body
LE: loop exit
PB: predicated region body
PF: predicated region fallthrough
CT: control target
= control target key end

     0   :  { %vm77_vm0 = vcmask 588800   ;;  %vm84_vm1 = vcmask 1043456   ;;  %s294_s1 = inlined_call_operand.vmem [shape: bf16[72,128], index: 1, kind: input, shape index: {}]   ;;  %s295_s0 = inlined_call_operand.vmem [shape: bf16[32,72], index: 0, kind: input, shape index: {}]   ;;  %s296_s2 = inlined_call_operand.vmem [shape: f32[32,128], index: 2, kind: output, shape index: {0}]   ;;  %s297_s3 = inlined_call_operand.vmem [shape: f32[1,128], index: 3, kind: output, shape index: {1}]   ;;  %s298_s4 = inlined_call_operand.vmem [shape: f32[1,128], index: 4, kind: output, shape index: {2}]  }
   0x1   :  { %v223_v0 = vld [vmem:[%s294_s1] sm:$0xff]   ;;  %v224_v1 = vld [vmem:[%s294_s1 + $0x8] sm:$0xff]   ;;  %v225_v2 = vld [vmem:[%s294_s1 + $0x10] sm:$0xff]  }
   0x2   :  { %208 = vmatprep.subr.bf16.mxu0 %v223_v0  ;;  %v228_v3 = vld [vmem:[%s295_s0] sm:$0xff]   ;;  %v226_v4 = vld [vmem:[%s294_s1 + $0x18] sm:$0xff]   ;;  %v229_v7 = vld [vmem:[%s295_s0 + $0x8] sm:$0xff]  }
   0x3   :  { %209 = vmatpush3.bf16.msra.mxu0 %v223_v0  ;;  %218 = vmatprep.mubr.msk.bf16.mxu0 %vm77_vm0, %v228_v3  ;;  %v227_v5 = vld [vmem:[%s294_s1 + $0x20] ss:$0 sps:$4 sm:$0xff]  }
   0x4   :  { %210 = vmatprep.subr.bf16.mxu0 %v224_v1  ;;  %v86_v6 = vsel %vm84_vm1, %v227_v5, 0 }
   0x7   :  { %211 = vmatpush3.bf16.msra.mxu0 %v224_v1 }
   0x8   :  { %212 = vmatprep.subr.bf16.mxu0 %v225_v2 }
   0xb   :  { %213 = vmatpush3.bf16.msra.mxu0 %v225_v2 }
   0xc   :  { %214 = vmatprep.subr.bf16.mxu0 %v226_v4 }
   0xf   :  { %215 = vmatpush3.bf16.msra.mxu0 %v226_v4 }
  0x10   :  { %222 = vmatprep.subr.msk.bf16.mxu0 %vm84_vm1, %v227_v5 }
  0x13   :  { %217 = vmatpush3.bf16.msra.mxu0 %v86_v6 }
  0x16   :  { %219 = vmatmul.mubr.msk.bf16.vlgmr.msra.gmra.mrb[0].mxu0 %vm77_vm0, %v229_v7 }
  0xe9   :  { %v220_v8 = vpop.f32.mrb[0].mxu0 }
  0xea   :  { %154 = vst [vmem:[%s296_s2 + $0x10] sm:$0xff] %v220_v8  ;;  %v122_v9 = vpop.f32.mrb[1].mxu0  ;;  %v168_v15 = vmul.f32 %v220_v8, %v220_v8 }
  0xeb   :  { %152 = vst [vmem:[%s296_s2] sm:$0xff] %v122_v9  ;;  %v221_v10 = vpop.f32.mrb[2].mxu0  ;;  %v166_v12 = vmul.f32 %v122_v9, %v122_v9 }
  0xec   :  { %155 = vst [vmem:[%s296_s2 + $0x18] sm:$0xff] %v221_v10  ;;  %v125_v11 = vpop.f32.mrb[3].mxu0  ;;  %v169_v18 = vmul.f32 %v221_v10, %v221_v10 }
  0xed   :  { %153 = vst [vmem:[%s296_s2 + $0x8] sm:$0xff] %v125_v11  ;;  %v156_v13 = vadd.f32 %v125_v11, %v122_v9  ;;  %v167_v14 = vmul.f32 %v125_v11, %v125_v11 }
  0xef   :  { %v157_v16 = vadd.f32 %v220_v8, %v156_v13  ;;  %v170_v17 = vadd.f32 %v167_v14, %v166_v12 }
  0xf1   :  { %v158_v19 = vadd.f32 %v221_v10, %v157_v16  ;;  %v171_v20 = vadd.f32 %v170_v17, %v168_v15 }
  0xf3   :  { %v159_v21 = vrot.slane %v158_v19, 4  ;;  %v172_v22 = vadd.f32 %v171_v20, %v169_v18 }
  0xf5   :  { %v160_v23 = vadd.f32 %v159_v21, %v158_v19  ;;  %v173_v24 = vrot.slane %v172_v22, 4 }
  0xf7   :  { %v161_v25 = vrot.slane %v160_v23, 2  ;;  %v174_v26 = vadd.f32 %v173_v24, %v172_v22 }
  0xf9   :  { %v162_v27 = vadd.f32 %v161_v25, %v160_v23  ;;  %v175_v28 = vrot.slane %v174_v26, 2 }
  0xfb   :  { %v163_v29 = vrot.slane %v162_v27, 1  ;;  %v176_v30 = vadd.f32 %v175_v28, %v174_v26 }
  0xfd   :  { %v164_v31 = vadd.f32 %v163_v29, %v162_v27  ;;  %v177_v32 = vrot.slane %v176_v30, 1 }
  0xff   :  { %165 = vst [vmem:[%s297_s3] sm:$0x1] %v164_v31  ;;  %v178_v33 = vadd.f32 %v177_v32, %v176_v30 }
 0x101   :  { %179 = vst [vmem:[%s298_s4] sm:$0x1] %v178_v33 }

// kernel: encoder_forward.25
= control target key start
LH: loop header
LB: loop body
LE: loop exit
PB: predicated region body
PF: predicated region fallthrough
CT: control target
= control target key end

     0   :  { %vm13_vm0 = vcmask 517120   ;;  %vm20_vm1 = vcmask 523264   ;;  %v93_v3 = vmov 0.0   ;;  %s132_s0 = inlined_call_operand.vmem [shape: f32[2,16,64], index: 0, kind: input, shape index: {}]   ;;  %s133_s1 = inlined_call_operand.hbm [shape: f32[2,64], index: 1, kind: output, shape index: {}]  }
   0x1   :  { %v16_v0 = vld [vmem:[%s132_s0] sm:$0xff]  ;;  %v17_v1 = vld [vmem:[%s132_s0 + $0x8] sm:$0xff]  ;;  %v18_v2 = vld [vmem:[%s132_s0 + $0x10] sm:$0xff]  ;;  %14 = vst.msk [vmem:[#allocation2] sm:$0x3] %vm13_vm0, %v93_v3 }
   0x2   :  { %v19_v4 = vld [vmem:[%s132_s0 + $0x18] sm:$0xff]  ;;  %v21_v5 = vsel %vm20_vm1, %v16_v0, 0.0  ;;  %v22_v6 = vsel %vm20_vm1, %v17_v1, 0.0  ;;  %v30_v7 = vsel %vm20_vm1, %v18_v2, 0.0 }
   0x3   :  { %v23_v8 = vadd.f32 %v22_v6, %v21_v5  ;;  %v31_v9 = vsel %vm20_vm1, %v19_v4, 0.0 }
   0x4   :  { %6 = vsyncpa [#allocation3], 0  ;;  %v32_v10 = vadd.f32 %v31_v9, %v30_v7  ;;  %vm41_vm2 = vcmask 1041409   ;;  %s94_s0 = smov [#allocation2]  }
   0x5   :  { %v24_v11 = vrot.slane %v23_v8, 4  ;;  %s59_s14 = sshll.u32 %s94_s0, 4  ;;  %s60_s14 = int_to_ptr.vmem [resolvable:$true] %s59_s14 }
   0x6   :  { %v33_v12 = vrot.slane %v32_v10, 4  ;;  %s69_s15 = scalar_lea.vmem %s60_s14, 32  ;;  %p74_p1 = scmp.lt.s32.totalorder %s60_s14, %s60_s14 }
   0x7   :  { %v25_v13 = vadd.f32 %v24_v11, %v23_v8  ;;  %p70_p0 = scmp.ne.s32.totalorder %s60_s14, %s69_s15  ;;  %p75_p2 = scmp.lt.s32.totalorder %s69_s15, %s69_s15 }
   0x8   :  { %v34_v14 = vadd.f32 %v33_v12, %v32_v10  ;;  %v15_v22 = vld [vmem:[#allocation2] sm:$0x3] }
   0x9   :  { %v26_v15 = vrot.slane %v25_v13, 2  ;;  %p76_p3 = por %p75_p2, %p74_p1 }
   0xa   :  { %v35_v16 = vrot.slane %v34_v14, 2 }
   0xb   :  { %v27_v17 = vadd.f32 %v26_v15, %v25_v13  ;;  %p77_p4 = pnand %p76_p3, %p70_p0 }
   0xc   :  { %v36_v18 = vadd.f32 %v35_v16, %v34_v14 }
   0xd   :  { %v28_v19 = vrot.slane %v27_v17, 1 }
   0xe   :  { %v37_v20 = vrot.slane %v36_v18, 1 }
   0xf   :  { %v29_v21 = vadd.f32 %v28_v19, %v27_v17 }
  0x10   :  { %v38_v23 = vadd.f32 %v37_v20, %v36_v18 }
  0x12   :  { %v42_v24 = vsel %vm41_vm2, %v38_v23, %v29_v21 }
  0x13   :  { %v44_v25 = vadd.f32 %v42_v24, %v15_v22 }
  0x15   :  { %46 = vst.msk [vmem:[#allocation2] sm:$0x3] %vm13_vm0, %v44_v25 }
  0x1c   :  { %v50_v26 = vld [vmem:[#allocation2] sm:$0x3] }
  0x1d   :  { %v51_v27 = vmul.f32 0.0625, %v50_v26 }
  0x1f   :  { %52 = vst.msk [vmem:[#allocation2] sm:$0x3] %vm13_vm0, %v51_v27 }
  0x20   :  { %80 = shalt.err (!%p77_p4)
}
  0x21   :  { %s81_s18 = scalar_lea.hbm %s133_s1, 32 }
  0x22   :  { %p82_p5 = scmp.ne.s32.totalorder %s133_s1, %s81_s18  ;;  %p85_p6 = scmp.lt.u32.totalorder %s81_s18, %s133_s1 }
  0x24   :  { %p87_p7 = pnand %p85_p6, %p82_p5 }
  0x26   :  { %90 = shalt.err (!%p87_p7)
}
  0x27   :  { %62 = dma.vmem_to_hbm [thread:$0]  %s60_s14, 32, %s133_s1, [#allocation3]  }
  0x28   :  { %91 = dma.done.wait [#allocation3], 32  }
  0x29   :  { %92 = vsyncadd [#allocation3], 4294967264 }
  0x2a   :  { %66 = vsyncpa [#allocation3], 1 }

</bundles_post_ra>
